<compile_context>
chip_gen: v7x
topology: tpu7x:2x2x1
jax: 0.10.0
libtpu: 0.0.40
codegen_flags: <defaults>
</compile_context>

<pallas_src>
import math

import jax
import jax.numpy as jnp
from jax import lax
from jax.experimental import pallas as pl
from jax.experimental.pallas import tpu as pltpu

LN_EPS = 1e-5  # nn.Transformer default layer_norm_eps


def _round_up(x, m):
    return (x + m - 1) // m * m


# ----------------------------- fused Pallas kernel ---------------------------

def _make_fused_kernel(num_layers, d_model, vec_idx):
    """Fused forward kernel for a fixed layer count / packed-weight layout."""
    L, D = num_layers, d_model
    f32, bf16 = jnp.float32, jnp.bfloat16

    def kernel(src_ref, w_in_ref, attn_w_ref, ca_w_ref, ff1_w_ref, ff2_w_ref,
               ff1_b_ref, vec_ref, w_out_ref, b_out_ref, out_ref):

        def vec(name):
            i = vec_idx[name]                      # static python int
            return vec_ref[pl.ds(i, 1), :]         # (1, D), broadcasts over rows

        def layernorm(z, g, b):
            mean = jnp.mean(z, axis=-1, keepdims=True)
            var = jnp.mean((z - mean) ** 2, axis=-1, keepdims=True)
            return (z - mean) * lax.rsqrt(var + LN_EPS) * vec(g) + vec(b)

        def attn(x, slab, bname):
            # folded seq_len==1 attention: x @ (Wv@Wo) + (bv@Wo + bo)
            return jnp.dot(x, attn_w_ref[slab], preferred_element_type=f32) + vec(bname)

        def ff(x, slab, b2name):
            # bf16 MXU operands, f32 accumulation, f32 elementwise
            h = jnp.dot(x.astype(bf16), ff1_w_ref[slab], preferred_element_type=f32)
            h = jnp.maximum(h + ff1_b_ref[pl.ds(slab, 1), :], 0.0)
            y = jnp.dot(h.astype(bf16), ff2_w_ref[slab], preferred_element_type=f32)
            return y + vec(b2name)

        # input projection
        x = jnp.dot(src_ref[...], w_in_ref[...], preferred_element_type=f32) + vec("in_b")

        # ---------------- encoder (post-LN) ----------------
        mem = x
        for l in range(L):
            mem = layernorm(mem + attn(mem, l, f"enc{l}_sa_b"),
                            f"enc{l}_ln1_g", f"enc{l}_ln1_b")
            mem = layernorm(mem + ff(mem, l, f"enc{l}_ff2_b"),
                            f"enc{l}_ln2_g", f"enc{l}_ln2_b")
        mem = layernorm(mem, "enc_norm_g", "enc_norm_b")

        # all decoder cross-attentions in ONE lane-dense (N, D*L) matmul, then split
        cross_all = jnp.dot(mem, ca_w_ref[...], preferred_element_type=f32)
        cross = [cross_all[:, l * D:(l + 1) * D] + vec(f"dec{l}_ca_b")
                 for l in range(L)]

        # ---------------- decoder (post-LN) ----------------
        y = x
        for l in range(L):
            y = layernorm(y + attn(y, L + l, f"dec{l}_sa_b"),
                          f"dec{l}_ln1_g", f"dec{l}_ln1_b")
            y = layernorm(y + cross[l], f"dec{l}_ln2_g", f"dec{l}_ln2_b")
            y = layernorm(y + ff(y, L + l, f"dec{l}_ff2_b"),
                          f"dec{l}_ln3_g", f"dec{l}_ln3_b")
        y = layernorm(y, "dec_norm_g", "dec_norm_b")

        # lane-dense (padded to 128 cols) output projection: the only HBM store
        out_ref[...] = (jnp.dot(y, w_out_ref[...], preferred_element_type=f32)
                        + b_out_ref[...])

    return kernel


# ----------------------------- weight packing ---------------------------------

def prepare_params(params):
    """Fold seq_len==1 attention offline and pack weights into a few VMEM slabs."""
    f32 = jnp.float32
    w_in, b_in = params["in_proj"]
    L = len(params["enc_layers"])
    D = w_in.shape[1]

    def fold(p):   # exact: (kv@Wv+bv)@Wo+bo == kv@(Wv@Wo) + (bv@Wo+bo)
        return jnp.dot(p["wv"], p["wo"]), jnp.dot(p["bv"], p["wo"]) + p["bo"]

    rows, vec_idx = [], {}

    def add(name, v):
        vec_idx[name] = len(rows)
        rows.append(jnp.reshape(v, (D,)).astype(f32))

    attn_ws, ff1_ws, ff2_ws, ff1_bs, ca_ws = [], [], [], [], []

    add("in_b", b_in)
    for l, p in enumerate(params["enc_layers"]):
        w_sa, b_sa = fold(p["sa"])
        attn_ws.append(w_sa); add(f"enc{l}_sa_b", b_sa)
        add(f"enc{l}_ln1_g", p["ln1"][0]); add(f"enc{l}_ln1_b", p["ln1"][1])
        ff1_ws.append(p["ff1"][0]); ff1_bs.append(jnp.reshape(p["ff1"][1], (-1,)))
        ff2_ws.append(p["ff2"][0]); add(f"enc{l}_ff2_b", p["ff2"][1])
        add(f"enc{l}_ln2_g", p["ln2"][0]); add(f"enc{l}_ln2_b", p["ln2"][1])
    add("enc_norm_g", params["enc_norm"][0]); add("enc_norm_b", params["enc_norm"][1])

    for l, p in enumerate(params["dec_layers"]):
        w_sa, b_sa = fold(p["sa"])
        attn_ws.append(w_sa); add(f"dec{l}_sa_b", b_sa)
        add(f"dec{l}_ln1_g", p["ln1"][0]); add(f"dec{l}_ln1_b", p["ln1"][1])
        w_ca, b_ca = fold(p["ca"])
        ca_ws.append(w_ca); add(f"dec{l}_ca_b", b_ca)
        add(f"dec{l}_ln2_g", p["ln2"][0]); add(f"dec{l}_ln2_b", p["ln2"][1])
        ff1_ws.append(p["ff1"][0]); ff1_bs.append(jnp.reshape(p["ff1"][1], (-1,)))
        ff2_ws.append(p["ff2"][0]); add(f"dec{l}_ff2_b", p["ff2"][1])
        add(f"dec{l}_ln3_g", p["ln3"][0]); add(f"dec{l}_ln3_b", p["ln3"][1])
    add("dec_norm_g", params["dec_norm"][0]); add("dec_norm_b", params["dec_norm"][1])

    w_out, b_out = params["out_proj"]
    out_dim = w_out.shape[1]
    out_pad = max(128, _round_up(out_dim, 128))           # lane-dense output store
    w_out_p = jnp.zeros((D, out_pad), f32).at[:, :out_dim].set(w_out)
    b_out_p = jnp.zeros((1, out_pad), f32).at[:, :out_dim].set(
        jnp.reshape(b_out, (1, -1)))

    return dict(
        num_layers=L, d_model=D, out_dim=out_dim,
        w_in=w_in.astype(f32),                             # (input_dim, D)
        attn_w=jnp.stack(attn_ws).astype(f32),             # (2L, D, D) folded self-attn
        ca_w=jnp.concatenate(ca_ws, axis=1).astype(f32),   # (D, D*L)   folded cross-attn
        ff1_w=jnp.stack(ff1_ws).astype(jnp.bfloat16),      # (2L, D, FF) bf16
        ff2_w=jnp.stack(ff2_ws).astype(jnp.bfloat16),      # (2L, FF, D) bf16
        ff1_b=jnp.stack(ff1_bs).astype(f32),               # (2L, FF)
        vec64=jnp.stack(rows),                             # (M, D) all 64-wide params
        w_out=w_out_p, b_out=b_out_p,                      # padded to 128 lanes
        vec_idx=vec_idx,                                   # static name -> row index
    )


# ----------------------------- pallas_call glue ------------------------------

def transformer_forward(packed, src, *, tile_n=None):
    n, input_dim = src.shape
    D, L = packed["d_model"], packed["num_layers"]
    out_pad = packed["w_out"].shape[1]

    if tile_n is None:
        # 256 keeps (tile_n,2048) f32 FF activation (+ ~4.5 MB double-buffered
        # weights) well inside v7x's 64 MiB VMEM; v5e/v6e have 128 MiB.
        tile_n = min(256, _round_up(max(n, 8), 8))
    n_pad = _round_up(n, tile_n)
    if n_pad != n:
        src = jnp.pad(src, ((0, n_pad - n), (0, 0)))
    grid = (n_pad // tile_n,)

    weights = [packed[k] for k in ("w_in", "attn_w", "ca_w", "ff1_w", "ff2_w",
                                   "ff1_b", "vec64", "w_out", "b_out")]

    def const_spec(a):
        nd = a.ndim

        def imap(i):
            return (0,) * nd
        return pl.BlockSpec(a.shape, imap)          # resident across grid steps

    ff_dim = packed["ff1_w"].shape[2]
    matmul_km = (input_dim * D
                 + 2 * L * (D * D + 2 * D * ff_dim)   # enc + dec self-attn / FF
                 + D * (D * L)                        # fused cross-attn
                 + D * out_pad)                       # padded output projection
    weight_bytes = sum(a.size * a.dtype.itemsize for a in weights)
    cost = pl.CostEstimate(
        flops=2 * n_pad * matmul_km,
        transcendentals=n_pad * (5 * L + 2),          # one rsqrt per LayerNorm row
        bytes_accessed=weight_bytes + n_pad * (input_dim + out_pad) * 4,
    )

    out = pl.pallas_call(
        _make_fused_kernel(L, D, packed["vec_idx"]),
        out_shape=jax.ShapeDtypeStruct((n_pad, out_pad), jnp.float32),
        grid=grid,
        in_specs=[pl.BlockSpec((tile_n, input_dim), lambda i: (i, 0))]
                 + [const_spec(a) for a in weights],
        out_specs=pl.BlockSpec((tile_n, out_pad), lambda i: (i, 0)),
        compiler_params=pltpu.CompilerParams(
            # Row grid is embarrassingly parallel -> megacore sharding on v7x.
            dimension_semantics=("parallel",),
            # Packed resident weights ~2.2 MB (bf16 FF) -> ~4.5 MB double-buffered,
            # + (tile_n,2048) f32 FF activation (~2 MB at tile_n=256) + src/out
            # tiles: 32 MiB leaves ample headroom on every generation (incl. the
            # 64 MiB physical VMEM of v7x).
            vmem_limit_bytes=32 * 1024 * 1024,
        ),
        cost_estimate=cost,
    )(src, *weights)

    return out[:n, :packed["out_dim"]]


# ----------------------------- parameters ------------------------------------

def init_params(key, input_dim, output_dim, d_model=64, nhead=4,
                num_layers=2, dim_feedforward=2048):
    del nhead  # head count does not change the seq_len==1 result
    keys = iter(jax.random.split(key, 512))

    def lin(fan_in, fan_out):
        lim = 1.0 / math.sqrt(fan_in)
        w = jax.random.uniform(next(keys), (fan_in, fan_out), jnp.float32, -lim, lim)
        b = jax.random.uniform(next(keys), (1, fan_out), jnp.float32, -lim, lim)
        return w, b

    def ln():
        return (jnp.ones((1, d_model), jnp.float32),
                jnp.zeros((1, d_model), jnp.float32))

    def mha():
        # Only the V slice of in_proj and the out_proj affect the output when
        # seq_len == 1; Q/K projections cancel exactly, so they are not stored.
        wv, bv = lin(d_model, d_model)
        wo, bo = lin(d_model, d_model)
        return dict(wv=wv, bv=bv, wo=wo, bo=bo)

    enc_layers = [dict(sa=mha(), ln1=ln(),
                       ff1=lin(d_model, dim_feedforward),
                       ff2=lin(dim_feedforward, d_model),
                       ln2=ln())
                  for _ in range(num_layers)]
    dec_layers = [dict(sa=mha(), ln1=ln(),
                       ca=mha(), ln2=ln(),
                       ff1=lin(d_model, dim_feedforward),
                       ff2=lin(dim_feedforward, d_model),
                       ln3=ln())
                  for _ in range(num_layers)]

    return dict(in_proj=lin(input_dim, d_model),
                enc_layers=enc_layers, enc_norm=ln(),
                dec_layers=dec_layers, dec_norm=ln(),
                out_proj=lin(d_model, output_dim))


# ----------------------------- pure-JAX f32 reference ------------------------

def _mm(a, b):
    return jnp.dot(a, b, precision=lax.Precision.HIGHEST)


def _ln_ref(z, g, b):
    mean = jnp.mean(z, axis=-1, keepdims=True)
    var = jnp.mean((z - mean) ** 2, axis=-1, keepdims=True)
    return (z - mean) / jnp.sqrt(var + LN_EPS) * g + b


def _attn_ref(kv, p):
    v = _mm(kv, p["wv"]) + p["bv"]
    return _mm(v, p["wo"]) + p["bo"]


def transformer_forward_ref(params, src):
    x = _mm(src, params["in_proj"][0]) + params["in_proj"][1]
    mem = x
    for p in params["enc_layers"]:
        mem = _ln_ref(mem + _attn_ref(mem, p["sa"]), *p["ln1"])
        h = jnp.maximum(_mm(mem, p["ff1"][0]) + p["ff1"][1], 0.0)
        h = _mm(h, p["ff2"][0]) + p["ff2"][1]
        mem = _ln_ref(mem + h, *p["ln2"])
    mem = _ln_ref(mem, *params["enc_norm"])
    y = x
    for p in params["dec_layers"]:
        y = _ln_ref(y + _attn_ref(y, p["sa"]), *p["ln1"])
        y = _ln_ref(y + _attn_ref(mem, p["ca"]), *p["ln2"])
        h = jnp.maximum(_mm(y, p["ff1"][0]) + p["ff1"][1], 0.0)
        h = _mm(h, p["ff2"][0]) + p["ff2"][1]
        y = _ln_ref(y + h, *p["ln3"])
    y = _ln_ref(y, *params["dec_norm"])
    return _mm(y, params["out_proj"][0]) + params["out_proj"][1]


# ----------------------------- main -------------------------------------------

if __name__ == "__main__":
    INPUT_DIM, OUTPUT_DIM = 16, 8
    N = 8  # batch rows; nn.Transformer sees them as (seq=1, batch=N, d_model)

    root = jax.random.PRNGKey(0)
    k_x, k_p = jax.random.split(root)
    src = jax.random.normal(k_x, (N, INPUT_DIM), jnp.float32)
    params = init_params(k_p, INPUT_DIM, OUTPUT_DIM,
                         d_model=64, nhead=4, num_layers=2, dim_feedforward=2048)

    packed = prepare_params(params)           # offline fold + slab packing (once)
    fwd = jax.jit(lambda s: transformer_forward(packed, s))

    out = jax.block_until_ready(fwd(src))

    assert out.shape == (N, OUTPUT_DIM) and out.dtype == jnp.float32
    assert bool(jnp.all(jnp.isfinite(out)))

    ref = transformer_forward_ref(params, src)
    # bf16 FF weights (f32 accumulation) vs the full-f32 reference: expected
    # deviation is O(1e-3) on O(0.5)-magnitude outputs; 2e-2 catches any real bug.
    max_err = float(jnp.max(jnp.abs(out - ref)))
    assert bool(jnp.allclose(out, ref, atol=2e-2, rtol=2e-2)), (
        f"fused Pallas kernel disagrees with f32 reference (max|err|={max_err})")

    print("KERNEL_OK")
</pallas_src>

<mosaic_0001>
module attributes {stable_mosaic.version = 11 : i64} {
  func.func @kernel(%arg0: i32, %arg1: memref<8x16xf32, #tpu.memory_space<vmem>>, %arg2: memref<16x64xf32, #tpu.memory_space<vmem>>, %arg3: memref<4x64x64xf32, #tpu.memory_space<vmem>>, %arg4: memref<64x128xf32, #tpu.memory_space<vmem>>, %arg5: memref<4x64x2048xbf16, #tpu.memory_space<vmem>>, %arg6: memref<4x2048x64xbf16, #tpu.memory_space<vmem>>, %arg7: memref<4x2048xf32, #tpu.memory_space<vmem>>, %arg8: memref<35x64xf32, #tpu.memory_space<vmem>>, %arg9: memref<64x128xf32, #tpu.memory_space<vmem>>, %arg10: memref<1x128xf32, #tpu.memory_space<vmem>>, %arg11: memref<8x128xf32, #tpu.memory_space<vmem>>) attributes {dimension_semantics = [#tpu.dimension_semantics<parallel>], iteration_bounds = array<i64: 1>, scalar_prefetch = 0 : i64, scratch_operands = 0 : i64, tpu.core_type = #tpu.core_type<tc>, window_params = [{transform_indices = @transform_0, window_bounds = array<i64: 8, 16>}, {pipeline_mode = #tpu.pipeline_mode<synchronous>, transform_indices = @transform_1, window_bounds = array<i64: 16, 64>}, {pipeline_mode = #tpu.pipeline_mode<synchronous>, transform_indices = @transform_2, window_bounds = array<i64: 4, 64, 64>}, {pipeline_mode = #tpu.pipeline_mode<synchronous>, transform_indices = @transform_3, window_bounds = array<i64: 64, 128>}, {pipeline_mode = #tpu.pipeline_mode<synchronous>, transform_indices = @transform_4, window_bounds = array<i64: 4, 64, 2048>}, {pipeline_mode = #tpu.pipeline_mode<synchronous>, transform_indices = @transform_5, window_bounds = array<i64: 4, 2048, 64>}, {pipeline_mode = #tpu.pipeline_mode<synchronous>, transform_indices = @transform_6, window_bounds = array<i64: 4, 2048>}, {pipeline_mode = #tpu.pipeline_mode<synchronous>, transform_indices = @transform_7, window_bounds = array<i64: 35, 64>}, {pipeline_mode = #tpu.pipeline_mode<synchronous>, transform_indices = @transform_8, window_bounds = array<i64: 64, 128>}, {pipeline_mode = #tpu.pipeline_mode<synchronous>, transform_indices = @transform_9, window_bounds = array<i64: 1, 128>}, {transform_indices = @transform_10, window_bounds = array<i64: 8, 128>}]} {
    %c0 = arith.constant 0 : index
    %c0_0 = arith.constant 0 : index
    %0 = vector.load %arg1[%c0, %c0_0] : memref<8x16xf32, #tpu.memory_space<vmem>>, vector<8x16xf32>
    %c0_1 = arith.constant 0 : index
    %c0_2 = arith.constant 0 : index
    %1 = vector.load %arg2[%c0_1, %c0_2] : memref<16x64xf32, #tpu.memory_space<vmem>>, vector<16x64xf32>
    %cst = arith.constant dense<0.000000e+00> : vector<8x64xf32>
    %2 = tpu.matmul %0, %1, %cst {dimension_numbers = #tpu.dot_dimension_numbers<[1], [0], [0], [1], [0, 0, 1, 1], [], []>} : vector<8x16xf32>, vector<16x64xf32>, vector<8x64xf32> -> vector<8x64xf32>
    %c0_3 = arith.constant 0 : index
    %c0_4 = arith.constant 0 : index
    %3 = vector.load %arg8[%c0_3, %c0_4] : memref<35x64xf32, #tpu.memory_space<vmem>>, vector<1x64xf32>
    %4 = vector.broadcast %3 : vector<1x64xf32> to vector<8x64xf32>
    %5 = arith.addf %2, %4 : vector<8x64xf32>
    %c0_5 = arith.constant 0 : index
    %c0_6 = arith.constant 0 : index
    %c0_7 = arith.constant 0 : index
    %6 = vector.load %arg3[%c0_5, %c0_6, %c0_7] : memref<4x64x64xf32, #tpu.memory_space<vmem>>, vector<1x64x64xf32>
    %7 = vector.shape_cast %6 : vector<1x64x64xf32> to vector<64x64xf32>
    %cst_8 = arith.constant dense<0.000000e+00> : vector<8x64xf32>
    %8 = tpu.matmul %5, %7, %cst_8 {dimension_numbers = #tpu.dot_dimension_numbers<[1], [0], [0], [1], [0, 0, 1, 1], [], []>} : vector<8x64xf32>, vector<64x64xf32>, vector<8x64xf32> -> vector<8x64xf32>
    %c1 = arith.constant 1 : index
    %c0_9 = arith.constant 0 : index
    %9 = vector.load %arg8[%c1, %c0_9] : memref<35x64xf32, #tpu.memory_space<vmem>>, vector<1x64xf32>
    %10 = vector.broadcast %9 : vector<1x64xf32> to vector<8x64xf32>
    %11 = arith.addf %8, %10 : vector<8x64xf32>
    %12 = arith.addf %5, %11 : vector<8x64xf32>
    %cst_10 = arith.constant dense<0.000000e+00> : vector<8xf32>
    %13 = vector.multi_reduction <add>, %12, %cst_10 [1] : vector<8x64xf32> to vector<8xf32>
    %14 = vector.shape_cast %13 : vector<8xf32> to vector<8x1xf32>
    %cst_11 = arith.constant 6.400000e+01 : f32
    %15 = vector.broadcast %cst_11 : f32 to vector<8x1xf32>
    %16 = arith.divf %14, %15 : vector<8x1xf32>
    %17 = vector.broadcast %16 : vector<8x1xf32> to vector<8x64xf32>
    %18 = arith.subf %12, %17 : vector<8x64xf32>
    %19 = arith.mulf %18, %18 : vector<8x64xf32>
    %cst_12 = arith.constant dense<0.000000e+00> : vector<8xf32>
    %20 = vector.multi_reduction <add>, %19, %cst_12 [1] : vector<8x64xf32> to vector<8xf32>
    %21 = vector.shape_cast %20 : vector<8xf32> to vector<8x1xf32>
    %cst_13 = arith.constant 6.400000e+01 : f32
    %22 = vector.broadcast %cst_13 : f32 to vector<8x1xf32>
    %23 = arith.divf %21, %22 : vector<8x1xf32>
    %24 = vector.broadcast %16 : vector<8x1xf32> to vector<8x64xf32>
    %25 = arith.subf %12, %24 : vector<8x64xf32>
    %cst_14 = arith.constant 9.99999974E-6 : f32
    %26 = vector.broadcast %cst_14 : f32 to vector<8x1xf32>
    %27 = arith.addf %23, %26 : vector<8x1xf32>
    %28 = math.rsqrt %27 : vector<8x1xf32>
    %29 = vector.broadcast %28 : vector<8x1xf32> to vector<8x64xf32>
    %30 = arith.mulf %25, %29 : vector<8x64xf32>
    %c2 = arith.constant 2 : index
    %c0_15 = arith.constant 0 : index
    %31 = vector.load %arg8[%c2, %c0_15] : memref<35x64xf32, #tpu.memory_space<vmem>>, vector<1x64xf32>
    %32 = vector.broadcast %31 : vector<1x64xf32> to vector<8x64xf32>
    %33 = arith.mulf %30, %32 : vector<8x64xf32>
    %c3 = arith.constant 3 : index
    %c0_16 = arith.constant 0 : index
    %34 = vector.load %arg8[%c3, %c0_16] : memref<35x64xf32, #tpu.memory_space<vmem>>, vector<1x64xf32>
    %35 = vector.broadcast %34 : vector<1x64xf32> to vector<8x64xf32>
    %36 = arith.addf %33, %35 : vector<8x64xf32>
    %37 = arith.truncf %36 : vector<8x64xf32> to vector<8x64xbf16>
    %c0_17 = arith.constant 0 : index
    %c0_18 = arith.constant 0 : index
    %c0_19 = arith.constant 0 : index
    %38 = vector.load %arg5[%c0_17, %c0_18, %c0_19] : memref<4x64x2048xbf16, #tpu.memory_space<vmem>>, vector<1x64x2048xbf16>
    %39 = vector.shape_cast %38 : vector<1x64x2048xbf16> to vector<64x2048xbf16>
    %cst_20 = arith.constant dense<0.000000e+00> : vector<8x2048xf32>
    %40 = tpu.matmul %37, %39, %cst_20 {dimension_numbers = #tpu.dot_dimension_numbers<[1], [0], [0], [1], [0, 0, 1, 1], [], []>} : vector<8x64xbf16>, vector<64x2048xbf16>, vector<8x2048xf32> -> vector<8x2048xf32>
    %c0_21 = arith.constant 0 : index
    %c0_22 = arith.constant 0 : index
    %41 = vector.load %arg7[%c0_21, %c0_22] : memref<4x2048xf32, #tpu.memory_space<vmem>>, vector<1x2048xf32>
    %42 = vector.broadcast %41 : vector<1x2048xf32> to vector<8x2048xf32>
    %43 = arith.addf %40, %42 : vector<8x2048xf32>
    %cst_23 = arith.constant 0.000000e+00 : f32
    %44 = vector.broadcast %cst_23 : f32 to vector<8x2048xf32>
    %45 = arith.maximumf %43, %44 : vector<8x2048xf32>
    %46 = arith.truncf %45 : vector<8x2048xf32> to vector<8x2048xbf16>
    %c0_24 = arith.constant 0 : index
    %c0_25 = arith.constant 0 : index
    %c0_26 = arith.constant 0 : index
    %47 = vector.load %arg6[%c0_24, %c0_25, %c0_26] : memref<4x2048x64xbf16, #tpu.memory_space<vmem>>, vector<1x2048x64xbf16>
    %48 = vector.shape_cast %47 : vector<1x2048x64xbf16> to vector<2048x64xbf16>
    %cst_27 = arith.constant dense<0.000000e+00> : vector<8x64xf32>
    %49 = tpu.matmul %46, %48, %cst_27 {dimension_numbers = #tpu.dot_dimension_numbers<[1], [0], [0], [1], [0, 0, 1, 1], [], []>} : vector<8x2048xbf16>, vector<2048x64xbf16>, vector<8x64xf32> -> vector<8x64xf32>
    %c4 = arith.constant 4 : index
    %c0_28 = arith.constant 0 : index
    %50 = vector.load %arg8[%c4, %c0_28] : memref<35x64xf32, #tpu.memory_space<vmem>>, vector<1x64xf32>
    %51 = vector.broadcast %50 : vector<1x64xf32> to vector<8x64xf32>
    %52 = arith.addf %49, %51 : vector<8x64xf32>
    %53 = arith.addf %36, %52 : vector<8x64xf32>
    %cst_29 = arith.constant dense<0.000000e+00> : vector<8xf32>
    %54 = vector.multi_reduction <add>, %53, %cst_29 [1] : vector<8x64xf32> to vector<8xf32>
    %55 = vector.shape_cast %54 : vector<8xf32> to vector<8x1xf32>
    %cst_30 = arith.constant 6.400000e+01 : f32
    %56 = vector.broadcast %cst_30 : f32 to vector<8x1xf32>
    %57 = arith.divf %55, %56 : vector<8x1xf32>
    %58 = vector.broadcast %57 : vector<8x1xf32> to vector<8x64xf32>
    %59 = arith.subf %53, %58 : vector<8x64xf32>
    %60 = arith.mulf %59, %59 : vector<8x64xf32>
    %cst_31 = arith.constant dense<0.000000e+00> : vector<8xf32>
    %61 = vector.multi_reduction <add>, %60, %cst_31 [1] : vector<8x64xf32> to vector<8xf32>
    %62 = vector.shape_cast %61 : vector<8xf32> to vector<8x1xf32>
    %cst_32 = arith.constant 6.400000e+01 : f32
    %63 = vector.broadcast %cst_32 : f32 to vector<8x1xf32>
    %64 = arith.divf %62, %63 : vector<8x1xf32>
    %65 = vector.broadcast %57 : vector<8x1xf32> to vector<8x64xf32>
    %66 = arith.subf %53, %65 : vector<8x64xf32>
    %cst_33 = arith.constant 9.99999974E-6 : f32
    %67 = vector.broadcast %cst_33 : f32 to vector<8x1xf32>
    %68 = arith.addf %64, %67 : vector<8x1xf32>
    %69 = math.rsqrt %68 : vector<8x1xf32>
    %70 = vector.broadcast %69 : vector<8x1xf32> to vector<8x64xf32>
    %71 = arith.mulf %66, %70 : vector<8x64xf32>
    %c5 = arith.constant 5 : index
    %c0_34 = arith.constant 0 : index
    %72 = vector.load %arg8[%c5, %c0_34] : memref<35x64xf32, #tpu.memory_space<vmem>>, vector<1x64xf32>
    %73 = vector.broadcast %72 : vector<1x64xf32> to vector<8x64xf32>
    %74 = arith.mulf %71, %73 : vector<8x64xf32>
    %c6 = arith.constant 6 : index
    %c0_35 = arith.constant 0 : index
    %75 = vector.load %arg8[%c6, %c0_35] : memref<35x64xf32, #tpu.memory_space<vmem>>, vector<1x64xf32>
    %76 = vector.broadcast %75 : vector<1x64xf32> to vector<8x64xf32>
    %77 = arith.addf %74, %76 : vector<8x64xf32>
    %c1_36 = arith.constant 1 : index
    %c0_37 = arith.constant 0 : index
    %c0_38 = arith.constant 0 : index
    %78 = vector.load %arg3[%c1_36, %c0_37, %c0_38] : memref<4x64x64xf32, #tpu.memory_space<vmem>>, vector<1x64x64xf32>
    %79 = vector.shape_cast %78 : vector<1x64x64xf32> to vector<64x64xf32>
    %cst_39 = arith.constant dense<0.000000e+00> : vector<8x64xf32>
    %80 = tpu.matmul %77, %79, %cst_39 {dimension_numbers = #tpu.dot_dimension_numbers<[1], [0], [0], [1], [0, 0, 1, 1], [], []>} : vector<8x64xf32>, vector<64x64xf32>, vector<8x64xf32> -> vector<8x64xf32>
    %c7 = arith.constant 7 : index
    %c0_40 = arith.constant 0 : index
    %81 = vector.load %arg8[%c7, %c0_40] : memref<35x64xf32, #tpu.memory_space<vmem>>, vector<1x64xf32>
    %82 = vector.broadcast %81 : vector<1x64xf32> to vector<8x64xf32>
    %83 = arith.addf %80, %82 : vector<8x64xf32>
    %84 = arith.addf %77, %83 : vector<8x64xf32>
    %cst_41 = arith.constant dense<0.000000e+00> : vector<8xf32>
    %85 = vector.multi_reduction <add>, %84, %cst_41 [1] : vector<8x64xf32> to vector<8xf32>
    %86 = vector.shape_cast %85 : vector<8xf32> to vector<8x1xf32>
    %cst_42 = arith.constant 6.400000e+01 : f32
    %87 = vector.broadcast %cst_42 : f32 to vector<8x1xf32>
    %88 = arith.divf %86, %87 : vector<8x1xf32>
    %89 = vector.broadcast %88 : vector<8x1xf32> to vector<8x64xf32>
    %90 = arith.subf %84, %89 : vector<8x64xf32>
    %91 = arith.mulf %90, %90 : vector<8x64xf32>
    %cst_43 = arith.constant dense<0.000000e+00> : vector<8xf32>
    %92 = vector.multi_reduction <add>, %91, %cst_43 [1] : vector<8x64xf32> to vector<8xf32>
    %93 = vector.shape_cast %92 : vector<8xf32> to vector<8x1xf32>
    %cst_44 = arith.constant 6.400000e+01 : f32
    %94 = vector.broadcast %cst_44 : f32 to vector<8x1xf32>
    %95 = arith.divf %93, %94 : vector<8x1xf32>
    %96 = vector.broadcast %88 : vector<8x1xf32> to vector<8x64xf32>
    %97 = arith.subf %84, %96 : vector<8x64xf32>
    %cst_45 = arith.constant 9.99999974E-6 : f32
    %98 = vector.broadcast %cst_45 : f32 to vector<8x1xf32>
    %99 = arith.addf %95, %98 : vector<8x1xf32>
    %100 = math.rsqrt %99 : vector<8x1xf32>
    %101 = vector.broadcast %100 : vector<8x1xf32> to vector<8x64xf32>
    %102 = arith.mulf %97, %101 : vector<8x64xf32>
    %c8 = arith.constant 8 : index
    %c0_46 = arith.constant 0 : index
    %103 = vector.load %arg8[%c8, %c0_46] : memref<35x64xf32, #tpu.memory_space<vmem>>, vector<1x64xf32>
    %104 = vector.broadcast %103 : vector<1x64xf32> to vector<8x64xf32>
    %105 = arith.mulf %102, %104 : vector<8x64xf32>
    %c9 = arith.constant 9 : index
    %c0_47 = arith.constant 0 : index
    %106 = vector.load %arg8[%c9, %c0_47] : memref<35x64xf32, #tpu.memory_space<vmem>>, vector<1x64xf32>
    %107 = vector.broadcast %106 : vector<1x64xf32> to vector<8x64xf32>
    %108 = arith.addf %105, %107 : vector<8x64xf32>
    %109 = arith.truncf %108 : vector<8x64xf32> to vector<8x64xbf16>
    %c1_48 = arith.constant 1 : index
    %c0_49 = arith.constant 0 : index
    %c0_50 = arith.constant 0 : index
    %110 = vector.load %arg5[%c1_48, %c0_49, %c0_50] : memref<4x64x2048xbf16, #tpu.memory_space<vmem>>, vector<1x64x2048xbf16>
    %111 = vector.shape_cast %110 : vector<1x64x2048xbf16> to vector<64x2048xbf16>
    %cst_51 = arith.constant dense<0.000000e+00> : vector<8x2048xf32>
    %112 = tpu.matmul %109, %111, %cst_51 {dimension_numbers = #tpu.dot_dimension_numbers<[1], [0], [0], [1], [0, 0, 1, 1], [], []>} : vector<8x64xbf16>, vector<64x2048xbf16>, vector<8x2048xf32> -> vector<8x2048xf32>
    %c1_52 = arith.constant 1 : index
    %c0_53 = arith.constant 0 : index
    %113 = vector.load %arg7[%c1_52, %c0_53] : memref<4x2048xf32, #tpu.memory_space<vmem>>, vector<1x2048xf32>
    %114 = vector.broadcast %113 : vector<1x2048xf32> to vector<8x2048xf32>
    %115 = arith.addf %112, %114 : vector<8x2048xf32>
    %cst_54 = arith.constant 0.000000e+00 : f32
    %116 = vector.broadcast %cst_54 : f32 to vector<8x2048xf32>
    %117 = arith.maximumf %115, %116 : vector<8x2048xf32>
    %118 = arith.truncf %117 : vector<8x2048xf32> to vector<8x2048xbf16>
    %c1_55 = arith.constant 1 : index
    %c0_56 = arith.constant 0 : index
    %c0_57 = arith.constant 0 : index
    %119 = vector.load %arg6[%c1_55, %c0_56, %c0_57] : memref<4x2048x64xbf16, #tpu.memory_space<vmem>>, vector<1x2048x64xbf16>
    %120 = vector.shape_cast %119 : vector<1x2048x64xbf16> to vector<2048x64xbf16>
    %cst_58 = arith.constant dense<0.000000e+00> : vector<8x64xf32>
    %121 = tpu.matmul %118, %120, %cst_58 {dimension_numbers = #tpu.dot_dimension_numbers<[1], [0], [0], [1], [0, 0, 1, 1], [], []>} : vector<8x2048xbf16>, vector<2048x64xbf16>, vector<8x64xf32> -> vector<8x64xf32>
    %c10 = arith.constant 10 : index
    %c0_59 = arith.constant 0 : index
    %122 = vector.load %arg8[%c10, %c0_59] : memref<35x64xf32, #tpu.memory_space<vmem>>, vector<1x64xf32>
    %123 = vector.broadcast %122 : vector<1x64xf32> to vector<8x64xf32>
    %124 = arith.addf %121, %123 : vector<8x64xf32>
    %125 = arith.addf %108, %124 : vector<8x64xf32>
    %cst_60 = arith.constant dense<0.000000e+00> : vector<8xf32>
    %126 = vector.multi_reduction <add>, %125, %cst_60 [1] : vector<8x64xf32> to vector<8xf32>
    %127 = vector.shape_cast %126 : vector<8xf32> to vector<8x1xf32>
    %cst_61 = arith.constant 6.400000e+01 : f32
    %128 = vector.broadcast %cst_61 : f32 to vector<8x1xf32>
    %129 = arith.divf %127, %128 : vector<8x1xf32>
    %130 = vector.broadcast %129 : vector<8x1xf32> to vector<8x64xf32>
    %131 = arith.subf %125, %130 : vector<8x64xf32>
    %132 = arith.mulf %131, %131 : vector<8x64xf32>
    %cst_62 = arith.constant dense<0.000000e+00> : vector<8xf32>
    %133 = vector.multi_reduction <add>, %132, %cst_62 [1] : vector<8x64xf32> to vector<8xf32>
    %134 = vector.shape_cast %133 : vector<8xf32> to vector<8x1xf32>
    %cst_63 = arith.constant 6.400000e+01 : f32
    %135 = vector.broadcast %cst_63 : f32 to vector<8x1xf32>
    %136 = arith.divf %134, %135 : vector<8x1xf32>
    %137 = vector.broadcast %129 : vector<8x1xf32> to vector<8x64xf32>
    %138 = arith.subf %125, %137 : vector<8x64xf32>
    %cst_64 = arith.constant 9.99999974E-6 : f32
    %139 = vector.broadcast %cst_64 : f32 to vector<8x1xf32>
    %140 = arith.addf %136, %139 : vector<8x1xf32>
    %141 = math.rsqrt %140 : vector<8x1xf32>
    %142 = vector.broadcast %141 : vector<8x1xf32> to vector<8x64xf32>
    %143 = arith.mulf %138, %142 : vector<8x64xf32>
    %c11 = arith.constant 11 : index
    %c0_65 = arith.constant 0 : index
    %144 = vector.load %arg8[%c11, %c0_65] : memref<35x64xf32, #tpu.memory_space<vmem>>, vector<1x64xf32>
    %145 = vector.broadcast %144 : vector<1x64xf32> to vector<8x64xf32>
    %146 = arith.mulf %143, %145 : vector<8x64xf32>
    %c12 = arith.constant 12 : index
    %c0_66 = arith.constant 0 : index
    %147 = vector.load %arg8[%c12, %c0_66] : memref<35x64xf32, #tpu.memory_space<vmem>>, vector<1x64xf32>
    %148 = vector.broadcast %147 : vector<1x64xf32> to vector<8x64xf32>
    %149 = arith.addf %146, %148 : vector<8x64xf32>
    %cst_67 = arith.constant dense<0.000000e+00> : vector<8xf32>
    %150 = vector.multi_reduction <add>, %149, %cst_67 [1] : vector<8x64xf32> to vector<8xf32>
    %151 = vector.shape_cast %150 : vector<8xf32> to vector<8x1xf32>
    %cst_68 = arith.constant 6.400000e+01 : f32
    %152 = vector.broadcast %cst_68 : f32 to vector<8x1xf32>
    %153 = arith.divf %151, %152 : vector<8x1xf32>
    %154 = vector.broadcast %153 : vector<8x1xf32> to vector<8x64xf32>
    %155 = arith.subf %149, %154 : vector<8x64xf32>
    %156 = arith.mulf %155, %155 : vector<8x64xf32>
    %cst_69 = arith.constant dense<0.000000e+00> : vector<8xf32>
    %157 = vector.multi_reduction <add>, %156, %cst_69 [1] : vector<8x64xf32> to vector<8xf32>
    %158 = vector.shape_cast %157 : vector<8xf32> to vector<8x1xf32>
    %cst_70 = arith.constant 6.400000e+01 : f32
    %159 = vector.broadcast %cst_70 : f32 to vector<8x1xf32>
    %160 = arith.divf %158, %159 : vector<8x1xf32>
    %161 = vector.broadcast %153 : vector<8x1xf32> to vector<8x64xf32>
    %162 = arith.subf %149, %161 : vector<8x64xf32>
    %cst_71 = arith.constant 9.99999974E-6 : f32
    %163 = vector.broadcast %cst_71 : f32 to vector<8x1xf32>
    %164 = arith.addf %160, %163 : vector<8x1xf32>
    %165 = math.rsqrt %164 : vector<8x1xf32>
    %166 = vector.broadcast %165 : vector<8x1xf32> to vector<8x64xf32>
    %167 = arith.mulf %162, %166 : vector<8x64xf32>
    %c13 = arith.constant 13 : index
    %c0_72 = arith.constant 0 : index
    %168 = vector.load %arg8[%c13, %c0_72] : memref<35x64xf32, #tpu.memory_space<vmem>>, vector<1x64xf32>
    %169 = vector.broadcast %168 : vector<1x64xf32> to vector<8x64xf32>
    %170 = arith.mulf %167, %169 : vector<8x64xf32>
    %c14 = arith.constant 14 : index
    %c0_73 = arith.constant 0 : index
    %171 = vector.load %arg8[%c14, %c0_73] : memref<35x64xf32, #tpu.memory_space<vmem>>, vector<1x64xf32>
    %172 = vector.broadcast %171 : vector<1x64xf32> to vector<8x64xf32>
    %173 = arith.addf %170, %172 : vector<8x64xf32>
    %c0_74 = arith.constant 0 : index
    %c0_75 = arith.constant 0 : index
    %174 = vector.load %arg4[%c0_74, %c0_75] : memref<64x128xf32, #tpu.memory_space<vmem>>, vector<64x128xf32>
    %cst_76 = arith.constant dense<0.000000e+00> : vector<8x128xf32>
    %175 = tpu.matmul %173, %174, %cst_76 {dimension_numbers = #tpu.dot_dimension_numbers<[1], [0], [0], [1], [0, 0, 1, 1], [], []>} : vector<8x64xf32>, vector<64x128xf32>, vector<8x128xf32> -> vector<8x128xf32>
    %176 = vector.extract_strided_slice %175 {offsets = [0, 0], sizes = [8, 64], strides = [1, 1]} : vector<8x128xf32> to vector<8x64xf32>
    %c18 = arith.constant 18 : index
    %c0_77 = arith.constant 0 : index
    %177 = vector.load %arg8[%c18, %c0_77] : memref<35x64xf32, #tpu.memory_space<vmem>>, vector<1x64xf32>
    %178 = vector.broadcast %177 : vector<1x64xf32> to vector<8x64xf32>
    %179 = arith.addf %176, %178 : vector<8x64xf32>
    %180 = vector.extract_strided_slice %175 {offsets = [0, 64], sizes = [8, 64], strides = [1, 1]} : vector<8x128xf32> to vector<8x64xf32>
    %c27 = arith.constant 27 : index
    %c0_78 = arith.constant 0 : index
    %181 = vector.load %arg8[%c27, %c0_78] : memref<35x64xf32, #tpu.memory_space<vmem>>, vector<1x64xf32>
    %182 = vector.broadcast %181 : vector<1x64xf32> to vector<8x64xf32>
    %183 = arith.addf %180, %182 : vector<8x64xf32>
    %c2_79 = arith.constant 2 : index
    %c0_80 = arith.constant 0 : index
    %c0_81 = arith.constant 0 : index
    %184 = vector.load %arg3[%c2_79, %c0_80, %c0_81] : memref<4x64x64xf32, #tpu.memory_space<vmem>>, vector<1x64x64xf32>
    %185 = vector.shape_cast %184 : vector<1x64x64xf32> to vector<64x64xf32>
    %cst_82 = arith.constant dense<0.000000e+00> : vector<8x64xf32>
    %186 = tpu.matmul %5, %185, %cst_82 {dimension_numbers = #tpu.dot_dimension_numbers<[1], [0], [0], [1], [0, 0, 1, 1], [], []>} : vector<8x64xf32>, vector<64x64xf32>, vector<8x64xf32> -> vector<8x64xf32>
    %c15 = arith.constant 15 : index
    %c0_83 = arith.constant 0 : index
    %187 = vector.load %arg8[%c15, %c0_83] : memref<35x64xf32, #tpu.memory_space<vmem>>, vector<1x64xf32>
    %188 = vector.broadcast %187 : vector<1x64xf32> to vector<8x64xf32>
    %189 = arith.addf %186, %188 : vector<8x64xf32>
    %190 = arith.addf %5, %189 : vector<8x64xf32>
    %cst_84 = arith.constant dense<0.000000e+00> : vector<8xf32>
    %191 = vector.multi_reduction <add>, %190, %cst_84 [1] : vector<8x64xf32> to vector<8xf32>
    %192 = vector.shape_cast %191 : vector<8xf32> to vector<8x1xf32>
    %cst_85 = arith.constant 6.400000e+01 : f32
    %193 = vector.broadcast %cst_85 : f32 to vector<8x1xf32>
    %194 = arith.divf %192, %193 : vector<8x1xf32>
    %195 = vector.broadcast %194 : vector<8x1xf32> to vector<8x64xf32>
    %196 = arith.subf %190, %195 : vector<8x64xf32>
    %197 = arith.mulf %196, %196 : vector<8x64xf32>
    %cst_86 = arith.constant dense<0.000000e+00> : vector<8xf32>
    %198 = vector.multi_reduction <add>, %197, %cst_86 [1] : vector<8x64xf32> to vector<8xf32>
    %199 = vector.shape_cast %198 : vector<8xf32> to vector<8x1xf32>
    %cst_87 = arith.constant 6.400000e+01 : f32
    %200 = vector.broadcast %cst_87 : f32 to vector<8x1xf32>
    %201 = arith.divf %199, %200 : vector<8x1xf32>
    %202 = vector.broadcast %194 : vector<8x1xf32> to vector<8x64xf32>
    %203 = arith.subf %190, %202 : vector<8x64xf32>
    %cst_88 = arith.constant 9.99999974E-6 : f32
    %204 = vector.broadcast %cst_88 : f32 to vector<8x1xf32>
    %205 = arith.addf %201, %204 : vector<8x1xf32>
    %206 = math.rsqrt %205 : vector<8x1xf32>
    %207 = vector.broadcast %206 : vector<8x1xf32> to vector<8x64xf32>
    %208 = arith.mulf %203, %207 : vector<8x64xf32>
    %c16 = arith.constant 16 : index
    %c0_89 = arith.constant 0 : index
    %209 = vector.load %arg8[%c16, %c0_89] : memref<35x64xf32, #tpu.memory_space<vmem>>, vector<1x64xf32>
    %210 = vector.broadcast %209 : vector<1x64xf32> to vector<8x64xf32>
    %211 = arith.mulf %208, %210 : vector<8x64xf32>
    %c17 = arith.constant 17 : index
    %c0_90 = arith.constant 0 : index
    %212 = vector.load %arg8[%c17, %c0_90] : memref<35x64xf32, #tpu.memory_space<vmem>>, vector<1x64xf32>
    %213 = vector.broadcast %212 : vector<1x64xf32> to vector<8x64xf32>
    %214 = arith.addf %211, %213 : vector<8x64xf32>
    %215 = arith.addf %214, %179 : vector<8x64xf32>
    %cst_91 = arith.constant dense<0.000000e+00> : vector<8xf32>
    %216 = vector.multi_reduction <add>, %215, %cst_91 [1] : vector<8x64xf32> to vector<8xf32>
    %217 = vector.shape_cast %216 : vector<8xf32> to vector<8x1xf32>
    %cst_92 = arith.constant 6.400000e+01 : f32
    %218 = vector.broadcast %cst_92 : f32 to vector<8x1xf32>
    %219 = arith.divf %217, %218 : vector<8x1xf32>
    %220 = vector.broadcast %219 : vector<8x1xf32> to vector<8x64xf32>
    %221 = arith.subf %215, %220 : vector<8x64xf32>
    %222 = arith.mulf %221, %221 : vector<8x64xf32>
    %cst_93 = arith.constant dense<0.000000e+00> : vector<8xf32>
    %223 = vector.multi_reduction <add>, %222, %cst_93 [1] : vector<8x64xf32> to vector<8xf32>
    %224 = vector.shape_cast %223 : vector<8xf32> to vector<8x1xf32>
    %cst_94 = arith.constant 6.400000e+01 : f32
    %225 = vector.broadcast %cst_94 : f32 to vector<8x1xf32>
    %226 = arith.divf %224, %225 : vector<8x1xf32>
    %227 = vector.broadcast %219 : vector<8x1xf32> to vector<8x64xf32>
    %228 = arith.subf %215, %227 : vector<8x64xf32>
    %cst_95 = arith.constant 9.99999974E-6 : f32
    %229 = vector.broadcast %cst_95 : f32 to vector<8x1xf32>
    %230 = arith.addf %226, %229 : vector<8x1xf32>
    %231 = math.rsqrt %230 : vector<8x1xf32>
    %232 = vector.broadcast %231 : vector<8x1xf32> to vector<8x64xf32>
    %233 = arith.mulf %228, %232 : vector<8x64xf32>
    %c19 = arith.constant 19 : index
    %c0_96 = arith.constant 0 : index
    %234 = vector.load %arg8[%c19, %c0_96] : memref<35x64xf32, #tpu.memory_space<vmem>>, vector<1x64xf32>
    %235 = vector.broadcast %234 : vector<1x64xf32> to vector<8x64xf32>
    %236 = arith.mulf %233, %235 : vector<8x64xf32>
    %c20 = arith.constant 20 : index
    %c0_97 = arith.constant 0 : index
    %237 = vector.load %arg8[%c20, %c0_97] : memref<35x64xf32, #tpu.memory_space<vmem>>, vector<1x64xf32>
    %238 = vector.broadcast %237 : vector<1x64xf32> to vector<8x64xf32>
    %239 = arith.addf %236, %238 : vector<8x64xf32>
    %240 = arith.truncf %239 : vector<8x64xf32> to vector<8x64xbf16>
    %c2_98 = arith.constant 2 : index
    %c0_99 = arith.constant 0 : index
    %c0_100 = arith.constant 0 : index
    %241 = vector.load %arg5[%c2_98, %c0_99, %c0_100] : memref<4x64x2048xbf16, #tpu.memory_space<vmem>>, vector<1x64x2048xbf16>
    %242 = vector.shape_cast %241 : vector<1x64x2048xbf16> to vector<64x2048xbf16>
    %cst_101 = arith.constant dense<0.000000e+00> : vector<8x2048xf32>
    %243 = tpu.matmul %240, %242, %cst_101 {dimension_numbers = #tpu.dot_dimension_numbers<[1], [0], [0], [1], [0, 0, 1, 1], [], []>} : vector<8x64xbf16>, vector<64x2048xbf16>, vector<8x2048xf32> -> vector<8x2048xf32>
    %c2_102 = arith.constant 2 : index
    %c0_103 = arith.constant 0 : index
    %244 = vector.load %arg7[%c2_102, %c0_103] : memref<4x2048xf32, #tpu.memory_space<vmem>>, vector<1x2048xf32>
    %245 = vector.broadcast %244 : vector<1x2048xf32> to vector<8x2048xf32>
    %246 = arith.addf %243, %245 : vector<8x2048xf32>
    %cst_104 = arith.constant 0.000000e+00 : f32
    %247 = vector.broadcast %cst_104 : f32 to vector<8x2048xf32>
    %248 = arith.maximumf %246, %247 : vector<8x2048xf32>
    %249 = arith.truncf %248 : vector<8x2048xf32> to vector<8x2048xbf16>
    %c2_105 = arith.constant 2 : index
    %c0_106 = arith.constant 0 : index
    %c0_107 = arith.constant 0 : index
    %250 = vector.load %arg6[%c2_105, %c0_106, %c0_107] : memref<4x2048x64xbf16, #tpu.memory_space<vmem>>, vector<1x2048x64xbf16>
    %251 = vector.shape_cast %250 : vector<1x2048x64xbf16> to vector<2048x64xbf16>
    %cst_108 = arith.constant dense<0.000000e+00> : vector<8x64xf32>
    %252 = tpu.matmul %249, %251, %cst_108 {dimension_numbers = #tpu.dot_dimension_numbers<[1], [0], [0], [1], [0, 0, 1, 1], [], []>} : vector<8x2048xbf16>, vector<2048x64xbf16>, vector<8x64xf32> -> vector<8x64xf32>
    %c21 = arith.constant 21 : index
    %c0_109 = arith.constant 0 : index
    %253 = vector.load %arg8[%c21, %c0_109] : memref<35x64xf32, #tpu.memory_space<vmem>>, vector<1x64xf32>
    %254 = vector.broadcast %253 : vector<1x64xf32> to vector<8x64xf32>
    %255 = arith.addf %252, %254 : vector<8x64xf32>
    %256 = arith.addf %239, %255 : vector<8x64xf32>
    %cst_110 = arith.constant dense<0.000000e+00> : vector<8xf32>
    %257 = vector.multi_reduction <add>, %256, %cst_110 [1] : vector<8x64xf32> to vector<8xf32>
    %258 = vector.shape_cast %257 : vector<8xf32> to vector<8x1xf32>
    %cst_111 = arith.constant 6.400000e+01 : f32
    %259 = vector.broadcast %cst_111 : f32 to vector<8x1xf32>
    %260 = arith.divf %258, %259 : vector<8x1xf32>
    %261 = vector.broadcast %260 : vector<8x1xf32> to vector<8x64xf32>
    %262 = arith.subf %256, %261 : vector<8x64xf32>
    %263 = arith.mulf %262, %262 : vector<8x64xf32>
    %cst_112 = arith.constant dense<0.000000e+00> : vector<8xf32>
    %264 = vector.multi_reduction <add>, %263, %cst_112 [1] : vector<8x64xf32> to vector<8xf32>
    %265 = vector.shape_cast %264 : vector<8xf32> to vector<8x1xf32>
    %cst_113 = arith.constant 6.400000e+01 : f32
    %266 = vector.broadcast %cst_113 : f32 to vector<8x1xf32>
    %267 = arith.divf %265, %266 : vector<8x1xf32>
    %268 = vector.broadcast %260 : vector<8x1xf32> to vector<8x64xf32>
    %269 = arith.subf %256, %268 : vector<8x64xf32>
    %cst_114 = arith.constant 9.99999974E-6 : f32
    %270 = vector.broadcast %cst_114 : f32 to vector<8x1xf32>
    %271 = arith.addf %267, %270 : vector<8x1xf32>
    %272 = math.rsqrt %271 : vector<8x1xf32>
    %273 = vector.broadcast %272 : vector<8x1xf32> to vector<8x64xf32>
    %274 = arith.mulf %269, %273 : vector<8x64xf32>
    %c22 = arith.constant 22 : index
    %c0_115 = arith.constant 0 : index
    %275 = vector.load %arg8[%c22, %c0_115] : memref<35x64xf32, #tpu.memory_space<vmem>>, vector<1x64xf32>
    %276 = vector.broadcast %275 : vector<1x64xf32> to vector<8x64xf32>
    %277 = arith.mulf %274, %276 : vector<8x64xf32>
    %c23 = arith.constant 23 : index
    %c0_116 = arith.constant 0 : index
    %278 = vector.load %arg8[%c23, %c0_116] : memref<35x64xf32, #tpu.memory_space<vmem>>, vector<1x64xf32>
    %279 = vector.broadcast %278 : vector<1x64xf32> to vector<8x64xf32>
    %280 = arith.addf %277, %279 : vector<8x64xf32>
    %c3_117 = arith.constant 3 : index
    %c0_118 = arith.constant 0 : index
    %c0_119 = arith.constant 0 : index
    %281 = vector.load %arg3[%c3_117, %c0_118, %c0_119] : memref<4x64x64xf32, #tpu.memory_space<vmem>>, vector<1x64x64xf32>
    %282 = vector.shape_cast %281 : vector<1x64x64xf32> to vector<64x64xf32>
    %cst_120 = arith.constant dense<0.000000e+00> : vector<8x64xf32>
    %283 = tpu.matmul %280, %282, %cst_120 {dimension_numbers = #tpu.dot_dimension_numbers<[1], [0], [0], [1], [0, 0, 1, 1], [], []>} : vector<8x64xf32>, vector<64x64xf32>, vector<8x64xf32> -> vector<8x64xf32>
    %c24 = arith.constant 24 : index
    %c0_121 = arith.constant 0 : index
    %284 = vector.load %arg8[%c24, %c0_121] : memref<35x64xf32, #tpu.memory_space<vmem>>, vector<1x64xf32>
    %285 = vector.broadcast %284 : vector<1x64xf32> to vector<8x64xf32>
    %286 = arith.addf %283, %285 : vector<8x64xf32>
    %287 = arith.addf %280, %286 : vector<8x64xf32>
    %cst_122 = arith.constant dense<0.000000e+00> : vector<8xf32>
    %288 = vector.multi_reduction <add>, %287, %cst_122 [1] : vector<8x64xf32> to vector<8xf32>
    %289 = vector.shape_cast %288 : vector<8xf32> to vector<8x1xf32>
    %cst_123 = arith.constant 6.400000e+01 : f32
    %290 = vector.broadcast %cst_123 : f32 to vector<8x1xf32>
    %291 = arith.divf %289, %290 : vector<8x1xf32>
    %292 = vector.broadcast %291 : vector<8x1xf32> to vector<8x64xf32>
    %293 = arith.subf %287, %292 : vector<8x64xf32>
    %294 = arith.mulf %293, %293 : vector<8x64xf32>
    %cst_124 = arith.constant dense<0.000000e+00> : vector<8xf32>
    %295 = vector.multi_reduction <add>, %294, %cst_124 [1] : vector<8x64xf32> to vector<8xf32>
    %296 = vector.shape_cast %295 : vector<8xf32> to vector<8x1xf32>
    %cst_125 = arith.constant 6.400000e+01 : f32
    %297 = vector.broadcast %cst_125 : f32 to vector<8x1xf32>
    %298 = arith.divf %296, %297 : vector<8x1xf32>
    %299 = vector.broadcast %291 : vector<8x1xf32> to vector<8x64xf32>
    %300 = arith.subf %287, %299 : vector<8x64xf32>
    %cst_126 = arith.constant 9.99999974E-6 : f32
    %301 = vector.broadcast %cst_126 : f32 to vector<8x1xf32>
    %302 = arith.addf %298, %301 : vector<8x1xf32>
    %303 = math.rsqrt %302 : vector<8x1xf32>
    %304 = vector.broadcast %303 : vector<8x1xf32> to vector<8x64xf32>
    %305 = arith.mulf %300, %304 : vector<8x64xf32>
    %c25 = arith.constant 25 : index
    %c0_127 = arith.constant 0 : index
    %306 = vector.load %arg8[%c25, %c0_127] : memref<35x64xf32, #tpu.memory_space<vmem>>, vector<1x64xf32>
    %307 = vector.broadcast %306 : vector<1x64xf32> to vector<8x64xf32>
    %308 = arith.mulf %305, %307 : vector<8x64xf32>
    %c26 = arith.constant 26 : index
    %c0_128 = arith.constant 0 : index
    %309 = vector.load %arg8[%c26, %c0_128] : memref<35x64xf32, #tpu.memory_space<vmem>>, vector<1x64xf32>
    %310 = vector.broadcast %309 : vector<1x64xf32> to vector<8x64xf32>
    %311 = arith.addf %308, %310 : vector<8x64xf32>
    %312 = arith.addf %311, %183 : vector<8x64xf32>
    %cst_129 = arith.constant dense<0.000000e+00> : vector<8xf32>
    %313 = vector.multi_reduction <add>, %312, %cst_129 [1] : vector<8x64xf32> to vector<8xf32>
    %314 = vector.shape_cast %313 : vector<8xf32> to vector<8x1xf32>
    %cst_130 = arith.constant 6.400000e+01 : f32
    %315 = vector.broadcast %cst_130 : f32 to vector<8x1xf32>
    %316 = arith.divf %314, %315 : vector<8x1xf32>
    %317 = vector.broadcast %316 : vector<8x1xf32> to vector<8x64xf32>
    %318 = arith.subf %312, %317 : vector<8x64xf32>
    %319 = arith.mulf %318, %318 : vector<8x64xf32>
    %cst_131 = arith.constant dense<0.000000e+00> : vector<8xf32>
    %320 = vector.multi_reduction <add>, %319, %cst_131 [1] : vector<8x64xf32> to vector<8xf32>
    %321 = vector.shape_cast %320 : vector<8xf32> to vector<8x1xf32>
    %cst_132 = arith.constant 6.400000e+01 : f32
    %322 = vector.broadcast %cst_132 : f32 to vector<8x1xf32>
    %323 = arith.divf %321, %322 : vector<8x1xf32>
    %324 = vector.broadcast %316 : vector<8x1xf32> to vector<8x64xf32>
    %325 = arith.subf %312, %324 : vector<8x64xf32>
    %cst_133 = arith.constant 9.99999974E-6 : f32
    %326 = vector.broadcast %cst_133 : f32 to vector<8x1xf32>
    %327 = arith.addf %323, %326 : vector<8x1xf32>
    %328 = math.rsqrt %327 : vector<8x1xf32>
    %329 = vector.broadcast %328 : vector<8x1xf32> to vector<8x64xf32>
    %330 = arith.mulf %325, %329 : vector<8x64xf32>
    %c28 = arith.constant 28 : index
    %c0_134 = arith.constant 0 : index
    %331 = vector.load %arg8[%c28, %c0_134] : memref<35x64xf32, #tpu.memory_space<vmem>>, vector<1x64xf32>
    %332 = vector.broadcast %331 : vector<1x64xf32> to vector<8x64xf32>
    %333 = arith.mulf %330, %332 : vector<8x64xf32>
    %c29 = arith.constant 29 : index
    %c0_135 = arith.constant 0 : index
    %334 = vector.load %arg8[%c29, %c0_135] : memref<35x64xf32, #tpu.memory_space<vmem>>, vector<1x64xf32>
    %335 = vector.broadcast %334 : vector<1x64xf32> to vector<8x64xf32>
    %336 = arith.addf %333, %335 : vector<8x64xf32>
    %337 = arith.truncf %336 : vector<8x64xf32> to vector<8x64xbf16>
    %c3_136 = arith.constant 3 : index
    %c0_137 = arith.constant 0 : index
    %c0_138 = arith.constant 0 : index
    %338 = vector.load %arg5[%c3_136, %c0_137, %c0_138] : memref<4x64x2048xbf16, #tpu.memory_space<vmem>>, vector<1x64x2048xbf16>
    %339 = vector.shape_cast %338 : vector<1x64x2048xbf16> to vector<64x2048xbf16>
    %cst_139 = arith.constant dense<0.000000e+00> : vector<8x2048xf32>
    %340 = tpu.matmul %337, %339, %cst_139 {dimension_numbers = #tpu.dot_dimension_numbers<[1], [0], [0], [1], [0, 0, 1, 1], [], []>} : vector<8x64xbf16>, vector<64x2048xbf16>, vector<8x2048xf32> -> vector<8x2048xf32>
    %c3_140 = arith.constant 3 : index
    %c0_141 = arith.constant 0 : index
    %341 = vector.load %arg7[%c3_140, %c0_141] : memref<4x2048xf32, #tpu.memory_space<vmem>>, vector<1x2048xf32>
    %342 = vector.broadcast %341 : vector<1x2048xf32> to vector<8x2048xf32>
    %343 = arith.addf %340, %342 : vector<8x2048xf32>
    %cst_142 = arith.constant 0.000000e+00 : f32
    %344 = vector.broadcast %cst_142 : f32 to vector<8x2048xf32>
    %345 = arith.maximumf %343, %344 : vector<8x2048xf32>
    %346 = arith.truncf %345 : vector<8x2048xf32> to vector<8x2048xbf16>
    %c3_143 = arith.constant 3 : index
    %c0_144 = arith.constant 0 : index
    %c0_145 = arith.constant 0 : index
    %347 = vector.load %arg6[%c3_143, %c0_144, %c0_145] : memref<4x2048x64xbf16, #tpu.memory_space<vmem>>, vector<1x2048x64xbf16>
    %348 = vector.shape_cast %347 : vector<1x2048x64xbf16> to vector<2048x64xbf16>
    %cst_146 = arith.constant dense<0.000000e+00> : vector<8x64xf32>
    %349 = tpu.matmul %346, %348, %cst_146 {dimension_numbers = #tpu.dot_dimension_numbers<[1], [0], [0], [1], [0, 0, 1, 1], [], []>} : vector<8x2048xbf16>, vector<2048x64xbf16>, vector<8x64xf32> -> vector<8x64xf32>
    %c30 = arith.constant 30 : index
    %c0_147 = arith.constant 0 : index
    %350 = vector.load %arg8[%c30, %c0_147] : memref<35x64xf32, #tpu.memory_space<vmem>>, vector<1x64xf32>
    %351 = vector.broadcast %350 : vector<1x64xf32> to vector<8x64xf32>
    %352 = arith.addf %349, %351 : vector<8x64xf32>
    %353 = arith.addf %336, %352 : vector<8x64xf32>
    %cst_148 = arith.constant dense<0.000000e+00> : vector<8xf32>
    %354 = vector.multi_reduction <add>, %353, %cst_148 [1] : vector<8x64xf32> to vector<8xf32>
    %355 = vector.shape_cast %354 : vector<8xf32> to vector<8x1xf32>
    %cst_149 = arith.constant 6.400000e+01 : f32
    %356 = vector.broadcast %cst_149 : f32 to vector<8x1xf32>
    %357 = arith.divf %355, %356 : vector<8x1xf32>
    %358 = vector.broadcast %357 : vector<8x1xf32> to vector<8x64xf32>
    %359 = arith.subf %353, %358 : vector<8x64xf32>
    %360 = arith.mulf %359, %359 : vector<8x64xf32>
    %cst_150 = arith.constant dense<0.000000e+00> : vector<8xf32>
    %361 = vector.multi_reduction <add>, %360, %cst_150 [1] : vector<8x64xf32> to vector<8xf32>
    %362 = vector.shape_cast %361 : vector<8xf32> to vector<8x1xf32>
    %cst_151 = arith.constant 6.400000e+01 : f32
    %363 = vector.broadcast %cst_151 : f32 to vector<8x1xf32>
    %364 = arith.divf %362, %363 : vector<8x1xf32>
    %365 = vector.broadcast %357 : vector<8x1xf32> to vector<8x64xf32>
    %366 = arith.subf %353, %365 : vector<8x64xf32>
    %cst_152 = arith.constant 9.99999974E-6 : f32
    %367 = vector.broadcast %cst_152 : f32 to vector<8x1xf32>
    %368 = arith.addf %364, %367 : vector<8x1xf32>
    %369 = math.rsqrt %368 : vector<8x1xf32>
    %370 = vector.broadcast %369 : vector<8x1xf32> to vector<8x64xf32>
    %371 = arith.mulf %366, %370 : vector<8x64xf32>
    %c31 = arith.constant 31 : index
    %c0_153 = arith.constant 0 : index
    %372 = vector.load %arg8[%c31, %c0_153] : memref<35x64xf32, #tpu.memory_space<vmem>>, vector<1x64xf32>
    %373 = vector.broadcast %372 : vector<1x64xf32> to vector<8x64xf32>
    %374 = arith.mulf %371, %373 : vector<8x64xf32>
    %c32 = arith.constant 32 : index
    %c0_154 = arith.constant 0 : index
    %375 = vector.load %arg8[%c32, %c0_154] : memref<35x64xf32, #tpu.memory_space<vmem>>, vector<1x64xf32>
    %376 = vector.broadcast %375 : vector<1x64xf32> to vector<8x64xf32>
    %377 = arith.addf %374, %376 : vector<8x64xf32>
    %cst_155 = arith.constant dense<0.000000e+00> : vector<8xf32>
    %378 = vector.multi_reduction <add>, %377, %cst_155 [1] : vector<8x64xf32> to vector<8xf32>
    %379 = vector.shape_cast %378 : vector<8xf32> to vector<8x1xf32>
    %cst_156 = arith.constant 6.400000e+01 : f32
    %380 = vector.broadcast %cst_156 : f32 to vector<8x1xf32>
    %381 = arith.divf %379, %380 : vector<8x1xf32>
    %382 = vector.broadcast %381 : vector<8x1xf32> to vector<8x64xf32>
    %383 = arith.subf %377, %382 : vector<8x64xf32>
    %384 = arith.mulf %383, %383 : vector<8x64xf32>
    %cst_157 = arith.constant dense<0.000000e+00> : vector<8xf32>
    %385 = vector.multi_reduction <add>, %384, %cst_157 [1] : vector<8x64xf32> to vector<8xf32>
    %386 = vector.shape_cast %385 : vector<8xf32> to vector<8x1xf32>
    %cst_158 = arith.constant 6.400000e+01 : f32
    %387 = vector.broadcast %cst_158 : f32 to vector<8x1xf32>
    %388 = arith.divf %386, %387 : vector<8x1xf32>
    %389 = vector.broadcast %381 : vector<8x1xf32> to vector<8x64xf32>
    %390 = arith.subf %377, %389 : vector<8x64xf32>
    %cst_159 = arith.constant 9.99999974E-6 : f32
    %391 = vector.broadcast %cst_159 : f32 to vector<8x1xf32>
    %392 = arith.addf %388, %391 : vector<8x1xf32>
    %393 = math.rsqrt %392 : vector<8x1xf32>
    %394 = vector.broadcast %393 : vector<8x1xf32> to vector<8x64xf32>
    %395 = arith.mulf %390, %394 : vector<8x64xf32>
    %c33 = arith.constant 33 : index
    %c0_160 = arith.constant 0 : index
    %396 = vector.load %arg8[%c33, %c0_160] : memref<35x64xf32, #tpu.memory_space<vmem>>, vector<1x64xf32>
    %397 = vector.broadcast %396 : vector<1x64xf32> to vector<8x64xf32>
    %398 = arith.mulf %395, %397 : vector<8x64xf32>
    %c34 = arith.constant 34 : index
    %c0_161 = arith.constant 0 : index
    %399 = vector.load %arg8[%c34, %c0_161] : memref<35x64xf32, #tpu.memory_space<vmem>>, vector<1x64xf32>
    %400 = vector.broadcast %399 : vector<1x64xf32> to vector<8x64xf32>
    %401 = arith.addf %398, %400 : vector<8x64xf32>
    %c0_162 = arith.constant 0 : index
    %c0_163 = arith.constant 0 : index
    %402 = vector.load %arg9[%c0_162, %c0_163] : memref<64x128xf32, #tpu.memory_space<vmem>>, vector<64x128xf32>
    %cst_164 = arith.constant dense<0.000000e+00> : vector<8x128xf32>
    %403 = tpu.matmul %401, %402, %cst_164 {dimension_numbers = #tpu.dot_dimension_numbers<[1], [0], [0], [1], [0, 0, 1, 1], [], []>} : vector<8x64xf32>, vector<64x128xf32>, vector<8x128xf32> -> vector<8x128xf32>
    %c0_165 = arith.constant 0 : index
    %c0_166 = arith.constant 0 : index
    %404 = vector.load %arg10[%c0_165, %c0_166] : memref<1x128xf32, #tpu.memory_space<vmem>>, vector<1x128xf32>
    %405 = vector.broadcast %404 : vector<1x128xf32> to vector<8x128xf32>
    %406 = arith.addf %403, %405 : vector<8x128xf32>
    %c0_167 = arith.constant 0 : index
    %c0_168 = arith.constant 0 : index
    %407 = vector.load %arg11[%c0_167, %c0_168] : memref<8x128xf32, #tpu.memory_space<vmem>>, vector<8x128xf32>
    tpu.vector_store %arg11[%c0_167, %c0_168], %406 {strides = array<i32>} : memref<8x128xf32, #tpu.memory_space<vmem>>, vector<8x128xf32>,
    return
  }
  func.func @transform_0(%arg0: i32) -> (i32, i32) {
    %c0_i32 = arith.constant 0 : i32
    %c0_i32_0 = arith.constant 0 : i32
    return %arg0, %c0_i32 : i32, i32
  }
  func.func @transform_1(%arg0: i32) -> (i32, i32) {
    %c0_i32 = arith.constant 0 : i32
    %c0_i32_0 = arith.constant 0 : i32
    %c0_i32_1 = arith.constant 0 : i32
    return %c0_i32, %c0_i32_0 : i32, i32
  }
  func.func @transform_2(%arg0: i32) -> (i32, i32, i32) {
    %c0_i32 = arith.constant 0 : i32
    %c0_i32_0 = arith.constant 0 : i32
    %c0_i32_1 = arith.constant 0 : i32
    %c0_i32_2 = arith.constant 0 : i32
    return %c0_i32, %c0_i32_0, %c0_i32_1 : i32, i32, i32
  }
  func.func @transform_3(%arg0: i32) -> (i32, i32) {
    %c0_i32 = arith.constant 0 : i32
    %c0_i32_0 = arith.constant 0 : i32
    %c0_i32_1 = arith.constant 0 : i32
    return %c0_i32, %c0_i32_0 : i32, i32
  }
  func.func @transform_4(%arg0: i32) -> (i32, i32, i32) {
    %c0_i32 = arith.constant 0 : i32
    %c0_i32_0 = arith.constant 0 : i32
    %c0_i32_1 = arith.constant 0 : i32
    %c0_i32_2 = arith.constant 0 : i32
    return %c0_i32, %c0_i32_0, %c0_i32_1 : i32, i32, i32
  }
  func.func @transform_5(%arg0: i32) -> (i32, i32, i32) {
    %c0_i32 = arith.constant 0 : i32
    %c0_i32_0 = arith.constant 0 : i32
    %c0_i32_1 = arith.constant 0 : i32
    %c0_i32_2 = arith.constant 0 : i32
    return %c0_i32, %c0_i32_0, %c0_i32_1 : i32, i32, i32
  }
  func.func @transform_6(%arg0: i32) -> (i32, i32) {
    %c0_i32 = arith.constant 0 : i32
    %c0_i32_0 = arith.constant 0 : i32
    %c0_i32_1 = arith.constant 0 : i32
    return %c0_i32, %c0_i32_0 : i32, i32
  }
  func.func @transform_7(%arg0: i32) -> (i32, i32) {
    %c0_i32 = arith.constant 0 : i32
    %c0_i32_0 = arith.constant 0 : i32
    %c0_i32_1 = arith.constant 0 : i32
    return %c0_i32, %c0_i32_0 : i32, i32
  }
  func.func @transform_8(%arg0: i32) -> (i32, i32) {
    %c0_i32 = arith.constant 0 : i32
    %c0_i32_0 = arith.constant 0 : i32
    %c0_i32_1 = arith.constant 0 : i32
    return %c0_i32, %c0_i32_0 : i32, i32
  }
  func.func @transform_9(%arg0: i32) -> (i32, i32) {
    %c0_i32 = arith.constant 0 : i32
    %c0_i32_0 = arith.constant 0 : i32
    %c0_i32_1 = arith.constant 0 : i32
    return %c0_i32, %c0_i32_0 : i32, i32
  }
  func.func @transform_10(%arg0: i32) -> (i32, i32) {
    %c0_i32 = arith.constant 0 : i32
    %c0_i32_0 = arith.constant 0 : i32
    return %arg0, %c0_i32 : i32, i32
  }
}

</mosaic_0001>

<bundles_post_ra>
// kernel: _lambda_.1
= control target key start
LH: loop header
LB: loop body
LE: loop exit
PB: predicated region body
PF: predicated region fallthrough
CT: control target
= control target key end

     0   :  { %15 = vsyncpa [#allocation3], 0  ;;  %s16152_s0 = inlined_call_operand.vmem [shape: f32[8,16], index: 0, kind: input, shape index: {}]   ;;  %s16153_s1 = inlined_call_operand.vmem [shape: f32[16,64], index: 1, kind: input, shape index: {}]   ;;  %s16154_s2 = inlined_call_operand.hbm [shape: f32[4,64,64], index: 2, kind: input, shape index: {}]   ;;  %s16155_s3 = inlined_call_operand.hbm [shape: f32[64,128], index: 3, kind: input, shape index: {}]   ;;  %s16156_s4 = inlined_call_operand.vmem [shape: bf16[4,64,2048], index: 4, kind: input, shape index: {}]   ;;  %s16157_s5 = inlined_call_operand.vmem [shape: bf16[4,2048,64], index: 5, kind: input, shape index: {}]   ;;  %s16158_s6 = inlined_call_operand.hbm [shape: f32[4,2048], index: 6, kind: input, shape index: {}]   ;;  %s16159_s7 = inlined_call_operand.hbm [shape: f32[35,64], index: 7, kind: input, shape index: {}]   ;;  %s16160_s8 = inlined_call_operand.hbm [shape: f32[64,128], index: 8, kind: input, shape index: {}]   ;;  %s16161_s9 = inlined_call_operand.vmem [shape: f32[1,128], index: 9, kind: input, shape index: {}]   ;;  %s16162_s10 = inlined_call_operand.hbm [shape: f32[8,128], index: 10, kind: output, shape index: {}]  }
   0x1   :  { %16 = vsyncpa [#allocation6], 0 }
   0x2   :  { %17 = vsyncpa [#allocation9], 0 }
   0x3   :  { %18 = vsyncpa [#allocation4], 0  ;;  %s13234_s13 = smov [#allocation5]   ;;  %s13235_s15 = smov [#allocation8]  }
   0x4   :  { %s40_s14 = sshll.u32 %s13234_s13, 4  ;;  %s66_s16 = sshll.u32 %s13235_s15, 4  ;;  %s41_s14 = int_to_ptr.vmem [resolvable:$true] %s40_s14  ;;  %s13302_s16 = int_to_ptr.vmem [resolvable:$true] %s66_s16 }
   0x5   :  { %s13094_s19 = scalar_lea.hbm %s16155_s3, 1024 }
   0x6   :  { %p13095_p0 = scmp.ne.s32.totalorder %s16155_s3, %s13094_s19  ;;  %p13098_p1 = scmp.lt.u32.totalorder %s13094_s19, %s16155_s3 }
   0x8   :  { %p13100_p2 = pnand %p13098_p1, %p13095_p0 }
   0xa   :  { %13103 = shalt.err (!%p13100_p2)
}
   0xb   :  { %s13104_s24 = scalar_lea.vmem %s41_s14, 1024  ;;  %p13109_p4 = scmp.lt.s32.totalorder %s41_s14, %s41_s14 }
   0xc   :  { %p13105_p3 = scmp.ne.s32.totalorder %s41_s14, %s13104_s24  ;;  %p13110_p5 = scmp.lt.s32.totalorder %s13104_s24, %s13104_s24 }
   0xe   :  { %p13111_p6 = por %p13110_p5, %p13109_p4 }
  0x10   :  { %p13112_p7 = pnand %p13111_p6, %p13105_p3 }
  0x12   :  { %13115 = shalt.err (!%p13112_p7)
}
  0x13   :  { %s13236_s25 = smov 128   ;;  %s13237_s26 = smov 8  }
  0x14   :  { %46 = dma.hbm_to_vmem [thread:$0]  %s16155_s3, 1024, %s41_s14, [#allocation6], %s13236_s25, %s13236_s25, %s13237_s26  }
  0x15   :  { %s13116_s11 = scalar_lea.hbm %s16159_s7, 640 }
  0x16   :  { %p13117_p8 = scmp.ne.s32.totalorder %s16159_s7, %s13116_s11  ;;  %p13120_p9 = scmp.lt.u32.totalorder %s13116_s11, %s16159_s7 }
  0x18   :  { %p13122_p10 = pnand %p13120_p9, %p13117_p8 }
  0x1a   :  { %13125 = shalt.err (!%p13122_p10)
}
  0x1b   :  { %s13126_s18 = scalar_lea.vmem %s13302_s16, 640  ;;  %p13131_p12 = scmp.lt.s32.totalorder %s13302_s16, %s13302_s16 }
  0x1c   :  { %p13127_p11 = scmp.ne.s32.totalorder %s13302_s16, %s13126_s18  ;;  %p13132_p13 = scmp.lt.s32.totalorder %s13126_s18, %s13126_s18 }
  0x1e   :  { %p13133_p0 = por %p13132_p13, %p13131_p12 }
  0x20   :  { %p13134_p1 = pnand %p13133_p0, %p13127_p11 }
  0x22   :  { %13137 = shalt.err (!%p13134_p1)
}
  0x23   :  { %72 = dma.hbm_to_vmem [thread:$0]  %s16159_s7, 640, %s13302_s16, [#allocation9], %s13236_s25, %s13236_s25, %s13237_s26  }
  0x24   :  { %s13238_s19 = smov [#allocation2]   ;;  %s13239_s21 = smov [#allocation7]  }
  0x25   :  { %s28_s20 = sshll.u32 %s13238_s19, 4  ;;  %s57_s22 = sshll.u32 %s13239_s21, 4  ;;  %s29_s20 = int_to_ptr.vmem [resolvable:$true] %s28_s20  ;;  %s58_s22 = int_to_ptr.vmem [resolvable:$true] %s57_s22 }
  0x26   :  { %s13138_s27 = scalar_lea.hbm %s16154_s2, 4096 }
  0x27   :  { %p13139_p2 = scmp.ne.s32.totalorder %s16154_s2, %s13138_s27  ;;  %p13142_p3 = scmp.lt.u32.totalorder %s13138_s27, %s16154_s2 }
  0x29   :  { %p13144_p4 = pnand %p13142_p3, %p13139_p2 }
  0x2b   :  { %13147 = shalt.err (!%p13144_p4)
}
  0x2c   :  { %s13148_s7 = scalar_lea.vmem %s29_s20, 4096  ;;  %p13153_p6 = scmp.lt.s32.totalorder %s29_s20, %s29_s20 }
  0x2d   :  { %p13149_p5 = scmp.ne.s32.totalorder %s29_s20, %s13148_s7  ;;  %p13154_p7 = scmp.lt.s32.totalorder %s13148_s7, %s13148_s7 }
  0x2f   :  { %p13155_p8 = por %p13154_p7, %p13153_p6 }
  0x31   :  { %p13156_p9 = pnand %p13155_p8, %p13149_p5 }
  0x33   :  { %13159 = shalt.err (!%p13156_p9)
}
  0x34   :  { %34 = dma.hbm_to_vmem [thread:$0]  %s16154_s2, 4096, %s29_s20, [#allocation3], %s13236_s25, %s13236_s25, %s13237_s26  }
  0x35   :  { %s13160_s17 = scalar_lea.hbm %s16158_s6, 1024 }
  0x36   :  { %p13161_p10 = scmp.ne.s32.totalorder %s16158_s6, %s13160_s17  ;;  %p13164_p11 = scmp.lt.u32.totalorder %s13160_s17, %s16158_s6 }
  0x38   :  { %p13166_p12 = pnand %p13164_p11, %p13161_p10 }
  0x3a   :  { %13169 = shalt.err (!%p13166_p12)
}
  0x3b   :  { %s13170_s21 = scalar_lea.vmem %s58_s22, 1024  ;;  %p13175_p0 = scmp.lt.s32.totalorder %s58_s22, %s58_s22 }
  0x3c   :  { %p13171_p13 = scmp.ne.s32.totalorder %s58_s22, %s13170_s21  ;;  %p13176_p1 = scmp.lt.s32.totalorder %s13170_s21, %s13170_s21 }
  0x3e   :  { %p13177_p2 = por %p13176_p1, %p13175_p0 }
  0x40   :  { %p13178_p3 = pnand %p13177_p2, %p13171_p13 }
  0x42   :  { %13181 = shalt.err (!%p13178_p3)
}
  0x43   :  { %60 = dma.hbm_to_vmem [thread:$0]  %s16158_s6, 1024, %s58_s22, [#allocation6]  }
  0x44   :  { %s13240_s23 = smov [#allocation10]   ;;  %s13182_s29 = scalar_lea.hbm %s16160_s8, 1024 }
  0x45   :  { %s78_s24 = sshll.u32 %s13240_s23, 4  ;;  %p13183_p4 = scmp.ne.s32.totalorder %s16160_s8, %s13182_s29  ;;  %s79_s24 = int_to_ptr.vmem [resolvable:$true] %s78_s24 }
  0x46   :  { %p13186_p5 = scmp.lt.u32.totalorder %s13182_s29, %s16160_s8 }
  0x48   :  { %p13188_p6 = pnand %p13186_p5, %p13183_p4 }
  0x4a   :  { %13191 = shalt.err (!%p13188_p6)
}
  0x4b   :  { %s13192_s12 = scalar_lea.vmem %s79_s24, 1024  ;;  %p13197_p8 = scmp.lt.s32.totalorder %s79_s24, %s79_s24 }
  0x4c   :  { %p13193_p7 = scmp.ne.s32.totalorder %s79_s24, %s13192_s12  ;;  %p13198_p9 = scmp.lt.s32.totalorder %s13192_s12, %s13192_s12 }
  0x4e   :  { %p13199_p10 = por %p13198_p9, %p13197_p8 }
  0x50   :  { %p13200_p11 = pnand %p13199_p10, %p13193_p7 }
  0x52   :  { %13203 = shalt.err (!%p13200_p11)
}
  0x53   :  { %84 = dma.hbm_to_vmem [thread:$0]  %s16160_s8, 1024, %s79_s24, [#allocation9], %s13236_s25, %s13236_s25, %s13237_s26  }
  0x54   :  { %13226 = dma.done.wait [#allocation3], 4096  }
  0x55   :  { %13227 = vsyncadd [#allocation3], 4294963200 }
  0x56   :  { %13228 = dma.done.wait [#allocation6], 2048  }
  0x57   :  { %13229 = vsyncadd [#allocation6], 4294965248 }
  0x58   :  { %13230 = dma.done.wait [#allocation9], 1664  }
  0x59   :  { %13231 = vsyncadd [#allocation9], 4294965632  ;;  %v13241_v0 = vmov 0.0|0.0   ;;  %vm13242_vm0 = vmmov 0   ;;  %v13243_v1 = vmov 0.0   ;;  %v104_v2 = vld [vmem:[%s16153_s1] sm:$0xff] }
  0x5a   :  { %12470 = vmatprep.subr.bf16.mxu0 %v13241_v0  ;;  %12353 = vmatprep.mubr.msk.f32.mxu0 %vm13242_vm0, %v13243_v1  ;;  %v105_v3 = vld [vmem:[%s16153_s1 + $0x8] sm:$0xff]  ;;  %v185_v5 = vld [vmem:[#allocation2] sm:$0xff]  ;;  %v187_v7 = vld [vmem:[#allocation2 + $0x10] sm:$0xff]  ;;  %vm111_vm1 = vcmask 130048   ;;  %vm198_vm2 = vcmask 523264   ;;  %s13245_s12 = smov 64  }
  0x5b   :  { %12473 = vmatprep.subr.bf16.mxu1 %v13241_v0  ;;  %12372 = vmatprep.mubr.msk.f32.mxu1 %vm13242_vm0, %v13243_v1  ;;  %v12471_v4 = vpack.c.bf16 %v105_v3, %v104_v2  ;;  %v186_v6 = vld [vmem:[#allocation2 + $0x8] sm:$0xff]  ;;  %v103_v8 = vld [vmem:[%s16152_s0] sm:$0xff]  ;;  %v188_v10 = vld [vmem:[#allocation2 + $0x18] sm:$0xff]  ;;  %s13246_s7 = smov [#allocation11]  }
  0x5c   :  { %v12474_v9 = vpack.c.bf16 %v186_v6, %v185_v5  ;;  %v189_v11 = vld [vmem:[#allocation2 + $0x20] sm:$0xff]  ;;  %v190_v12 = vld [vmem:[#allocation2 + $0x28] sm:$0xff]  ;;  %v12477_v13 = vpack.c.bf16 %v188_v10, %v187_v7  ;;  %v191_v15 = vld [vmem:[#allocation2 + $0x30] sm:$0xff]  ;;  %s9774_s16 = sshll.u32 %s13246_s7, 4  ;;  %s9775_s16 = int_to_ptr.vmem [resolvable:$true] %s9774_s16 }
  0x5d   :  { %12472 = vmatpush3.bf16.msra.mxu0 %v12471_v4  ;;  %v12480_v14 = vpack.c.bf16 %v190_v12, %v189_v11  ;;  %v192_v16 = vld [vmem:[#allocation2 + $0x38] sm:$0xff]  ;;  %v9785_v18 = vld [vmem:[#allocation8] ss:$0 sm:$0xff]  ;;  %v9787_v22 = vld [vmem:[#allocation8 + $0x1] ss:$0 sm:$0xff]  ;;  %v13244_v11 = vmov 0   ;;  %p13209_p13 = scmp.lt.s32.totalorder %s9775_s16, %s9775_s16 }
  0x5e   :  { %12475 = vmatpush3.bf16.msra.mxu1 %v12474_v9  ;;  %v12483_v17 = vpack.c.bf16 %v192_v16, %v191_v15  ;;  %v300_v33 = vld [vmem:[%s16156_s4] sm:$0xff]  ;;  %v301_v35 = vld [vmem:[%s16156_s4 + $0x8] sm:$0xff]  ;;  %v302_v3 = vld [vmem:[%s16156_s4 + $0x10] sm:$0xff] }
  0x5f   :  { %12476 = vmatprep.subr.bf16.mxu1 %v13241_v0  ;;  %v308_v34 = vld [vmem:[%s16156_s4 + $0x40] sm:$0xff]  ;;  %v309_v37 = vld [vmem:[%s16156_s4 + $0x48] sm:$0xff]  ;;  %v310_v4 = vld [vmem:[%s16156_s4 + $0x50] sm:$0xff] }
  0x60   :  { %12354 = vmatmul.mubr.msk.f32.vlgmr.msra.gmra.mrb[0].mxu0 %vm111_vm1, %v103_v8  ;;  %v9792_v36 = vcombine.high %v300_v33, %v308_v34  ;;  %v9791_v38 = vcombine.low %v300_v33, %v308_v34  ;;  %v9793_v39 = vcombine.low %v301_v35, %v309_v37  ;;  %v9794_v40 = vcombine.high %v301_v35, %v309_v37  ;;  %v316_v41 = vld [vmem:[%s16156_s4 + $0x80] sm:$0xff]  ;;  %v317_v43 = vld [vmem:[%s16156_s4 + $0x88] sm:$0xff]  ;;  %v303_v5 = vld [vmem:[%s16156_s4 + $0x18] sm:$0xff] }
  0x61   :  { %v324_v42 = vld [vmem:[%s16156_s4 + $0xc0] sm:$0xff]  ;;  %v325_v45 = vld [vmem:[%s16156_s4 + $0xc8] sm:$0xff]  ;;  %v9796_v6 = vcombine.high %v302_v3, %v310_v4  ;;  %v311_v7 = vld [vmem:[%s16156_s4 + $0x58] sm:$0xff]  ;;  %v9795_v8 = vcombine.low %v302_v3, %v310_v4  ;;  %804 = vmatprep.mubr.bf16.mxu0 %v13244_v11 }
  0x62   :  { %12478 = vmatpush3.bf16.msra.mxu1 %v12477_v13  ;;  %772 = vmatprep.subr.bf16.mxu0 %v9792_v36  ;;  %v9808_v44 = vcombine.high %v316_v41, %v324_v42  ;;  %v9807_v46 = vcombine.low %v316_v41, %v324_v42  ;;  %v9809_v47 = vcombine.low %v317_v43, %v325_v45  ;;  %v332_v49 = vld [vmem:[%s16156_s4 + $0x100] sm:$0xff]  ;;  %v333_v51 = vld [vmem:[%s16156_s4 + $0x108] sm:$0xff]  ;;  %v350_v37 = vld [vmem:[%s16156_s4 + $0x190] sm:$0xff] }
  0x63   :  { %12479 = vmatprep.subr.bf16.mxu1 %v13241_v0  ;;  %773 = vmatpush1.bf16.msra.mxu0 %v9791_v38  ;;  %v9810_v48 = vcombine.high %v317_v43, %v325_v45  ;;  %v340_v50 = vld [vmem:[%s16156_s4 + $0x140] sm:$0xff]  ;;  %v341_v53 = vld [vmem:[%s16156_s4 + $0x148] sm:$0xff]  ;;  %v9797_v9 = vcombine.low %v303_v5, %v311_v7  ;;  %v9798_v10 = vcombine.high %v303_v5, %v311_v7  ;;  %v358_v38 = vld [vmem:[%s16156_s4 + $0x1d0] sm:$0xff] }
  0x64   :  { %774 = vmatprep.subr.bf16.mxu0 %v9808_v44  ;;  %v9824_v52 = vcombine.high %v332_v49, %v340_v50  ;;  %v9823_v54 = vcombine.low %v332_v49, %v340_v50  ;;  %v9825_v55 = vcombine.low %v333_v51, %v341_v53  ;;  %v9826_v56 = vcombine.high %v333_v51, %v341_v53  ;;  %v348_v57 = vld [vmem:[%s16156_s4 + $0x180] sm:$0xff]  ;;  %v349_v59 = vld [vmem:[%s16156_s4 + $0x188] sm:$0xff] }
  0x65   :  { %v356_v58 = vld [vmem:[%s16156_s4 + $0x1c0] sm:$0xff]  ;;  %v357_v61 = vld [vmem:[%s16156_s4 + $0x1c8] sm:$0xff]  ;;  %v9844_v43 = vcombine.high %v350_v37, %v358_v38  ;;  %v9843_v49 = vcombine.low %v350_v37, %v358_v38  ;;  %v339_v37 = vld [vmem:[%s16156_s4 + $0x138] sm:$0xff] }
  0x66   :  { %12481 = vmatpush3.bf16.msra.mxu1 %v12480_v14  ;;  %v9840_v60 = vcombine.high %v348_v57, %v356_v58  ;;  %v9839_v62 = vcombine.low %v348_v57, %v356_v58  ;;  %v9841_v63 = vcombine.low %v349_v59, %v357_v61  ;;  %v9842_v2 = vcombine.high %v349_v59, %v357_v61  ;;  %v9789_v16 = vld [vmem:[#allocation8 + $0x2] ss:$0 sm:$0xff]  ;;  %v347_v38 = vld [vmem:[%s16156_s4 + $0x178] sm:$0xff] }
  0x67   :  { %12482 = vmatprep.subr.bf16.mxu1 %v13241_v0  ;;  %775 = vmatpush1.bf16.msra.mxu0 %v9807_v46  ;;  %v304_v45 = vld [vmem:[%s16156_s4 + $0x20] sm:$0xff] }
  0x68   :  { %776 = vmatprep.subr.bf16.mxu0 %v9824_v52  ;;  %v312_v46 = vld [vmem:[%s16156_s4 + $0x60] sm:$0xff] }
  0x69   :  { %v9800_v51 = vcombine.high %v304_v45, %v312_v46  ;;  %v320_v53 = vld [vmem:[%s16156_s4 + $0xa0] sm:$0xff]  ;;  %v9799_v57 = vcombine.low %v304_v45, %v312_v46  ;;  %v355_v45 = vld [vmem:[%s16156_s4 + $0x1b8] sm:$0xff] }
  0x6a   :  { %12484 = vmatpush3.bf16.msra.mxu1 %v12483_v17  ;;  %v336_v61 = vld [vmem:[%s16156_s4 + $0x120] sm:$0xff]  ;;  %v363_v46 = vld [vmem:[%s16156_s4 + $0x1f8] sm:$0xff] }
  0x6b   :  { %813 = vmatprep.subr.bf16.mxu1 %v9794_v40  ;;  %777 = vmatpush1.bf16.msra.mxu0 %v9823_v54  ;;  %v359_v40 = vld [vmem:[%s16156_s4 + $0x1d8] sm:$0xff]  ;;  %v328_v54 = vld [vmem:[%s16156_s4 + $0xe0] sm:$0xff] }
  0x6c   :  { %778 = vmatprep.subr.bf16.mxu0 %v9840_v60  ;;  %v9816_v59 = vcombine.high %v320_v53, %v328_v54  ;;  %v9815_v3 = vcombine.low %v320_v53, %v328_v54  ;;  %v352_v7 = vld [vmem:[%s16156_s4 + $0x1a0] sm:$0xff] }
  0x6d   :  { %v12558_v53 = vld [vmem:[%s16157_s5 + $0x40] sm:$0xff]  }
  0x6e   :  { %v12559_v54 = vld [vmem:[%s16157_s5 + $0xc0] sm:$0xff]  }
  0x6f   :  { %779 = vmatpush1.bf16.msra.mxu0 %v9839_v62  ;;  %v344_v62 = vld [vmem:[%s16156_s4 + $0x160] sm:$0xff] }
  0x70   :  { %854 = vmatprep.subr.bf16.mxu0 %v9796_v6  ;;  %v9832_v5 = vcombine.high %v336_v61, %v344_v62 }
 0x133   :  { %v181_v19 = vpop.f32.mrb[0].mxu0 }
 0x134   :  { %v13399_v20 = vadd.f32 %v9785_v18, %v181_v19  ;;  %v12355_v21 = vpop.f32.mrb[1].mxu0  ;;  %v9790_v18 = vld [vmem:[#allocation8 + $0x3] ss:$0 sm:$0xff] }
 0x135   :  { %v318_v21 = vld [vmem:[%s16156_s4 + $0x90] sm:$0xff] }
 0x136   :  { %12373 = vmatmul.mubr.msk.f32.vlgmr.msra.gmra.mrb[0].mxu1 %vm198_vm2, %v13399_v20 }
 0x137   :  { %814 = vmatpush1.bf16.msra.mxu1 %v9793_v39  ;;  %845 = vmatprep.mubr.bf16.mxu1 %v13244_v11  ;;  %v351_v39 = vld [vmem:[%s16156_s4 + $0x198] sm:$0xff] }
 0x138   :  { %815 = vmatprep.subr.bf16.mxu1 %v9810_v48  ;;  %v9846_v44 = vcombine.high %v351_v39, %v359_v40  ;;  %v313_v48 = vld [vmem:[%s16156_s4 + $0x68] sm:$0xff]  ;;  %v9845_v50 = vcombine.low %v351_v39, %v359_v40 }
 0x13b   :  { %816 = vmatpush1.bf16.msra.mxu1 %v9809_v47  ;;  %v305_v47 = vld [vmem:[%s16156_s4 + $0x28] sm:$0xff] }
 0x13c   :  { %817 = vmatprep.subr.bf16.mxu1 %v9826_v56  ;;  %v9802_v52 = vcombine.high %v305_v47, %v313_v48  ;;  %v329_v56 = vld [vmem:[%s16156_s4 + $0xe8] sm:$0xff]  ;;  %v9801_v58 = vcombine.low %v305_v47, %v313_v48  ;;  %v9837_v48 = vcombine.low %v339_v37, %v347_v38 }
 0x13f   :  { %818 = vmatpush1.bf16.msra.mxu1 %v9825_v55  ;;  %v321_v55 = vld [vmem:[%s16156_s4 + $0xa8] sm:$0xff] }
 0x140   :  { %819 = vmatprep.subr.bf16.mxu1 %v9842_v2  ;;  %v9818_v60 = vcombine.high %v321_v55, %v329_v56  ;;  %v345_v2 = vld [vmem:[%s16156_s4 + $0x168] sm:$0xff]  ;;  %v9817_v4 = vcombine.low %v321_v55, %v329_v56  ;;  %v12560_v55 = vld [vmem:[%s16157_s5] sm:$0xff]  }
 0x141   :  { %v12561_v56 = vld [vmem:[%s16157_s5 + $0x80] sm:$0xff]  }
 0x143   :  { %820 = vmatpush1.bf16.msra.mxu1 %v9841_v63  ;;  %v337_v63 = vld [vmem:[%s16156_s4 + $0x128] sm:$0xff] }
 0x144   :  { %895 = vmatprep.subr.bf16.mxu1 %v9798_v10  ;;  %v9834_v6 = vcombine.high %v337_v63, %v345_v2  ;;  %v361_v10 = vld [vmem:[%s16156_s4 + $0x1e8] sm:$0xff] }
 0x209   :  { %v268_v23 = vpop.f32.mrb[0].mxu1 }
 0x20a   :  { %v269_v24 = vadd.f32 %v9787_v22, %v268_v23  ;;  %v12374_v25 = vpop.f32.mrb[1].mxu1  ;;  %v326_v22 = vld [vmem:[%s16156_s4 + $0xd0] sm:$0xff]  ;;  %v319_v23 = vld [vmem:[%s16156_s4 + $0x98] sm:$0xff] }
 0x20b   :  { %v9811_v33 = vcombine.low %v318_v21, %v326_v22 }
 0x20c   :  { %v272_v26 = vadd.f32 %v269_v24, %v13399_v20  ;;  %v327_v24 = vld [vmem:[%s16156_s4 + $0xd8] sm:$0xff] }
 0x20d   :  { %v9813_v34 = vcombine.low %v319_v23, %v327_v24 }
 0x20e   :  { %v273_v27 = vsel %vm198_vm2, %v272_v26, 0.0 }
 0x20f   :  { %274 = vadd.xlane.f32.xlu0 %v273_v27  ;;  %v9812_v27 = vcombine.high %v318_v21, %v326_v22 }
 0x29c   :  { %v275_v28 = vpop.xlane.xlu0 %274 }
 0x29d   :  { %v277_v29 = vmul.f32 0.015625, %v275_v28  ;;  %v9814_v28 = vcombine.high %v319_v23, %v327_v24 }
 0x29f   :  { %v13405_v30 = vsub.f32 %v272_v26, %v277_v29  ;;  %v334_v29 = vld [vmem:[%s16156_s4 + $0x110] sm:$0xff] }
 0x2a1   :  { %v279_v31 = vmul.f32 %v13405_v30, %v13405_v30 }
 0x2a3   :  { %v280_v32 = vsel %vm198_vm2, %v279_v31, 0.0  ;;  %v335_v31 = vld [vmem:[%s16156_s4 + $0x118] sm:$0xff] }
 0x2a4   :  { %281 = vadd.xlane.f32.xlu0 %v280_v32  ;;  %v343_v32 = vld [vmem:[%s16156_s4 + $0x158] sm:$0xff] }
 0x2a5   :  { %v9830_v36 = vcombine.high %v335_v31, %v343_v32  ;;  %v9829_v42 = vcombine.low %v335_v31, %v343_v32 }
 0x331   :  { %v282_v12 = vpop.xlane.xlu0 %281 }
 0x332   :  { %v283_v13 = vmul.f32 0.015625, %v282_v12  ;;  %v9831_v12 = vcombine.low %v336_v61, %v344_v62  ;;  %v12566_v61 = vld [vmem:[%s16157_s5 + $0x50] sm:$0xff]  }
 0x333   :  { %v12568_v62 = vld [vmem:[%s16157_s5 + $0x10] sm:$0xff]  }
 0x334   :  { %v284_v14 = vadd.f32 1e-05, %v283_v13  ;;  %v9833_v13 = vcombine.low %v337_v63, %v345_v2  ;;  %v12569_v63 = vld [vmem:[%s16157_s5 + $0x90] sm:$0xff]   ;;  %v12570_v2 = vld [vmem:[%s16157_s5 + $0x58] sm:$0xff]  }
 0x336   :  { %13070 = vrsqrt.f32 %v284_v14 }
 0x340   :  { %v13071_v15 = vpop.eup %13070 }
 0x341   :  { %v286_v17 = vmul.f32 %v13071_v15, %v13405_v30  ;;  %v342_v30 = vld [vmem:[%s16156_s4 + $0x150] sm:$0xff] }
 0x342   :  { %v9828_v35 = vcombine.high %v334_v29, %v342_v30  ;;  %v9827_v41 = vcombine.low %v334_v29, %v342_v30  ;;  %v323_v29 = vld [vmem:[%s16156_s4 + $0xb8] sm:$0xff] }
 0x343   :  { %v292_v19 = vmul.f32 %v9789_v16, %v286_v17  ;;  %v306_v16 = vld [vmem:[%s16156_s4 + $0x30] sm:$0xff]  ;;  %v331_v30 = vld [vmem:[%s16156_s4 + $0xf8] sm:$0xff] }
 0x344   :  { %v314_v17 = vld [vmem:[%s16156_s4 + $0x70] sm:$0xff]  ;;  %v9821_v40 = vcombine.low %v323_v29, %v331_v30 }
 0x345   :  { %v13485_v25 = vadd.f32 %v9790_v18, %v292_v19  ;;  %v307_v18 = vld [vmem:[%s16156_s4 + $0x38] sm:$0xff]  ;;  %v9804_v23 = vcombine.high %v306_v16, %v314_v17  ;;  %v9803_v31 = vcombine.low %v306_v16, %v314_v17  ;;  %v12583_v16 = vld [vmem:[%s16157_s5 + $0xf0] sm:$0xff]  }
 0x346   :  { %v315_v19 = vld [vmem:[%s16156_s4 + $0x78] sm:$0xff]  ;;  %v12584_v17 = vld [vmem:[%s16157_s5 + $0x30] sm:$0xff]  }
 0x347   :  { %v13489_v26 = vpack.c.bf16 %v13485_v25, %v13485_v25  ;;  %v9806_v24 = vcombine.high %v307_v18, %v315_v19  ;;  %v9805_v32 = vcombine.low %v307_v18, %v315_v19  ;;  %v12585_v18 = vld [vmem:[%s16157_s5 + $0xb0] sm:$0xff]   ;;  %v12586_v19 = vld [vmem:[%s16157_s5 + $0x78] sm:$0xff]  }
 0x349   :  { %9855 = vmatmul.mubr.msk.bf16.vlgmr.msra.gmra.mrb[4].mxu0 %vm198_vm2, %v13489_v26  ;;  %9856 = vmatmul.mubr.msk.bf16.vlgmr.msra.gmra.mrb[4].mxu1 %vm198_vm2, %v13489_v26 }
 0x34a   :  { %855 = vmatpush1.bf16.msra.mxu0 %v9795_v8  ;;  %896 = vmatpush1.bf16.msra.mxu1 %v9797_v9  ;;  %v360_v8 = vld [vmem:[%s16156_s4 + $0x1e0] sm:$0xff]  ;;  %v353_v9 = vld [vmem:[%s16156_s4 + $0x1a8] sm:$0xff] }
 0x34b   :  { %856 = vmatprep.subr.bf16.mxu0 %v9812_v27  ;;  %897 = vmatprep.subr.bf16.mxu1 %v9814_v28  ;;  %v9848_v14 = vcombine.high %v352_v7, %v360_v8  ;;  %v9850_v15 = vcombine.high %v353_v9, %v361_v10  ;;  %v9847_v21 = vcombine.low %v352_v7, %v360_v8  ;;  %v322_v27 = vld [vmem:[%s16156_s4 + $0xb0] sm:$0xff]  ;;  %v12575_v7 = vld [vmem:[%s16157_s5 + $0xe0] sm:$0xff]  }
 0x34c   :  { %886 = vmatprep.mubr.bf16.mxu0 %v13244_v11  ;;  %927 = vmatprep.mubr.bf16.mxu1 %v13244_v11  ;;  %v9849_v22 = vcombine.low %v353_v9, %v361_v10  ;;  %v330_v28 = vld [vmem:[%s16156_s4 + $0xf0] sm:$0xff]  ;;  %v12576_v8 = vld [vmem:[%s16157_s5 + $0x20] sm:$0xff]   ;;  %v12578_v10 = vld [vmem:[%s16157_s5 + $0x68] sm:$0xff]  }
 0x34d   :  { %v9819_v39 = vcombine.low %v322_v27, %v330_v28  ;;  %v12577_v9 = vld [vmem:[%s16157_s5 + $0xa0] sm:$0xff]  }
 0x34e   :  { %857 = vmatpush1.bf16.msra.mxu0 %v9811_v33  ;;  %898 = vmatpush1.bf16.msra.mxu1 %v9813_v34  ;;  %v9820_v33 = vcombine.high %v322_v27, %v330_v28  ;;  %v9822_v34 = vcombine.high %v323_v29, %v331_v30  ;;  %v12591_v27 = vld [vmem:[%s16157_s5 + $0x1c0] sm:$0xff]   ;;  %v369_v28 = vlaneseq }
 0x34f   :  { %858 = vmatprep.subr.bf16.mxu0 %v9828_v35  ;;  %899 = vmatprep.subr.bf16.mxu1 %v9830_v36  ;;  %v338_v35 = vld [vmem:[%s16156_s4 + $0x130] sm:$0xff] }
 0x350   :  { %v346_v36 = vld [vmem:[%s16156_s4 + $0x170] sm:$0xff]  ;;  %v13735_v29 = vshrl.u32 %v369_v28, 7  ;;  %v12606_v28 = vld [vmem:[%s16157_s5 + $0x160] sm:$0xff]  }
 0x351   :  { %v9835_v47 = vcombine.low %v338_v35, %v346_v36 }
 0x352   :  { %859 = vmatpush1.bf16.msra.mxu0 %v9827_v41  ;;  %900 = vmatpush1.bf16.msra.mxu1 %v9829_v42  ;;  %v9836_v41 = vcombine.high %v338_v35, %v346_v36  ;;  %v9838_v42 = vcombine.high %v339_v37, %v347_v38  ;;  %v13738_v30 = vsub.s32 0, %v13735_v29 }
 0x353   :  { %860 = vmatprep.subr.bf16.mxu0 %v9844_v43  ;;  %901 = vmatprep.subr.bf16.mxu1 %v9846_v44  ;;  %v354_v43 = vld [vmem:[%s16156_s4 + $0x1b0] sm:$0xff] }
 0x354   :  { %v362_v44 = vld [vmem:[%s16156_s4 + $0x1f0] sm:$0xff] }
 0x356   :  { %861 = vmatpush1.bf16.msra.mxu0 %v9843_v49  ;;  %902 = vmatpush1.bf16.msra.mxu1 %v9845_v50  ;;  %v9852_v49 = vcombine.high %v354_v43, %v362_v44  ;;  %v9854_v50 = vcombine.high %v355_v45, %v363_v46 }
 0x357   :  { %936 = vmatprep.subr.bf16.mxu0 %v9800_v51  ;;  %977 = vmatprep.subr.bf16.mxu1 %v9802_v52  ;;  %v9851_v51 = vcombine.low %v354_v43, %v362_v44  ;;  %v9853_v52 = vcombine.low %v355_v45, %v363_v46 }
 0x359   :  { %9857 = vmatmul.mubr.msk.bf16.vlgmr.msra.gmra.mrb[8].mxu0 %vm198_vm2, %v13489_v26  ;;  %9858 = vmatmul.mubr.msk.bf16.vlgmr.msra.gmra.mrb[8].mxu1 %vm198_vm2, %v13489_v26 }
 0x35a   :  { %937 = vmatpush1.bf16.msra.mxu0 %v9799_v57  ;;  %978 = vmatpush1.bf16.msra.mxu1 %v9801_v58  ;;  %v12562_v57 = vld [vmem:[%s16157_s5 + $0x48] sm:$0xff]  }
 0x35b   :  { %938 = vmatprep.subr.bf16.mxu0 %v9816_v59  ;;  %979 = vmatprep.subr.bf16.mxu1 %v9818_v60  ;;  %v12563_v58 = vld [vmem:[%s16157_s5 + $0xc8] sm:$0xff]  }
 0x35c   :  { %968 = vmatprep.mubr.bf16.mxu0 %v13244_v11  ;;  %1009 = vmatprep.mubr.bf16.mxu1 %v13244_v11  ;;  %v12564_v59 = vld [vmem:[%s16157_s5 + $0x8] sm:$0xff]  }
 0x35d   :  { %v12565_v60 = vld [vmem:[%s16157_s5 + $0x88] sm:$0xff]  }
 0x35e   :  { %939 = vmatpush1.bf16.msra.mxu0 %v9815_v3  ;;  %980 = vmatpush1.bf16.msra.mxu1 %v9817_v4  ;;  %v12571_v3 = vld [vmem:[%s16157_s5 + $0xd8] sm:$0xff]  }
 0x35f   :  { %940 = vmatprep.subr.bf16.mxu0 %v9832_v5  ;;  %981 = vmatprep.subr.bf16.mxu1 %v9834_v6  ;;  %v12572_v4 = vld [vmem:[%s16157_s5 + $0x18] sm:$0xff]   ;;  %v12574_v6 = vld [vmem:[%s16157_s5 + $0x60] sm:$0xff]  }
 0x360   :  { %v12573_v5 = vld [vmem:[%s16157_s5 + $0x98] sm:$0xff]  }
 0x362   :  { %941 = vmatpush1.bf16.msra.mxu0 %v9831_v12  ;;  %982 = vmatpush1.bf16.msra.mxu1 %v9833_v13  ;;  %v12579_v12 = vld [vmem:[%s16157_s5 + $0xe8] sm:$0xff]  }
 0x363   :  { %942 = vmatprep.subr.bf16.mxu0 %v9848_v14  ;;  %983 = vmatprep.subr.bf16.mxu1 %v9850_v15  ;;  %v12580_v13 = vld [vmem:[%s16157_s5 + $0x28] sm:$0xff]   ;;  %v12582_v15 = vld [vmem:[%s16157_s5 + $0x70] sm:$0xff]  }
 0x364   :  { %v12581_v14 = vld [vmem:[%s16157_s5 + $0xa8] sm:$0xff]  }
 0x366   :  { %943 = vmatpush1.bf16.msra.mxu0 %v9847_v21  ;;  %984 = vmatpush1.bf16.msra.mxu1 %v9849_v22  ;;  %v12587_v21 = vld [vmem:[%s16157_s5 + $0xf8] sm:$0xff]  }
 0x367   :  { %1018 = vmatprep.subr.bf16.mxu0 %v9804_v23  ;;  %1059 = vmatprep.subr.bf16.mxu1 %v9806_v24  ;;  %v12588_v22 = vld [vmem:[%s16157_s5 + $0x38] sm:$0xff]   ;;  %v12590_v24 = vld [vmem:[%s16157_s5 + $0x140] sm:$0xff]  }
 0x368   :  { %v12589_v23 = vld [vmem:[%s16157_s5 + $0xb8] sm:$0xff]  }
 0x369   :  { %9859 = vmatmul.mubr.msk.bf16.vlgmr.msra.gmra.mrb[12].mxu0 %vm198_vm2, %v13489_v26  ;;  %9860 = vmatmul.mubr.msk.bf16.vlgmr.msra.gmra.mrb[12].mxu1 %vm198_vm2, %v13489_v26 }
 0x36a   :  { %1019 = vmatpush1.bf16.msra.mxu0 %v9803_v31  ;;  %1060 = vmatpush1.bf16.msra.mxu1 %v9805_v32  ;;  %v13741_v31 = vsub.s32 2, %v13735_v29  ;;  %v13743_v32 = vld [vmem:[#allocation7] ss:$4 sm:$0xff] }
 0x36b   :  { %1020 = vmatprep.subr.bf16.mxu0 %v9820_v33  ;;  %1061 = vmatprep.subr.bf16.mxu1 %v9822_v34  ;;  %v13746_v33 = vsub.s32 1, %v13735_v29  ;;  %v13749_v34 = vsub.s32 3, %v13735_v29  ;;  %v372_v35 = vrot.slane %v13743_v32, %v13738_v30 }
 0x36c   :  { %1050 = vmatprep.mubr.bf16.mxu0 %v13244_v11  ;;  %1091 = vmatprep.mubr.bf16.mxu1 %v13244_v11  ;;  %v380_v36 = vrot.slane %v13743_v32, %v13741_v31 }
 0x36d   :  { %v376_v37 = vrot.slane %v13743_v32, %v13746_v33  ;;  %v384_v38 = vrot.slane %v13743_v32, %v13749_v34 }
 0x36e   :  { %1021 = vmatpush1.bf16.msra.mxu0 %v9819_v39  ;;  %1062 = vmatpush1.bf16.msra.mxu1 %v9821_v40 }
 0x36f   :  { %1022 = vmatprep.subr.bf16.mxu0 %v9836_v41  ;;  %1063 = vmatprep.subr.bf16.mxu1 %v9838_v42 }
 0x372   :  { %1023 = vmatpush1.bf16.msra.mxu0 %v9835_v47  ;;  %1064 = vmatpush1.bf16.msra.mxu1 %v9837_v48 }
 0x373   :  { %1024 = vmatprep.subr.bf16.mxu0 %v9852_v49  ;;  %1065 = vmatprep.subr.bf16.mxu1 %v9854_v50 }
 0x376   :  { %1025 = vmatpush1.bf16.msra.mxu0 %v9851_v51  ;;  %1066 = vmatpush1.bf16.msra.mxu1 %v9853_v52 }
 0x377   :  { %11600 = vmatprep.subr.bf16.mxu0 %v12558_v53  ;;  %11622 = vmatprep.subr.bf16.mxu1 %v12559_v54 }
 0x379   :  { %9861 = vmatmul.mubr.msk.bf16.vlgmr.msra.gmra.mrb[16].mxu0 %vm198_vm2, %v13489_v26  ;;  %9862 = vmatmul.mubr.msk.bf16.vlgmr.msra.gmra.mrb[16].mxu1 %vm198_vm2, %v13489_v26  ;;  %v12567_v26 = vld [vmem:[%s16157_s5 + $0xd0] sm:$0xff]  }
 0x37a   :  { %11601 = vmatpush3.bf16.msra.mxu0 %v12560_v55  ;;  %11623 = vmatpush3.bf16.msra.mxu1 %v12561_v56 }
 0x37b   :  { %11602 = vmatprep.subr.bf16.mxu0 %v12562_v57  ;;  %11624 = vmatprep.subr.bf16.mxu1 %v12563_v58  ;;  %v12592_v57 = vld [vmem:[%s16157_s5 + $0x100] sm:$0xff]  }
 0x37c   :  { %v12593_v58 = vld [vmem:[%s16157_s5 + $0x180] sm:$0xff]  }
 0x37e   :  { %11603 = vmatpush3.bf16.msra.mxu0 %v12564_v59  ;;  %11625 = vmatpush3.bf16.msra.mxu1 %v12565_v60 }
 0x37f   :  { %11604 = vmatprep.subr.bf16.mxu0 %v12566_v61  ;;  %11626 = vmatprep.subr.bf16.mxu1 %v12567_v26  ;;  %v12594_v61 = vld [vmem:[%s16157_s5 + $0x148] sm:$0xff]  }
 0x380   :  { %v12595_v26 = vld [vmem:[%s16157_s5 + $0x1c8] sm:$0xff]  }
 0x382   :  { %11605 = vmatpush3.bf16.msra.mxu0 %v12568_v62  ;;  %11627 = vmatpush3.bf16.msra.mxu1 %v12569_v63  ;;  %v12596_v62 = vld [vmem:[%s16157_s5 + $0x108] sm:$0xff]  }
 0x383   :  { %11606 = vmatprep.subr.bf16.mxu0 %v12570_v2  ;;  %11628 = vmatprep.subr.bf16.mxu1 %v12571_v3  ;;  %v12597_v63 = vld [vmem:[%s16157_s5 + $0x188] sm:$0xff]   ;;  %v13778_v2 = vsub.s32 5, %v13735_v29  ;;  %v13781_v3 = vsub.s32 7, %v13735_v29 }
 0x386   :  { %11607 = vmatpush3.bf16.msra.mxu0 %v12572_v4  ;;  %11629 = vmatpush3.bf16.msra.mxu1 %v12573_v5  ;;  %v12598_v4 = vld [vmem:[%s16157_s5 + $0x150] sm:$0xff]  }
 0x387   :  { %11608 = vmatprep.subr.bf16.mxu0 %v12574_v6  ;;  %11630 = vmatprep.subr.bf16.mxu1 %v12575_v7  ;;  %v12599_v5 = vld [vmem:[%s16157_s5 + $0x1d0] sm:$0xff]   ;;  %v392_v6 = vrot.slane %v13743_v32, %v13778_v2  ;;  %v400_v7 = vrot.slane %v13743_v32, %v13781_v3 }
 0x38a   :  { %11609 = vmatpush3.bf16.msra.mxu0 %v12576_v8  ;;  %11631 = vmatpush3.bf16.msra.mxu1 %v12577_v9  ;;  %v12600_v8 = vld [vmem:[%s16157_s5 + $0x110] sm:$0xff]  }
 0x38b   :  { %11610 = vmatprep.subr.bf16.mxu0 %v12578_v10  ;;  %11632 = vmatprep.subr.bf16.mxu1 %v12579_v12  ;;  %v12601_v9 = vld [vmem:[%s16157_s5 + $0x190] sm:$0xff]   ;;  %v12602_v10 = vld [vmem:[%s16157_s5 + $0x158] sm:$0xff]  }
 0x38c   :  { %v12603_v12 = vld [vmem:[%s16157_s5 + $0x1d8] sm:$0xff]  }
 0x38e   :  { %11611 = vmatpush3.bf16.msra.mxu0 %v12580_v13  ;;  %11633 = vmatpush3.bf16.msra.mxu1 %v12581_v14 }
 0x38f   :  { %11612 = vmatprep.subr.bf16.mxu0 %v12582_v15  ;;  %11634 = vmatprep.subr.bf16.mxu1 %v12583_v16 }
 0x392   :  { %11613 = vmatpush3.bf16.msra.mxu0 %v12584_v17  ;;  %11635 = vmatpush3.bf16.msra.mxu1 %v12585_v18 }
 0x393   :  { %11614 = vmatprep.subr.bf16.mxu0 %v12586_v19  ;;  %11636 = vmatprep.subr.bf16.mxu1 %v12587_v21 }
 0x396   :  { %11615 = vmatpush3.bf16.msra.mxu0 %v12588_v22  ;;  %11637 = vmatpush3.bf16.msra.mxu1 %v12589_v23  ;;  %v12604_v22 = vld [vmem:[%s16157_s5 + $0x118] sm:$0xff]  }
 0x397   :  { %11644 = vmatprep.subr.bf16.mxu0 %v12590_v24  ;;  %11666 = vmatprep.subr.bf16.mxu1 %v12591_v27  ;;  %v12605_v23 = vld [vmem:[%s16157_s5 + $0x198] sm:$0xff]  }
 0x41c   :  { %v806_v39 = vpop.f32.mrb[4].mxu0  ;;  %v847_v40 = vpop.f32.mrb[4].mxu1 }
 0x41d   :  { %v807_v41 = vadd.f32 %v806_v39, %v372_v35  ;;  %v848_v42 = vadd.f32 %v847_v40, %v380_v36  ;;  %v808_v43 = vpop.f32.mrb[5].mxu0  ;;  %v849_v44 = vpop.f32.mrb[5].mxu1  ;;  %v12607_v35 = vld [vmem:[%s16157_s5 + $0x1e0] sm:$0xff]  }
 0x41e   :  { %v809_v45 = vadd.f32 %v808_v43, %v376_v37  ;;  %v850_v46 = vadd.f32 %v849_v44, %v384_v38  ;;  %v810_v47 = vpop.f32.mrb[6].mxu0  ;;  %v851_v48 = vpop.f32.mrb[6].mxu1  ;;  %v12608_v40 = vld [vmem:[%s16157_s5 + $0x120] sm:$0xff]   ;;  %v13827_v43 = vsub.s32 6, %v13735_v29  ;;  %v12610_v44 = vld [vmem:[%s16157_s5 + $0x168] sm:$0xff]  }
 0x41f   :  { %v1100_v49 = vmax.f32 %v807_v41, 0.0  ;;  %v1102_v50 = vmax.f32 %v848_v42, 0.0  ;;  %v811_v51 = vpop.f32.mrb[7].mxu0  ;;  %v852_v52 = vpop.f32.mrb[7].mxu1  ;;  %v12609_v41 = vld [vmem:[%s16157_s5 + $0x1a0] sm:$0xff]   ;;  %v13824_v42 = vsub.s32 4, %v13735_v29 }
 0x420   :  { %v1101_v53 = vmax.f32 %v809_v45, 0.0  ;;  %v1103_v54 = vmax.f32 %v850_v46, 0.0  ;;  %v12611_v45 = vld [vmem:[%s16157_s5 + $0x1e8] sm:$0xff]   ;;  %v396_v48 = vrot.slane %v13743_v32, %v13827_v43  ;;  %v12615_v51 = vld [vmem:[%s16157_s5 + $0x1f0] sm:$0xff]  }
 0x421   :  { %v1116_v59 = vpack.c.bf16 %v1100_v49, %v1100_v49  ;;  %v1118_v60 = vpack.c.bf16 %v1102_v50, %v1102_v50  ;;  %v12612_v46 = vld [vmem:[%s16157_s5 + $0x128] sm:$0xff]   ;;  %v388_v47 = vrot.slane %v13743_v32, %v13824_v42  ;;  %v12614_v50 = vld [vmem:[%s16157_s5 + $0x170] sm:$0xff]  }
 0x422   :  { %v1117_v55 = vpack.c.bf16 %v1101_v53, %v1101_v53  ;;  %v1119_v56 = vpack.c.bf16 %v1103_v54, %v1103_v54  ;;  %v12613_v29 = vld [vmem:[%s16157_s5 + $0x1a8] sm:$0xff]   ;;  %v12616_v53 = vld [vmem:[%s16157_s5 + $0x130] sm:$0xff]  }
 0x423   :  { %v13845_v49 = vld [vmem:[#allocation7 + $0x20] ss:$4 sm:$0xff] }
 0x424   :  { %2193 = vmatprep.mubr.bf16.mxu0 %v1117_v55  ;;  %2233 = vmatprep.mubr.bf16.mxu1 %v1119_v56  ;;  %v408_v52 = vrot.slane %v13845_v49, %v13746_v33  ;;  %v416_v32 = vrot.slane %v13845_v49, %v13749_v34  ;;  %v12617_v54 = vld [vmem:[%s16157_s5 + $0x1b0] sm:$0xff]  }
 0x425   :  { %2194 = vmatmul.mubr.bf16.vlgmr.msra.gmra.mrb[20].mxu0 %v1116_v59  ;;  %2234 = vmatmul.mubr.bf16.vlgmr.msra.gmra.mrb[20].mxu1 %v1118_v60 }
 0x426   :  { %11645 = vmatpush3.bf16.msra.mxu0 %v12592_v57  ;;  %11667 = vmatpush3.bf16.msra.mxu1 %v12593_v58  ;;  %v12618_v57 = vld [vmem:[%s16157_s5 + $0x178] sm:$0xff]  }
 0x427   :  { %11646 = vmatprep.subr.bf16.mxu0 %v12594_v61  ;;  %11668 = vmatprep.subr.bf16.mxu1 %v12595_v26  ;;  %v12619_v58 = vld [vmem:[%s16157_s5 + $0x1f8] sm:$0xff]  }
 0x42a   :  { %11647 = vmatpush3.bf16.msra.mxu0 %v12596_v62  ;;  %11669 = vmatpush3.bf16.msra.mxu1 %v12597_v63 }
 0x42b   :  { %11648 = vmatprep.subr.bf16.mxu0 %v12598_v4  ;;  %11670 = vmatprep.subr.bf16.mxu1 %v12599_v5 }
 0x42c   :  { %v888_v13 = vpop.f32.mrb[8].mxu0  ;;  %v929_v14 = vpop.f32.mrb[8].mxu1 }
 0x42d   :  { %v890_v15 = vpop.f32.mrb[9].mxu0  ;;  %v931_v16 = vpop.f32.mrb[9].mxu1  ;;  %v889_v55 = vadd.f32 %v888_v13, %v388_v47  ;;  %v930_v56 = vadd.f32 %v929_v14, %v396_v48  ;;  %v12622_v13 = vld [vmem:[%s16157_s5 + $0x240] sm:$0xff]  }
 0x42e   :  { %v891_v17 = vadd.f32 %v890_v15, %v392_v6  ;;  %v932_v18 = vadd.f32 %v931_v16, %v400_v7  ;;  %v892_v19 = vpop.f32.mrb[10].mxu0  ;;  %v933_v21 = vpop.f32.mrb[10].mxu1  ;;  %11649 = vmatpush3.bf16.msra.mxu0 %v12600_v8  ;;  %11671 = vmatpush3.bf16.msra.mxu1 %v12601_v9  ;;  %v12620_v6 = vld [vmem:[%s16157_s5 + $0x138] sm:$0xff]   ;;  %v12623_v14 = vld [vmem:[%s16157_s5 + $0x2c0] sm:$0xff]  }
 0x42f   :  { %v893_v24 = vpop.f32.mrb[11].mxu0  ;;  %v934_v27 = vpop.f32.mrb[11].mxu1  ;;  %11650 = vmatprep.subr.bf16.mxu0 %v12602_v10  ;;  %11672 = vmatprep.subr.bf16.mxu1 %v12603_v12  ;;  %v12621_v7 = vld [vmem:[%s16157_s5 + $0x1b8] sm:$0xff]   ;;  %v1104_v8 = vmax.f32 %v889_v55, 0.0  ;;  %v1106_v9 = vmax.f32 %v930_v56, 0.0  ;;  %v12625_v21 = vld [vmem:[%s16157_s5 + $0x280] sm:$0xff]  }
 0x430   :  { %v1105_v36 = vmax.f32 %v891_v17, 0.0  ;;  %v1107_v37 = vmax.f32 %v932_v18, 0.0  ;;  %v12624_v17 = vld [vmem:[%s16157_s5 + $0x200] sm:$0xff]   ;;  %v12627_v24 = vld [vmem:[%s16157_s5 + $0x2c8] sm:$0xff]  }
 0x431   :  { %v1120_v18 = vpack.c.bf16 %v1104_v8, %v1104_v8  ;;  %v1122_v19 = vpack.c.bf16 %v1106_v9, %v1106_v9  ;;  %v12638_v55 = vld [vmem:[%s16157_s5 + $0x260] sm:$0xff]   ;;  %v424_v8 = vrot.slane %v13845_v49, %v13778_v2  ;;  %v432_v9 = vrot.slane %v13845_v49, %v13781_v3 }
 0x432   :  { %v1121_v38 = vpack.c.bf16 %v1105_v36, %v1105_v36  ;;  %v1123_v39 = vpack.c.bf16 %v1107_v37, %v1107_v37  ;;  %11651 = vmatpush3.bf16.msra.mxu0 %v12604_v22  ;;  %11673 = vmatpush3.bf16.msra.mxu1 %v12605_v23  ;;  %v12626_v23 = vld [vmem:[%s16157_s5 + $0x248] sm:$0xff]   ;;  %v12630_v36 = vld [vmem:[%s16157_s5 + $0x250] sm:$0xff]   ;;  %v12639_v56 = vld [vmem:[%s16157_s5 + $0x2e0] sm:$0xff]  }
 0x433   :  { %11652 = vmatprep.subr.bf16.mxu0 %v12606_v28  ;;  %11674 = vmatprep.subr.bf16.mxu1 %v12607_v35  ;;  %v12628_v28 = vld [vmem:[%s16157_s5 + $0x208] sm:$0xff]   ;;  %v12631_v37 = vld [vmem:[%s16157_s5 + $0x2d0] sm:$0xff]  }
 0x434   :  { %2273 = vmatprep.mubr.bf16.mxu0 %v1121_v38  ;;  %2313 = vmatprep.mubr.bf16.mxu1 %v1123_v39  ;;  %v12629_v35 = vld [vmem:[%s16157_s5 + $0x288] sm:$0xff]   ;;  %v428_v38 = vrot.slane %v13845_v49, %v13827_v43  ;;  %v12632_v39 = vld [vmem:[%s16157_s5 + $0x210] sm:$0xff]  }
 0x436   :  { %11653 = vmatpush3.bf16.msra.mxu0 %v12608_v40  ;;  %11675 = vmatpush3.bf16.msra.mxu1 %v12609_v41  ;;  %v12633_v40 = vld [vmem:[%s16157_s5 + $0x290] sm:$0xff]   ;;  %v12634_v41 = vld [vmem:[%s16157_s5 + $0x258] sm:$0xff]  }
 0x437   :  { %11654 = vmatprep.subr.bf16.mxu0 %v12610_v44  ;;  %11676 = vmatprep.subr.bf16.mxu1 %v12611_v45 }
 0x43a   :  { %11655 = vmatpush3.bf16.msra.mxu0 %v12612_v46  ;;  %11677 = vmatpush3.bf16.msra.mxu1 %v12613_v29  ;;  %v12635_v46 = vld [vmem:[%s16157_s5 + $0x2d8] sm:$0xff]  }
 0x43b   :  { %11656 = vmatprep.subr.bf16.mxu0 %v12614_v50  ;;  %11678 = vmatprep.subr.bf16.mxu1 %v12615_v51 }
 0x43c   :  { %v13869_v59 = vpop.f32.mrb[12].mxu0  ;;  %v13871_v60 = vpop.f32.mrb[12].mxu1 }
 0x43d   :  { %v972_v61 = vpop.f32.mrb[13].mxu0  ;;  %v1013_v26 = vpop.f32.mrb[13].mxu1 }
 0x43e   :  { %v973_v62 = vadd.f32 %v972_v61, %v408_v52  ;;  %v1014_v63 = vadd.f32 %v1013_v26, %v416_v32  ;;  %v974_v4 = vpop.f32.mrb[14].mxu0  ;;  %v1015_v5 = vpop.f32.mrb[14].mxu1  ;;  %11657 = vmatpush3.bf16.msra.mxu0 %v12616_v53  ;;  %11679 = vmatpush3.bf16.msra.mxu1 %v12617_v54  ;;  %v12636_v52 = vld [vmem:[%s16157_s5 + $0x218] sm:$0xff]   ;;  %v12642_v61 = vld [vmem:[%s16157_s5 + $0x268] sm:$0xff]  }
 0x43f   :  { %v975_v10 = vpop.f32.mrb[15].mxu0  ;;  %v1016_v12 = vpop.f32.mrb[15].mxu1  ;;  %11658 = vmatprep.subr.bf16.mxu0 %v12618_v57  ;;  %11680 = vmatprep.subr.bf16.mxu1 %v12619_v58  ;;  %v12637_v54 = vld [vmem:[%s16157_s5 + $0x298] sm:$0xff]   ;;  %v12640_v57 = vld [vmem:[%s16157_s5 + $0x220] sm:$0xff]   ;;  %v12643_v26 = vld [vmem:[%s16157_s5 + $0x2e8] sm:$0xff]  }
 0x440   :  { %v1109_v15 = vmax.f32 %v973_v62, 0.0  ;;  %v1111_v16 = vmax.f32 %v1014_v63, 0.0  ;;  %v12641_v58 = vld [vmem:[%s16157_s5 + $0x2a0] sm:$0xff]   ;;  %v12644_v62 = vld [vmem:[%s16157_s5 + $0x228] sm:$0xff]   ;;  %v404_v63 = vrot.slane %v13845_v49, %v13738_v30  ;;  %v12646_v5 = vld [vmem:[%s16157_s5 + $0x270] sm:$0xff]  }
 0x441   :  { %v12645_v4 = vld [vmem:[%s16157_s5 + $0x2a8] sm:$0xff]   ;;  %v12648_v10 = vld [vmem:[%s16157_s5 + $0x230] sm:$0xff]  }
 0x442   :  { %11659 = vmatpush3.bf16.msra.mxu0 %v12620_v6  ;;  %11681 = vmatpush3.bf16.msra.mxu1 %v12621_v7  ;;  %v1125_v22 = vpack.c.bf16 %v1109_v15, %v1109_v15  ;;  %v1127_v27 = vpack.c.bf16 %v1111_v16, %v1111_v16  ;;  %v412_v6 = vrot.slane %v13845_v49, %v13741_v31  ;;  %v12647_v7 = vld [vmem:[%s16157_s5 + $0x2f0] sm:$0xff]   ;;  %v12651_v16 = vld [vmem:[%s16157_s5 + $0x2f8] sm:$0xff]  }
 0x443   :  { %11688 = vmatprep.subr.bf16.mxu0 %v12622_v13  ;;  %11710 = vmatprep.subr.bf16.mxu1 %v12623_v14  ;;  %v971_v12 = vadd.f32 %v13869_v59, %v404_v63  ;;  %v12649_v13 = vld [vmem:[%s16157_s5 + $0x2b0] sm:$0xff]   ;;  %v12650_v14 = vld [vmem:[%s16157_s5 + $0x278] sm:$0xff]   ;;  %v420_v63 = vrot.slane %v13845_v49, %v13824_v42 }
 0x444   :  { %v1012_v15 = vadd.f32 %v13871_v60, %v412_v6  ;;  %v12652_v59 = vld [vmem:[%s16157_s5 + $0x238] sm:$0xff]   ;;  %v12654_v60 = vld [vmem:[%s16157_s5 + $0x340] sm:$0xff]   ;;  %v12679_v6 = vld [vmem:[%s16157_s5 + $0x3f0] sm:$0xff]  }
 0x445   :  { %2274 = vmatmul.mubr.bf16.vlgmr.msra.gmra.mrb[24].mxu0 %v1120_v18  ;;  %2314 = vmatmul.mubr.bf16.vlgmr.msra.gmra.mrb[24].mxu1 %v1122_v19  ;;  %v1108_v19 = vmax.f32 %v971_v12, 0.0  ;;  %v12680_v49 = vld [vmem:[%s16157_s5 + $0x330] sm:$0xff]  }
 0x446   :  { %11689 = vmatpush3.bf16.msra.mxu0 %v12624_v17  ;;  %2353 = vmatprep.mubr.bf16.mxu0 %v1125_v22  ;;  %v1110_v22 = vmax.f32 %v1012_v15, 0.0 }
 0x447   :  { %11711 = vmatpush3.bf16.msra.mxu1 %v12625_v21  ;;  %2393 = vmatprep.mubr.bf16.mxu1 %v1127_v27  ;;  %v12653_v21 = vld [vmem:[%s16157_s5 + $0x2b8] sm:$0xff]  }
 0x448   :  { %11690 = vmatprep.subr.bf16.mxu0 %v12626_v23  ;;  %11712 = vmatprep.subr.bf16.mxu1 %v12627_v24  ;;  %v12655_v23 = vld [vmem:[%s16157_s5 + $0x3c0] sm:$0xff]  }
 0x44a   :  { %11691 = vmatpush3.bf16.msra.mxu0 %v12628_v28  ;;  %v12656_v28 = vld [vmem:[%s16157_s5 + $0x300] sm:$0xff]  }
 0x44b   :  { %11713 = vmatpush3.bf16.msra.mxu1 %v12629_v35  ;;  %11692 = vmatprep.subr.bf16.mxu0 %v12630_v36  ;;  %v1124_v35 = vpack.c.bf16 %v1108_v19, %v1108_v19  ;;  %v12657_v36 = vld [vmem:[%s16157_s5 + $0x380] sm:$0xff]  }
 0x44c   :  { %v13920_v44 = vpop.f32.mrb[16].mxu0  ;;  %v1093_v45 = vpop.f32.mrb[16].mxu1  ;;  %11714 = vmatprep.subr.bf16.mxu1 %v12631_v37  ;;  %v1126_v37 = vpack.c.bf16 %v1110_v22, %v1110_v22 }
 0x44d   :  { %v13925_v29 = vadd.f32 %v1093_v45, %v428_v38  ;;  %v1054_v47 = vpop.f32.mrb[17].mxu0  ;;  %v1095_v48 = vpop.f32.mrb[17].mxu1  ;;  %v12658_v38 = vld [vmem:[%s16157_s5 + $0x348] sm:$0xff]  }
 0x44e   :  { %v1056_v50 = vpop.f32.mrb[18].mxu0  ;;  %v1097_v51 = vpop.f32.mrb[18].mxu1  ;;  %11693 = vmatpush3.bf16.msra.mxu0 %v12632_v39  ;;  %v1055_v17 = vadd.f32 %v1054_v47, %v424_v8  ;;  %v1096_v18 = vadd.f32 %v1095_v48, %v432_v9  ;;  %v12660_v45 = vld [vmem:[%s16157_s5 + $0x308] sm:$0xff]   ;;  %v12662_v47 = vld [vmem:[%s16157_s5 + $0x350] sm:$0xff]   ;;  %v12682_v9 = vld [vmem:[%s16157_s5 + $0x378] sm:$0xff]  }
 0x44f   :  { %11715 = vmatpush3.bf16.msra.mxu1 %v12633_v40  ;;  %v1057_v32 = vpop.f32.mrb[19].mxu0  ;;  %v1098_v53 = vpop.f32.mrb[19].mxu1  ;;  %11694 = vmatprep.subr.bf16.mxu0 %v12634_v41  ;;  %v12659_v40 = vld [vmem:[%s16157_s5 + $0x3c8] sm:$0xff]   ;;  %v12663_v48 = vld [vmem:[%s16157_s5 + $0x3d0] sm:$0xff]  }
 0x450   :  { %11716 = vmatprep.subr.bf16.mxu1 %v12635_v46  ;;  %v1113_v24 = vmax.f32 %v1055_v17, 0.0  ;;  %v1115_v27 = vmax.f32 %v1096_v18, 0.0  ;;  %v12661_v46 = vld [vmem:[%s16157_s5 + $0x388] sm:$0xff]   ;;  %v12664_v50 = vld [vmem:[%s16157_s5 + $0x310] sm:$0xff]   ;;  %v12667_v32 = vld [vmem:[%s16157_s5 + $0x3d8] sm:$0xff]  }
 0x451   :  { %v12665_v51 = vld [vmem:[%s16157_s5 + $0x390] sm:$0xff]   ;;  %v12668_v53 = vld [vmem:[%s16157_s5 + $0x318] sm:$0xff]  }
 0x452   :  { %11695 = vmatpush3.bf16.msra.mxu0 %v12636_v52  ;;  %v1129_v39 = vpack.c.bf16 %v1113_v24, %v1113_v24  ;;  %v1131_v41 = vpack.c.bf16 %v1115_v27, %v1115_v27  ;;  %v12666_v52 = vld [vmem:[%s16157_s5 + $0x358] sm:$0xff]   ;;  %v12681_v8 = vld [vmem:[%s16157_s5 + $0x3b0] sm:$0xff]  }
 0x453   :  { %11717 = vmatpush3.bf16.msra.mxu1 %v12637_v54  ;;  %11696 = vmatprep.subr.bf16.mxu0 %v12638_v55  ;;  %v12669_v54 = vld [vmem:[%s16157_s5 + $0x398] sm:$0xff]   ;;  %v12670_v55 = vld [vmem:[%s16157_s5 + $0x360] sm:$0xff]  }
 0x454   :  { %11718 = vmatprep.subr.bf16.mxu1 %v12639_v56  ;;  %v12671_v56 = vld [vmem:[%s16157_s5 + $0x3e0] sm:$0xff]  }
 0x456   :  { %11697 = vmatpush3.bf16.msra.mxu0 %v12640_v57  ;;  %v12672_v57 = vld [vmem:[%s16157_s5 + $0x320] sm:$0xff]  }
 0x457   :  { %11719 = vmatpush3.bf16.msra.mxu1 %v12641_v58  ;;  %11698 = vmatprep.subr.bf16.mxu0 %v12642_v61  ;;  %v12673_v58 = vld [vmem:[%s16157_s5 + $0x3a0] sm:$0xff]   ;;  %v12674_v61 = vld [vmem:[%s16157_s5 + $0x368] sm:$0xff]  }
 0x458   :  { %11720 = vmatprep.subr.bf16.mxu1 %v12643_v26  ;;  %v12675_v26 = vld [vmem:[%s16157_s5 + $0x3e8] sm:$0xff]  }
 0x45a   :  { %11699 = vmatpush3.bf16.msra.mxu0 %v12644_v62  ;;  %v12676_v62 = vld [vmem:[%s16157_s5 + $0x328] sm:$0xff]  }
 0x45b   :  { %11721 = vmatpush3.bf16.msra.mxu1 %v12645_v4  ;;  %11700 = vmatprep.subr.bf16.mxu0 %v12646_v5  ;;  %v12677_v4 = vld [vmem:[%s16157_s5 + $0x3a8] sm:$0xff]   ;;  %v12678_v5 = vld [vmem:[%s16157_s5 + $0x370] sm:$0xff]  }
 0x45c   :  { %11722 = vmatprep.subr.bf16.mxu1 %v12647_v7  ;;  %v1053_v7 = vadd.f32 %v13920_v44, %v420_v63  ;;  %v12684_v44 = vld [vmem:[%s16157_s5 + $0x338] sm:$0xff]  }
 0x45e   :  { %11701 = vmatpush3.bf16.msra.mxu0 %v12648_v10  ;;  %v12683_v10 = vld [vmem:[%s16157_s5 + $0x3f8] sm:$0xff]   ;;  %v1112_v12 = vmax.f32 %v1053_v7, 0.0 }
 0x45f   :  { %11723 = vmatpush3.bf16.msra.mxu1 %v12649_v13  ;;  %11702 = vmatprep.subr.bf16.mxu0 %v12650_v14  ;;  %v12685_v13 = vld [vmem:[%s16157_s5 + $0x3b8] sm:$0xff]   ;;  %v1114_v14 = vmax.f32 %v13925_v29, 0.0 }
 0x460   :  { %11724 = vmatprep.subr.bf16.mxu1 %v12651_v16  ;;  %v1128_v15 = vpack.c.bf16 %v1112_v12, %v1112_v12 }
 0x461   :  { %v1130_v16 = vpack.c.bf16 %v1114_v14, %v1114_v14 }
 0x462   :  { %11703 = vmatpush3.bf16.msra.mxu0 %v12652_v59  ;;  %v9863_v59 = vld [vmem:[#allocation8 + $0x4] ss:$0 sm:$0xff] }
 0x463   :  { %11725 = vmatpush3.bf16.msra.mxu1 %v12653_v21  ;;  %11732 = vmatprep.subr.bf16.mxu0 %v12654_v60 }
 0x464   :  { %11754 = vmatprep.subr.bf16.mxu1 %v12655_v23 }
 0x465   :  { %2354 = vmatmul.mubr.bf16.vlgmr.msra.gmra.mrb[28].mxu0 %v1124_v35 }
 0x466   :  { %2394 = vmatmul.mubr.bf16.vlgmr.msra.gmra.mrb[28].mxu1 %v1126_v37  ;;  %11733 = vmatpush3.bf16.msra.mxu0 %v12656_v28 }
 0x467   :  { %2433 = vmatprep.mubr.bf16.mxu0 %v1129_v39  ;;  %11755 = vmatpush3.bf16.msra.mxu1 %v12657_v36 }
 0x468   :  { %2473 = vmatprep.mubr.bf16.mxu1 %v1131_v41  ;;  %11734 = vmatprep.subr.bf16.mxu0 %v12658_v38 }
 0x469   :  { %11756 = vmatprep.subr.bf16.mxu1 %v12659_v40 }
 0x46a   :  { %11735 = vmatpush3.bf16.msra.mxu0 %v12660_v45 }
 0x46b   :  { %11757 = vmatpush3.bf16.msra.mxu1 %v12661_v46  ;;  %11736 = vmatprep.subr.bf16.mxu0 %v12662_v47 }
 0x46c   :  { %11758 = vmatprep.subr.bf16.mxu1 %v12663_v48 }
 0x46e   :  { %11737 = vmatpush3.bf16.msra.mxu0 %v12664_v50 }
 0x46f   :  { %11759 = vmatpush3.bf16.msra.mxu1 %v12665_v51  ;;  %11738 = vmatprep.subr.bf16.mxu0 %v12666_v52 }
 0x470   :  { %11760 = vmatprep.subr.bf16.mxu1 %v12667_v32 }
 0x472   :  { %11739 = vmatpush3.bf16.msra.mxu0 %v12668_v53 }
 0x473   :  { %11761 = vmatpush3.bf16.msra.mxu1 %v12669_v54  ;;  %11740 = vmatprep.subr.bf16.mxu0 %v12670_v55 }
 0x474   :  { %11762 = vmatprep.subr.bf16.mxu1 %v12671_v56 }
 0x476   :  { %11741 = vmatpush3.bf16.msra.mxu0 %v12672_v57 }
 0x477   :  { %11763 = vmatpush3.bf16.msra.mxu1 %v12673_v58  ;;  %11742 = vmatprep.subr.bf16.mxu0 %v12674_v61 }
 0x478   :  { %11764 = vmatprep.subr.bf16.mxu1 %v12675_v26 }
 0x47a   :  { %11743 = vmatpush3.bf16.msra.mxu0 %v12676_v62 }
 0x47b   :  { %11765 = vmatpush3.bf16.msra.mxu1 %v12677_v4  ;;  %11744 = vmatprep.subr.bf16.mxu0 %v12678_v5 }
 0x47c   :  { %11766 = vmatprep.subr.bf16.mxu1 %v12679_v6 }
 0x47e   :  { %11745 = vmatpush3.bf16.msra.mxu0 %v12680_v49 }
 0x47f   :  { %11767 = vmatpush3.bf16.msra.mxu1 %v12681_v8  ;;  %11746 = vmatprep.subr.bf16.mxu0 %v12682_v9 }
 0x480   :  { %11768 = vmatprep.subr.bf16.mxu1 %v12683_v10 }
 0x482   :  { %11747 = vmatpush3.bf16.msra.mxu0 %v12684_v44 }
 0x483   :  { %11769 = vmatpush3.bf16.msra.mxu1 %v12685_v13  ;;  %12485 = vmatprep.subr.bf16.mxu0 %v13241_v0 }
 0x485   :  { %2434 = vmatmul.mubr.bf16.vlgmr.msra.gmra.mrb[32].mxu0 %v1128_v15 }
 0x486   :  { %2474 = vmatmul.mubr.bf16.vlgmr.msra.gmra.mrb[32].mxu1 %v1130_v16  ;;  %12391 = vmatprep.mubr.msk.f32.mxu0 %vm13242_vm0, %v13243_v1 }
 0x487   :  { %3127 = vmatprep.mubr.bf16.mxu1 %v13244_v11 }
 0x4f8   :  { %v11616_v17 = vpop.f32.mrb[20].mxu0  ;;  %v11638_v18 = vpop.f32.mrb[20].mxu1 }
 0x4f9   :  { %v11617_v19 = vpop.f32.mrb[21].mxu0  ;;  %v11639_v21 = vpop.f32.mrb[21].mxu1 }
 0x4fa   :  { %v11618_v29 = vadd.f32 %v11617_v19, %v11616_v17  ;;  %v11640_v60 = vadd.f32 %v11639_v21, %v11638_v18  ;;  %v11619_v22 = vpop.f32.mrb[22].mxu0  ;;  %v11641_v23 = vpop.f32.mrb[22].mxu1 }
 0x4fb   :  { %v11620_v24 = vpop.f32.mrb[23].mxu0  ;;  %v11642_v27 = vpop.f32.mrb[23].mxu1  ;;  %v2510_v23 = vld [vmem:[#allocation2 + $0x50] sm:$0xff] }
 0x4fc   :  { %v2196_v28 = vadd.f32 %v11618_v29, %v9863_v59  ;;  %v2508_v29 = vld [vmem:[#allocation2 + $0x40] sm:$0xff]  ;;  %v2511_v24 = vld [vmem:[#allocation2 + $0x58] sm:$0xff] }
 0x4fd   :  { %v12489_v27 = vpack.c.bf16 %v2511_v24, %v2510_v23  ;;  %v10046_v24 = vld [vmem:[%s16156_s4 + $0x380] sm:$0xff] }
 0x4fe   :  { %v2236_v35 = vadd.f32 %v11640_v60, %v2196_v28  ;;  %v2509_v60 = vld [vmem:[#allocation2 + $0x48] sm:$0xff] }
 0x4ff   :  { %v12486_v22 = vpack.c.bf16 %v2509_v60, %v2508_v29  ;;  %v2513_v28 = vld [vmem:[#allocation2 + $0x68] sm:$0xff] }
 0x500   :  { %v10039_v29 = vld [vmem:[%s16156_s4 + $0x348] sm:$0xff] }
 0x501   :  { %12487 = vmatpush3.bf16.msra.mxu0 %v12486_v22 }
 0x502   :  { %12488 = vmatprep.subr.bf16.mxu0 %v13241_v0 }
 0x505   :  { %12490 = vmatpush3.bf16.msra.mxu0 %v12489_v27  ;;  %v10054_v27 = vld [vmem:[%s16156_s4 + $0x3c0] sm:$0xff] }
 0x506   :  { %12491 = vmatprep.subr.bf16.mxu0 %v13241_v0 }
 0x518   :  { %v11660_v36 = vpop.f32.mrb[24].mxu0  ;;  %v11682_v37 = vpop.f32.mrb[24].mxu1 }
 0x519   :  { %v11661_v38 = vpop.f32.mrb[25].mxu0  ;;  %v11683_v39 = vpop.f32.mrb[25].mxu1 }
 0x51a   :  { %v11662_v40 = vadd.f32 %v11661_v38, %v11660_v36  ;;  %v11684_v41 = vadd.f32 %v11683_v39, %v11682_v37  ;;  %v11663_v45 = vpop.f32.mrb[26].mxu0  ;;  %v11685_v46 = vpop.f32.mrb[26].mxu1  ;;  %v2514_v36 = vld [vmem:[#allocation2 + $0x70] sm:$0xff]  ;;  %v2515_v37 = vld [vmem:[#allocation2 + $0x78] sm:$0xff] }
 0x51b   :  { %v11664_v47 = vpop.f32.mrb[27].mxu0  ;;  %v11686_v48 = vpop.f32.mrb[27].mxu1  ;;  %v12495_v38 = vpack.c.bf16 %v2515_v37, %v2514_v36  ;;  %v9992_v46 = vld [vmem:[#allocation8 + $0x5] ss:$0 sm:$0xff]  ;;  %v10110_v36 = vcombine.low %v10046_v24, %v10054_v27 }
 0x51c   :  { %v2276_v50 = vadd.f32 %v11662_v40, %v2236_v35  ;;  %v9993_v48 = vld [vmem:[#allocation8 + $0x6] ss:$0 sm:$0xff] }
 0x51e   :  { %v2316_v51 = vadd.f32 %v11684_v41, %v2276_v50 }
 0x538   :  { %v11704_v52 = vpop.f32.mrb[28].mxu0 }
 0x539   :  { %v11726_v32 = vpop.f32.mrb[28].mxu1  ;;  %v11705_v53 = vpop.f32.mrb[29].mxu0 }
 0x53a   :  { %v11706_v54 = vadd.f32 %v11705_v53, %v11704_v52  ;;  %v11727_v55 = vpop.f32.mrb[29].mxu1  ;;  %v11707_v56 = vpop.f32.mrb[30].mxu0  ;;  %v9994_v52 = vld [vmem:[#allocation8 + $0x7] ss:$0 sm:$0xff] }
 0x53b   :  { %v11728_v57 = vadd.f32 %v11727_v55, %v11726_v32  ;;  %v11729_v58 = vpop.f32.mrb[30].mxu1  ;;  %v11708_v61 = vpop.f32.mrb[31].mxu0 }
 0x53c   :  { %v2356_v26 = vadd.f32 %v11706_v54, %v2316_v51  ;;  %v11730_v62 = vpop.f32.mrb[31].mxu1 }
 0x53e   :  { %v2396_v63 = vadd.f32 %v11728_v57, %v2356_v26 }
 0x558   :  { %v11748_v4 = vpop.f32.mrb[32].mxu0 }
 0x559   :  { %v11770_v5 = vpop.f32.mrb[32].mxu1  ;;  %v11749_v6 = vpop.f32.mrb[33].mxu0 }
 0x55a   :  { %v11750_v49 = vadd.f32 %v11749_v6, %v11748_v4  ;;  %v11771_v7 = vpop.f32.mrb[33].mxu1  ;;  %v11751_v8 = vpop.f32.mrb[34].mxu0  ;;  %v10006_v4 = vld [vmem:[%s16156_s4 + $0x240] sm:$0xff] }
 0x55b   :  { %v11772_v9 = vadd.f32 %v11771_v7, %v11770_v5  ;;  %v11773_v10 = vpop.f32.mrb[34].mxu1  ;;  %v11752_v44 = vpop.f32.mrb[35].mxu0  ;;  %v9999_v5 = vld [vmem:[%s16156_s4 + $0x208] sm:$0xff] }
 0x55c   :  { %v2436_v12 = vadd.f32 %v11750_v49, %v2396_v63  ;;  %v11774_v13 = vpop.f32.mrb[35].mxu1  ;;  %v9998_v63 = vld [vmem:[%s16156_s4 + $0x200] sm:$0xff]  ;;  %v10007_v49 = vld [vmem:[%s16156_s4 + $0x248] sm:$0xff] }
 0x55d   :  { %v10063_v6 = vcombine.high %v9998_v63, %v10006_v4  ;;  %v10062_v7 = vcombine.low %v9998_v63, %v10006_v4  ;;  %v10064_v8 = vcombine.low %v9999_v5, %v10007_v49  ;;  %v10014_v10 = vld [vmem:[%s16156_s4 + $0x280] sm:$0xff]  ;;  %v10025_v63 = vld [vmem:[%s16156_s4 + $0x2d8] sm:$0xff] }
 0x55e   :  { %v2476_v14 = vadd.f32 %v11772_v9, %v2436_v12  ;;  %v10065_v9 = vcombine.high %v9999_v5, %v10007_v49  ;;  %v10022_v44 = vld [vmem:[%s16156_s4 + $0x2c0] sm:$0xff]  ;;  %v10015_v12 = vld [vmem:[%s16156_s4 + $0x288] sm:$0xff]  ;;  %v10032_v49 = vld [vmem:[%s16156_s4 + $0x310] sm:$0xff] }
 0x55f   :  { %3095 = vmatprep.subr.bf16.mxu1 %v10063_v6  ;;  %v10079_v13 = vcombine.high %v10014_v10, %v10022_v44 }
 0x560   :  { %v2481_v15 = vadd.f32 %v2476_v14, %v13485_v25  ;;  %v2512_v25 = vld [vmem:[#allocation2 + $0x60] sm:$0xff]  ;;  %3096 = vmatpush1.bf16.msra.mxu1 %v10062_v7  ;;  %v10023_v14 = vld [vmem:[%s16156_s4 + $0x2c8] sm:$0xff]  ;;  %v10040_v7 = vld [vmem:[%s16156_s4 + $0x350] sm:$0xff] }
 0x561   :  { %v12492_v35 = vpack.c.bf16 %v2513_v28, %v2512_v25  ;;  %3097 = vmatprep.subr.bf16.mxu1 %v10079_v13  ;;  %v10047_v25 = vld [vmem:[%s16156_s4 + $0x388] sm:$0xff]  ;;  %v10111_v28 = vcombine.high %v10046_v24, %v10054_v27 }
 0x562   :  { %v2482_v16 = vsel %vm198_vm2, %v2481_v15, 0.0 }
 0x563   :  { %2483 = vadd.xlane.f32.xlu1 %v2482_v16  ;;  %12493 = vmatpush3.bf16.msra.mxu0 %v12492_v35  ;;  %v10080_v16 = vcombine.low %v10015_v12, %v10023_v14  ;;  %v10055_v35 = vld [vmem:[%s16156_s4 + $0x3c8] sm:$0xff] }
 0x564   :  { %12494 = vmatprep.subr.bf16.mxu0 %v13241_v0  ;;  %v10112_v37 = vcombine.low %v10047_v25, %v10055_v35 }
 0x567   :  { %12496 = vmatpush3.bf16.msra.mxu0 %v12495_v38  ;;  %v10113_v38 = vcombine.high %v10047_v25, %v10055_v35  ;;  %v10018_v35 = vld [vmem:[%s16156_s4 + $0x2a0] sm:$0xff] }
 0x568   :  { %3136 = vmatprep.subr.bf16.mxu0 %v10065_v9  ;;  %v10041_v9 = vld [vmem:[%s16156_s4 + $0x358] sm:$0xff] }
 0x5f0   :  { %v2484_v17 = vpop.xlane.xlu1 %2483 }
 0x5f1   :  { %v2485_v18 = vmul.f32 0.015625, %v2484_v17  ;;  %v10081_v17 = vcombine.high %v10015_v12, %v10023_v14  ;;  %v10099_v12 = vcombine.high %v10032_v49, %v10040_v7  ;;  %v10048_v14 = vld [vmem:[%s16156_s4 + $0x390] sm:$0xff] }
 0x5f3   :  { %v2486_v59 = vsub.f32 %v2481_v15, %v2485_v18  ;;  %v10078_v15 = vcombine.low %v10014_v10, %v10022_v44  ;;  %v10030_v18 = vld [vmem:[%s16156_s4 + $0x300] sm:$0xff] }
 0x5f5   :  { %v2487_v19 = vmul.f32 %v2486_v59, %v2486_v59  ;;  %3098 = vmatpush1.bf16.msra.mxu1 %v10078_v15  ;;  %v10056_v15 = vld [vmem:[%s16156_s4 + $0x3d0] sm:$0xff] }
 0x5f6   :  { %v10114_v24 = vcombine.low %v10048_v14, %v10056_v15 }
 0x5f7   :  { %v2488_v21 = vsel %vm198_vm2, %v2487_v19, 0.0  ;;  %v10031_v19 = vld [vmem:[%s16156_s4 + $0x308] sm:$0xff] }
 0x5f8   :  { %2489 = vadd.xlane.f32.xlu1 %v2488_v21  ;;  %v10096_v22 = vcombine.low %v10031_v19, %v10039_v29  ;;  %v10097_v23 = vcombine.high %v10031_v19, %v10039_v29  ;;  %v10115_v19 = vcombine.high %v10048_v14, %v10056_v15  ;;  %v10002_v29 = vld [vmem:[%s16156_s4 + $0x220] sm:$0xff]  ;;  %v10021_v14 = vld [vmem:[%s16156_s4 + $0x2b8] sm:$0xff] }
 0x5f9   :  { %v10029_v15 = vld [vmem:[%s16156_s4 + $0x2f8] sm:$0xff] }
 0x685   :  { %v2490_v39 = vpop.xlane.xlu1 %2489 }
 0x686   :  { %v2491_v40 = vmul.f32 0.015625, %v2490_v39  ;;  %v10000_v39 = vld [vmem:[%s16156_s4 + $0x210] sm:$0xff] }
 0x688   :  { %v2492_v41 = vadd.f32 1e-05, %v2491_v40  ;;  %v10008_v40 = vld [vmem:[%s16156_s4 + $0x250] sm:$0xff] }
 0x68a   :  { %13072 = vrsqrt.f32 %v2492_v41  ;;  %v10001_v41 = vld [vmem:[%s16156_s4 + $0x218] sm:$0xff] }
 0x694   :  { %v13073_v45 = vpop.eup %13072 }
 0x695   :  { %v2494_v47 = vmul.f32 %v13073_v45, %v2486_v59  ;;  %v10038_v59 = vld [vmem:[%s16156_s4 + $0x340] sm:$0xff]  ;;  %v10066_v45 = vcombine.low %v10000_v39, %v10008_v40 }
 0x696   :  { %v10095_v21 = vcombine.high %v10030_v18, %v10038_v59  ;;  %v10094_v60 = vcombine.low %v10030_v18, %v10038_v59  ;;  %v10098_v18 = vcombine.low %v10032_v49, %v10040_v7  ;;  %v10005_v49 = vld [vmem:[%s16156_s4 + $0x238] sm:$0xff] }
 0x697   :  { %v2500_v50 = vmul.f32 %v9992_v46, %v2494_v47  ;;  %v10067_v46 = vcombine.high %v10000_v39, %v10008_v40  ;;  %v10009_v47 = vld [vmem:[%s16156_s4 + $0x258] sm:$0xff] }
 0x698   :  { %3099 = vmatprep.subr.bf16.mxu1 %v10095_v21  ;;  %v10013_v7 = vld [vmem:[%s16156_s4 + $0x278] sm:$0xff] }
 0x699   :  { %v2506_v51 = vadd.f32 %v9993_v48, %v2500_v50  ;;  %3100 = vmatpush1.bf16.msra.mxu1 %v10094_v60  ;;  %v10068_v48 = vcombine.low %v10001_v41, %v10009_v47  ;;  %v10069_v50 = vcombine.high %v10001_v41, %v10009_v47  ;;  %v10010_v60 = vld [vmem:[%s16156_s4 + $0x260] sm:$0xff] }
 0x69a   :  { %3101 = vmatprep.subr.bf16.mxu1 %v10111_v28  ;;  %v10071_v25 = vcombine.high %v10002_v29, %v10010_v60  ;;  %v10070_v39 = vcombine.low %v10002_v29, %v10010_v60  ;;  %v10042_v47 = vld [vmem:[%s16156_s4 + $0x360] sm:$0xff]  ;;  %v10037_v29 = vld [vmem:[%s16156_s4 + $0x338] sm:$0xff] }
 0x69b   :  { %12392 = vmatmul.mubr.msk.f32.vlgmr.msra.gmra.mrb[2].mxu0 %vm198_vm2, %v2506_v51  ;;  %v10045_v60 = vld [vmem:[%s16156_s4 + $0x378] sm:$0xff] }
 0x69c   :  { %3168 = vmatprep.mubr.bf16.mxu0 %v13244_v11  ;;  %3137 = vmatpush1.bf16.msra.mxu0 %v10064_v8  ;;  %v10033_v8 = vld [vmem:[%s16156_s4 + $0x318] sm:$0xff] }
 0x69d   :  { %3138 = vmatprep.subr.bf16.mxu0 %v10081_v17  ;;  %3102 = vmatpush1.bf16.msra.mxu1 %v10110_v36  ;;  %v10101_v13 = vcombine.high %v10033_v8, %v10041_v9  ;;  %v10057_v17 = vld [vmem:[%s16156_s4 + $0x3d8] sm:$0xff]  ;;  %v10100_v59 = vcombine.low %v10033_v8, %v10041_v9  ;;  %v10026_v36 = vld [vmem:[%s16156_s4 + $0x2e0] sm:$0xff] }
 0x69e   :  { %3177 = vmatprep.subr.bf16.mxu1 %v10067_v46  ;;  %v10087_v41 = vcombine.high %v10018_v35, %v10026_v36  ;;  %v10034_v46 = vld [vmem:[%s16156_s4 + $0x320] sm:$0xff] }
 0x6a0   :  { %3139 = vmatpush1.bf16.msra.mxu0 %v10080_v16  ;;  %v10049_v16 = vld [vmem:[%s16156_s4 + $0x398] sm:$0xff] }
 0x6a1   :  { %3140 = vmatprep.subr.bf16.mxu0 %v10097_v23  ;;  %v10117_v21 = vcombine.high %v10049_v16, %v10057_v17  ;;  %v10011_v23 = vld [vmem:[%s16156_s4 + $0x268] sm:$0xff]  ;;  %v10116_v27 = vcombine.low %v10049_v16, %v10057_v17  ;;  %v10076_v17 = vcombine.low %v10005_v49, %v10013_v7 }
 0x6a4   :  { %3141 = vmatpush1.bf16.msra.mxu0 %v10096_v22  ;;  %v10003_v22 = vld [vmem:[%s16156_s4 + $0x228] sm:$0xff] }
 0x6a5   :  { %3142 = vmatprep.subr.bf16.mxu0 %v10113_v38  ;;  %v10073_v28 = vcombine.high %v10003_v22, %v10011_v23  ;;  %v10027_v38 = vld [vmem:[%s16156_s4 + $0x2e8] sm:$0xff]  ;;  %v10072_v40 = vcombine.low %v10003_v22, %v10011_v23  ;;  %v10092_v23 = vcombine.low %v10021_v14, %v10029_v15 }
 0x6a8   :  { %3143 = vmatpush1.bf16.msra.mxu0 %v10112_v37  ;;  %v10019_v37 = vld [vmem:[%s16156_s4 + $0x2a8] sm:$0xff] }
 0x6a9   :  { %3218 = vmatprep.subr.bf16.mxu0 %v10069_v50  ;;  %v10043_v50 = vld [vmem:[%s16156_s4 + $0x368] sm:$0xff] }
 0x76e   :  { %v2590_v32 = vpop.f32.mrb[2].mxu0 }
 0x76f   :  { %v2591_v53 = vadd.f32 %v9994_v52, %v2590_v32  ;;  %v12393_v54 = vpop.f32.mrb[3].mxu0 }
 0x770   :  { %v9996_v54 = vld [vmem:[#allocation8 + $0x8] ss:$0 sm:$0xff] }
 0x771   :  { %v2594_v55 = vadd.f32 %v2591_v53, %v2506_v51 }
 0x773   :  { %v2595_v56 = vsel %vm198_vm2, %v2594_v55, 0.0 }
 0x774   :  { %2596 = vadd.xlane.f32.xlu0 %v2595_v56  ;;  %v9997_v56 = vld [vmem:[#allocation8 + $0x9] ss:$0 sm:$0xff] }
 0x801   :  { %v2597_v57 = vpop.xlane.xlu0 %2596 }
 0x802   :  { %v2598_v58 = vmul.f32 0.015625, %v2597_v57 }
 0x804   :  { %v14104_v61 = vsub.f32 %v2594_v55, %v2598_v58  ;;  %v10016_v58 = vld [vmem:[%s16156_s4 + $0x290] sm:$0xff] }
 0x806   :  { %v2600_v26 = vmul.f32 %v14104_v61, %v14104_v61 }
 0x808   :  { %v2601_v62 = vsel %vm198_vm2, %v2600_v26, 0.0  ;;  %v10024_v26 = vld [vmem:[%s16156_s4 + $0x2d0] sm:$0xff] }
 0x809   :  { %2602 = vadd.xlane.f32.xlu1 %v2601_v62  ;;  %v10017_v62 = vld [vmem:[%s16156_s4 + $0x298] sm:$0xff]  ;;  %v10083_v5 = vcombine.high %v10016_v58, %v10024_v26  ;;  %v10082_v10 = vcombine.low %v10016_v58, %v10024_v26  ;;  %v10102_v58 = vcombine.low %v10034_v46, %v10042_v47 }
 0x80a   :  { %v10085_v6 = vcombine.high %v10017_v62, %v10025_v63  ;;  %v10084_v44 = vcombine.low %v10017_v62, %v10025_v63 }
 0x896   :  { %v2603_v51 = vpop.xlane.xlu1 %2602 }
 0x897   :  { %v2604_v52 = vmul.f32 0.015625, %v2603_v51  ;;  %v10086_v51 = vcombine.low %v10018_v35, %v10026_v36  ;;  %v10053_v35 = vld [vmem:[%s16156_s4 + $0x3b8] sm:$0xff] }
 0x898   :  { %v10061_v36 = vld [vmem:[%s16156_s4 + $0x3f8] sm:$0xff] }
 0x899   :  { %v2605_v32 = vadd.f32 1e-05, %v2604_v52  ;;  %v10088_v52 = vcombine.low %v10019_v37, %v10027_v38 }
 0x89b   :  { %13074 = vrsqrt.f32 %v2605_v32  ;;  %v10103_v32 = vcombine.high %v10034_v46, %v10042_v47  ;;  %v12686_v46 = vld [vmem:[%s16157_s5 + $0x440] sm:$0xff]  }
 0x89c   :  { %v12687_v47 = vld [vmem:[%s16157_s5 + $0x4c0] sm:$0xff]  }
 0x8a5   :  { %v13075_v53 = vpop.eup %13074 }
 0x8a6   :  { %v2607_v55 = vmul.f32 %v13075_v53, %v14104_v61 }
 0x8a8   :  { %v2613_v57 = vmul.f32 %v9996_v54, %v2607_v55  ;;  %v10050_v54 = vld [vmem:[%s16156_s4 + $0x3a0] sm:$0xff] }
 0x8a9   :  { %v10058_v55 = vld [vmem:[%s16156_s4 + $0x3e0] sm:$0xff] }
 0x8aa   :  { %v14182_v4 = vadd.f32 %v9997_v56, %v2613_v57  ;;  %v10051_v56 = vld [vmem:[%s16156_s4 + $0x3a8] sm:$0xff]  ;;  %v10119_v62 = vcombine.high %v10050_v54, %v10058_v55  ;;  %v10118_v8 = vcombine.low %v10050_v54, %v10058_v55  ;;  %v12694_v54 = vld [vmem:[%s16157_s5 + $0x450] sm:$0xff]  }
 0x8ab   :  { %v10059_v57 = vld [vmem:[%s16156_s4 + $0x3e8] sm:$0xff]  ;;  %v12696_v55 = vld [vmem:[%s16157_s5 + $0x410] sm:$0xff]  }
 0x8ac   :  { %v14186_v61 = vpack.c.bf16 %v14182_v4, %v14182_v4  ;;  %v10121_v63 = vcombine.high %v10051_v56, %v10059_v57  ;;  %v10120_v9 = vcombine.low %v10051_v56, %v10059_v57  ;;  %v12697_v56 = vld [vmem:[%s16157_s5 + $0x490] sm:$0xff]   ;;  %v12698_v57 = vld [vmem:[%s16157_s5 + $0x458] sm:$0xff]  }
 0x8ae   :  { %10126 = vmatmul.mubr.msk.bf16.vlgmr.msra.gmra.mrb[36].mxu1 %vm198_vm2, %v14186_v61  ;;  %10127 = vmatmul.mubr.msk.bf16.vlgmr.msra.gmra.mrb[36].mxu0 %vm198_vm2, %v14186_v61 }
 0x8af   :  { %3178 = vmatpush1.bf16.msra.mxu1 %v10066_v45  ;;  %3219 = vmatpush1.bf16.msra.mxu0 %v10068_v48  ;;  %v10089_v45 = vcombine.high %v10019_v37, %v10027_v38  ;;  %v10035_v48 = vld [vmem:[%s16156_s4 + $0x328] sm:$0xff]  ;;  %v10108_v38 = vcombine.low %v10037_v29, %v10045_v60 }
 0x8b0   :  { %3179 = vmatprep.subr.bf16.mxu1 %v10083_v5  ;;  %3220 = vmatprep.subr.bf16.mxu0 %v10085_v6  ;;  %v10105_v53 = vcombine.high %v10035_v48, %v10043_v50  ;;  %v10104_v26 = vcombine.low %v10035_v48, %v10043_v50  ;;  %v10004_v5 = vld [vmem:[%s16156_s4 + $0x230] sm:$0xff]  ;;  %v12688_v48 = vld [vmem:[%s16157_s5 + $0x400] sm:$0xff]  }
 0x8b1   :  { %3209 = vmatprep.mubr.bf16.mxu1 %v13244_v11  ;;  %3250 = vmatprep.mubr.bf16.mxu0 %v13244_v11  ;;  %v10012_v6 = vld [vmem:[%s16156_s4 + $0x270] sm:$0xff]  ;;  %v12689_v50 = vld [vmem:[%s16157_s5 + $0x480] sm:$0xff]  }
 0x8b2   :  { %v10074_v16 = vcombine.low %v10004_v5, %v10012_v6 }
 0x8b3   :  { %3180 = vmatpush1.bf16.msra.mxu1 %v10082_v10  ;;  %3221 = vmatpush1.bf16.msra.mxu0 %v10084_v44  ;;  %v10075_v10 = vcombine.high %v10004_v5, %v10012_v6  ;;  %v10077_v44 = vcombine.high %v10005_v49, %v10013_v7  ;;  %v12703_v5 = vld [vmem:[%s16157_s5 + $0x4e0] sm:$0xff]   ;;  %v12706_v7 = vld [vmem:[%s16157_s5 + $0x468] sm:$0xff]  }
 0x8b4   :  { %3181 = vmatprep.subr.bf16.mxu1 %v10099_v12  ;;  %3222 = vmatprep.subr.bf16.mxu0 %v10101_v13  ;;  %v10020_v12 = vld [vmem:[%s16156_s4 + $0x2b0] sm:$0xff]  ;;  %v12704_v6 = vld [vmem:[%s16157_s5 + $0x420] sm:$0xff]  }
 0x8b5   :  { %v10028_v13 = vld [vmem:[%s16156_s4 + $0x2f0] sm:$0xff]  ;;  %v12705_v49 = vld [vmem:[%s16157_s5 + $0x4a0] sm:$0xff]  }
 0x8b6   :  { %v10090_v22 = vcombine.low %v10020_v12, %v10028_v13 }
 0x8b7   :  { %3182 = vmatpush1.bf16.msra.mxu1 %v10098_v18  ;;  %3223 = vmatpush1.bf16.msra.mxu0 %v10100_v59  ;;  %v10091_v18 = vcombine.high %v10020_v12, %v10028_v13  ;;  %v10093_v59 = vcombine.high %v10021_v14, %v10029_v15  ;;  %v12711_v12 = vld [vmem:[%s16157_s5 + $0x4f0] sm:$0xff]   ;;  %v12714_v15 = vld [vmem:[%s16157_s5 + $0x478] sm:$0xff]  }
 0x8b8   :  { %3183 = vmatprep.subr.bf16.mxu1 %v10115_v19  ;;  %3224 = vmatprep.subr.bf16.mxu0 %v10117_v21  ;;  %v10036_v19 = vld [vmem:[%s16156_s4 + $0x330] sm:$0xff] }
 0x8b9   :  { %v10044_v21 = vld [vmem:[%s16156_s4 + $0x370] sm:$0xff] }
 0x8ba   :  { %v10106_v37 = vcombine.low %v10036_v19, %v10044_v21  ;;  %v12712_v13 = vld [vmem:[%s16157_s5 + $0x430] sm:$0xff]  }
 0x8bb   :  { %3184 = vmatpush1.bf16.msra.mxu1 %v10114_v24  ;;  %3225 = vmatpush1.bf16.msra.mxu0 %v10116_v27  ;;  %v10107_v24 = vcombine.high %v10036_v19, %v10044_v21  ;;  %v10109_v27 = vcombine.high %v10037_v29, %v10045_v60  ;;  %v12713_v14 = vld [vmem:[%s16157_s5 + $0x4b0] sm:$0xff]   ;;  %v12719_v19 = vld [vmem:[%s16157_s5 + $0x5c0] sm:$0xff]  }
 0x8bc   :  { %3259 = vmatprep.subr.bf16.mxu1 %v10071_v25  ;;  %3300 = vmatprep.subr.bf16.mxu0 %v10073_v28  ;;  %v10052_v25 = vld [vmem:[%s16156_s4 + $0x3b0] sm:$0xff] }
 0x8bd   :  { %v10060_v28 = vld [vmem:[%s16156_s4 + $0x3f0] sm:$0xff] }
 0x8be   :  { %10128 = vmatmul.mubr.msk.bf16.vlgmr.msra.gmra.mrb[40].mxu1 %vm198_vm2, %v14186_v61  ;;  %10129 = vmatmul.mubr.msk.bf16.vlgmr.msra.gmra.mrb[40].mxu0 %vm198_vm2, %v14186_v61  ;;  %v14432_v21 = vld [vmem:[#allocation7 + $0x1] ss:$4 sm:$0xff] }
 0x8bf   :  { %3260 = vmatpush1.bf16.msra.mxu1 %v10070_v39  ;;  %3301 = vmatpush1.bf16.msra.mxu0 %v10072_v40  ;;  %v10123_v39 = vcombine.high %v10052_v25, %v10060_v28  ;;  %v10125_v40 = vcombine.high %v10053_v35, %v10061_v36  ;;  %v2695_v29 = vrot.slane %v14432_v21, %v13738_v30 }
 0x8c0   :  { %3261 = vmatprep.subr.bf16.mxu1 %v10087_v41  ;;  %3302 = vmatprep.subr.bf16.mxu0 %v10089_v45  ;;  %v10122_v41 = vcombine.low %v10052_v25, %v10060_v28  ;;  %v10124_v45 = vcombine.low %v10053_v35, %v10061_v36  ;;  %v2703_v60 = vrot.slane %v14432_v21, %v13741_v31 }
 0x8c1   :  { %3291 = vmatprep.mubr.bf16.mxu1 %v13244_v11  ;;  %3332 = vmatprep.mubr.bf16.mxu0 %v13244_v11 }
 0x8c3   :  { %3262 = vmatpush1.bf16.msra.mxu1 %v10086_v51  ;;  %3303 = vmatpush1.bf16.msra.mxu0 %v10088_v52  ;;  %v12690_v51 = vld [vmem:[%s16157_s5 + $0x448] sm:$0xff]  }
 0x8c4   :  { %3263 = vmatprep.subr.bf16.mxu1 %v10103_v32  ;;  %3304 = vmatprep.subr.bf16.mxu0 %v10105_v53  ;;  %v12691_v52 = vld [vmem:[%s16157_s5 + $0x4c8] sm:$0xff]  }
 0x8c5   :  { %v12692_v32 = vld [vmem:[%s16157_s5 + $0x408] sm:$0xff]  }
 0x8c6   :  { %v12693_v53 = vld [vmem:[%s16157_s5 + $0x488] sm:$0xff]  }
 0x8c7   :  { %3264 = vmatpush1.bf16.msra.mxu1 %v10102_v58  ;;  %3305 = vmatpush1.bf16.msra.mxu0 %v10104_v26  ;;  %v12699_v58 = vld [vmem:[%s16157_s5 + $0x4d8] sm:$0xff]  }
 0x8c8   :  { %3265 = vmatprep.subr.bf16.mxu1 %v10119_v62  ;;  %3306 = vmatprep.subr.bf16.mxu0 %v10121_v63  ;;  %v12700_v26 = vld [vmem:[%s16157_s5 + $0x418] sm:$0xff]   ;;  %v12702_v63 = vld [vmem:[%s16157_s5 + $0x460] sm:$0xff]  }
 0x8c9   :  { %v12701_v62 = vld [vmem:[%s16157_s5 + $0x498] sm:$0xff]  }
 0x8cb   :  { %3266 = vmatpush1.bf16.msra.mxu1 %v10118_v8  ;;  %3307 = vmatpush1.bf16.msra.mxu0 %v10120_v9  ;;  %v12707_v8 = vld [vmem:[%s16157_s5 + $0x4e8] sm:$0xff]  }
 0x8cc   :  { %3341 = vmatprep.subr.bf16.mxu1 %v10075_v10  ;;  %3382 = vmatprep.subr.bf16.mxu0 %v10077_v44  ;;  %v12708_v9 = vld [vmem:[%s16157_s5 + $0x428] sm:$0xff]   ;;  %v12710_v44 = vld [vmem:[%s16157_s5 + $0x470] sm:$0xff]  }
 0x8cd   :  { %v12709_v10 = vld [vmem:[%s16157_s5 + $0x4a8] sm:$0xff]  }
 0x8ce   :  { %10130 = vmatmul.mubr.msk.bf16.vlgmr.msra.gmra.mrb[44].mxu1 %vm198_vm2, %v14186_v61  ;;  %10131 = vmatmul.mubr.msk.bf16.vlgmr.msra.gmra.mrb[44].mxu0 %vm198_vm2, %v14186_v61 }
 0x8cf   :  { %3342 = vmatpush1.bf16.msra.mxu1 %v10074_v16  ;;  %3383 = vmatpush1.bf16.msra.mxu0 %v10076_v17  ;;  %v12715_v16 = vld [vmem:[%s16157_s5 + $0x4f8] sm:$0xff]  }
 0x8d0   :  { %3343 = vmatprep.subr.bf16.mxu1 %v10091_v18  ;;  %3384 = vmatprep.subr.bf16.mxu0 %v10093_v59  ;;  %v12716_v17 = vld [vmem:[%s16157_s5 + $0x438] sm:$0xff]   ;;  %v12718_v59 = vld [vmem:[%s16157_s5 + $0x540] sm:$0xff]  }
 0x8d1   :  { %3373 = vmatprep.mubr.bf16.mxu1 %v13244_v11  ;;  %3414 = vmatprep.mubr.bf16.mxu0 %v13244_v11  ;;  %v12717_v18 = vld [vmem:[%s16157_s5 + $0x4b8] sm:$0xff]  }
 0x8d3   :  { %3344 = vmatpush1.bf16.msra.mxu1 %v10090_v22  ;;  %3385 = vmatpush1.bf16.msra.mxu0 %v10092_v23  ;;  %v2699_v22 = vrot.slane %v14432_v21, %v13746_v33  ;;  %v2707_v23 = vrot.slane %v14432_v21, %v13749_v34 }
 0x8d4   :  { %3345 = vmatprep.subr.bf16.mxu1 %v10107_v24  ;;  %3386 = vmatprep.subr.bf16.mxu0 %v10109_v27 }
 0x8d7   :  { %3346 = vmatpush1.bf16.msra.mxu1 %v10106_v37  ;;  %3387 = vmatpush1.bf16.msra.mxu0 %v10108_v38 }
 0x8d8   :  { %3347 = vmatprep.subr.bf16.mxu1 %v10123_v39  ;;  %3388 = vmatprep.subr.bf16.mxu0 %v10125_v40 }
 0x8db   :  { %3348 = vmatpush1.bf16.msra.mxu1 %v10122_v41  ;;  %3389 = vmatpush1.bf16.msra.mxu0 %v10124_v45 }
 0x8dc   :  { %11785 = vmatprep.subr.bf16.mxu1 %v12686_v46  ;;  %11807 = vmatprep.subr.bf16.mxu0 %v12687_v47 }
 0x8de   :  { %10132 = vmatmul.mubr.msk.bf16.vlgmr.msra.gmra.mrb[48].mxu1 %vm198_vm2, %v14186_v61  ;;  %10133 = vmatmul.mubr.msk.bf16.vlgmr.msra.gmra.mrb[48].mxu0 %vm198_vm2, %v14186_v61  ;;  %v12695_v61 = vld [vmem:[%s16157_s5 + $0x4d0] sm:$0xff]  }
 0x8df   :  { %11786 = vmatpush3.bf16.msra.mxu1 %v12688_v48  ;;  %11808 = vmatpush3.bf16.msra.mxu0 %v12689_v50 }
 0x8e0   :  { %11787 = vmatprep.subr.bf16.mxu1 %v12690_v51  ;;  %11809 = vmatprep.subr.bf16.mxu0 %v12691_v52 }
 0x8e3   :  { %11788 = vmatpush3.bf16.msra.mxu1 %v12692_v32  ;;  %11810 = vmatpush3.bf16.msra.mxu0 %v12693_v53  ;;  %v12720_v32 = vld [vmem:[%s16157_s5 + $0x500] sm:$0xff]  }
 0x8e4   :  { %11789 = vmatprep.subr.bf16.mxu1 %v12694_v54  ;;  %11811 = vmatprep.subr.bf16.mxu0 %v12695_v61  ;;  %v12721_v53 = vld [vmem:[%s16157_s5 + $0x580] sm:$0xff]  }
 0x8e7   :  { %11790 = vmatpush3.bf16.msra.mxu1 %v12696_v55  ;;  %11812 = vmatpush3.bf16.msra.mxu0 %v12697_v56  ;;  %v12722_v55 = vld [vmem:[%s16157_s5 + $0x548] sm:$0xff]  }
 0x8e8   :  { %11791 = vmatprep.subr.bf16.mxu1 %v12698_v57  ;;  %11813 = vmatprep.subr.bf16.mxu0 %v12699_v58  ;;  %v12723_v56 = vld [vmem:[%s16157_s5 + $0x5c8] sm:$0xff]  }
 0x8e9   :  { %v12724_v57 = vld [vmem:[%s16157_s5 + $0x508] sm:$0xff]  }
 0x8ea   :  { %v12725_v58 = vld [vmem:[%s16157_s5 + $0x588] sm:$0xff]  }
 0x8eb   :  { %11792 = vmatpush3.bf16.msra.mxu1 %v12700_v26  ;;  %11814 = vmatpush3.bf16.msra.mxu0 %v12701_v62  ;;  %v12726_v26 = vld [vmem:[%s16157_s5 + $0x550] sm:$0xff]  }
 0x8ec   :  { %11793 = vmatprep.subr.bf16.mxu1 %v12702_v63  ;;  %11815 = vmatprep.subr.bf16.mxu0 %v12703_v5  ;;  %v12727_v62 = vld [vmem:[%s16157_s5 + $0x5d0] sm:$0xff]   ;;  %v2715_v63 = vrot.slane %v14432_v21, %v13778_v2  ;;  %v2723_v5 = vrot.slane %v14432_v21, %v13781_v3 }
 0x8ef   :  { %11794 = vmatpush3.bf16.msra.mxu1 %v12704_v6  ;;  %11816 = vmatpush3.bf16.msra.mxu0 %v12705_v49  ;;  %v12728_v6 = vld [vmem:[%s16157_s5 + $0x510] sm:$0xff]  }
 0x8f0   :  { %11795 = vmatprep.subr.bf16.mxu1 %v12706_v7  ;;  %11817 = vmatprep.subr.bf16.mxu0 %v12707_v8  ;;  %v12729_v49 = vld [vmem:[%s16157_s5 + $0x590] sm:$0xff]   ;;  %v12730_v7 = vld [vmem:[%s16157_s5 + $0x558] sm:$0xff]  }
 0x8f1   :  { %v12731_v8 = vld [vmem:[%s16157_s5 + $0x5d8] sm:$0xff]  }
 0x8f3   :  { %11796 = vmatpush3.bf16.msra.mxu1 %v12708_v9  ;;  %11818 = vmatpush3.bf16.msra.mxu0 %v12709_v10 }
 0x8f4   :  { %11797 = vmatprep.subr.bf16.mxu1 %v12710_v44  ;;  %11819 = vmatprep.subr.bf16.mxu0 %v12711_v12 }
 0x8f7   :  { %11798 = vmatpush3.bf16.msra.mxu1 %v12712_v13  ;;  %11820 = vmatpush3.bf16.msra.mxu0 %v12713_v14 }
 0x8f8   :  { %11799 = vmatprep.subr.bf16.mxu1 %v12714_v15  ;;  %11821 = vmatprep.subr.bf16.mxu0 %v12715_v16 }
 0x8fb   :  { %11800 = vmatpush3.bf16.msra.mxu1 %v12716_v17  ;;  %11822 = vmatpush3.bf16.msra.mxu0 %v12717_v18  ;;  %v12732_v17 = vld [vmem:[%s16157_s5 + $0x518] sm:$0xff]  }
 0x8fc   :  { %11829 = vmatprep.subr.bf16.mxu1 %v12718_v59  ;;  %11851 = vmatprep.subr.bf16.mxu0 %v12719_v19  ;;  %v12733_v18 = vld [vmem:[%s16157_s5 + $0x598] sm:$0xff]  }
 0x981   :  { %v3129_v24 = vpop.f32.mrb[36].mxu1  ;;  %v3170_v27 = vpop.f32.mrb[36].mxu0 }
 0x982   :  { %v3130_v25 = vadd.f32 %v3129_v24, %v2695_v29  ;;  %v3171_v28 = vadd.f32 %v3170_v27, %v2703_v60  ;;  %v3131_v35 = vpop.f32.mrb[37].mxu1  ;;  %v3172_v36 = vpop.f32.mrb[37].mxu0  ;;  %v12734_v29 = vld [vmem:[%s16157_s5 + $0x560] sm:$0xff]  }
 0x983   :  { %v3132_v37 = vadd.f32 %v3131_v35, %v2699_v22  ;;  %v3173_v38 = vadd.f32 %v3172_v36, %v2707_v23  ;;  %v3133_v39 = vpop.f32.mrb[38].mxu1  ;;  %v3174_v40 = vpop.f32.mrb[38].mxu0  ;;  %v12735_v60 = vld [vmem:[%s16157_s5 + $0x5e0] sm:$0xff]   ;;  %v12738_v35 = vld [vmem:[%s16157_s5 + $0x568] sm:$0xff]  }
 0x984   :  { %v3423_v41 = vmax.f32 %v3130_v25, 0.0  ;;  %v3425_v45 = vmax.f32 %v3171_v28, 0.0  ;;  %v3134_v46 = vpop.f32.mrb[39].mxu1  ;;  %v3175_v47 = vpop.f32.mrb[39].mxu0  ;;  %v12736_v25 = vld [vmem:[%s16157_s5 + $0x520] sm:$0xff]   ;;  %v12739_v36 = vld [vmem:[%s16157_s5 + $0x5e8] sm:$0xff]   ;;  %v2711_v39 = vrot.slane %v14432_v21, %v13824_v42  ;;  %v2719_v40 = vrot.slane %v14432_v21, %v13827_v43 }
 0x985   :  { %v3424_v48 = vmax.f32 %v3132_v37, 0.0  ;;  %v3426_v50 = vmax.f32 %v3173_v38, 0.0  ;;  %v12737_v28 = vld [vmem:[%s16157_s5 + $0x5a0] sm:$0xff]   ;;  %v12740_v37 = vld [vmem:[%s16157_s5 + $0x528] sm:$0xff]   ;;  %v12743_v46 = vld [vmem:[%s16157_s5 + $0x5f0] sm:$0xff]  }
 0x986   :  { %v3439_v54 = vpack.c.bf16 %v3423_v41, %v3423_v41  ;;  %v3441_v61 = vpack.c.bf16 %v3425_v45, %v3425_v45  ;;  %v12741_v38 = vld [vmem:[%s16157_s5 + $0x5a8] sm:$0xff]   ;;  %v12742_v45 = vld [vmem:[%s16157_s5 + $0x570] sm:$0xff]  }
 0x987   :  { %v3440_v51 = vpack.c.bf16 %v3424_v48, %v3424_v48  ;;  %v3442_v52 = vpack.c.bf16 %v3426_v50, %v3426_v50  ;;  %v14516_v41 = vld [vmem:[#allocation7 + $0x21] ss:$4 sm:$0xff] }
 0x988   :  { %v2731_v47 = vrot.slane %v14516_v41, %v13746_v33  ;;  %v2739_v21 = vrot.slane %v14516_v41, %v13749_v34  ;;  %v12744_v48 = vld [vmem:[%s16157_s5 + $0x530] sm:$0xff]  }
 0x989   :  { %4517 = vmatprep.mubr.bf16.mxu1 %v3440_v51  ;;  %4557 = vmatprep.mubr.bf16.mxu0 %v3442_v52  ;;  %v12745_v50 = vld [vmem:[%s16157_s5 + $0x5b0] sm:$0xff]  }
 0x98a   :  { %4518 = vmatmul.mubr.bf16.vlgmr.msra.gmra.mrb[52].mxu1 %v3439_v54  ;;  %4558 = vmatmul.mubr.bf16.vlgmr.msra.gmra.mrb[52].mxu0 %v3441_v61 }
 0x98b   :  { %11830 = vmatpush3.bf16.msra.mxu1 %v12720_v32  ;;  %11852 = vmatpush3.bf16.msra.mxu0 %v12721_v53  ;;  %v12746_v32 = vld [vmem:[%s16157_s5 + $0x578] sm:$0xff]  }
 0x98c   :  { %11831 = vmatprep.subr.bf16.mxu1 %v12722_v55  ;;  %11853 = vmatprep.subr.bf16.mxu0 %v12723_v56  ;;  %v12747_v53 = vld [vmem:[%s16157_s5 + $0x5f8] sm:$0xff]  }
 0x98f   :  { %11832 = vmatpush3.bf16.msra.mxu1 %v12724_v57  ;;  %11854 = vmatpush3.bf16.msra.mxu0 %v12725_v58 }
 0x990   :  { %11833 = vmatprep.subr.bf16.mxu1 %v12726_v26  ;;  %11855 = vmatprep.subr.bf16.mxu0 %v12727_v62 }
 0x991   :  { %v3211_v9 = vpop.f32.mrb[40].mxu1  ;;  %v3252_v10 = vpop.f32.mrb[40].mxu0 }
 0x992   :  { %v3213_v44 = vpop.f32.mrb[41].mxu1  ;;  %v3254_v12 = vpop.f32.mrb[41].mxu0  ;;  %v3212_v51 = vadd.f32 %v3211_v9, %v2711_v39  ;;  %v3253_v52 = vadd.f32 %v3252_v10, %v2719_v40  ;;  %v12750_v9 = vld [vmem:[%s16157_s5 + $0x640] sm:$0xff]  }
 0x993   :  { %v3214_v13 = vadd.f32 %v3213_v44, %v2715_v63  ;;  %v3255_v14 = vadd.f32 %v3254_v12, %v2723_v5  ;;  %v3215_v15 = vpop.f32.mrb[42].mxu1  ;;  %v3256_v16 = vpop.f32.mrb[42].mxu0  ;;  %11834 = vmatpush3.bf16.msra.mxu1 %v12728_v6  ;;  %11856 = vmatpush3.bf16.msra.mxu0 %v12729_v49  ;;  %v12748_v63 = vld [vmem:[%s16157_s5 + $0x538] sm:$0xff]   ;;  %v12751_v10 = vld [vmem:[%s16157_s5 + $0x6c0] sm:$0xff]  }
 0x994   :  { %v3216_v59 = vpop.f32.mrb[43].mxu1  ;;  %v3257_v19 = vpop.f32.mrb[43].mxu0  ;;  %11835 = vmatprep.subr.bf16.mxu1 %v12730_v7  ;;  %11857 = vmatprep.subr.bf16.mxu0 %v12731_v8  ;;  %v12749_v5 = vld [vmem:[%s16157_s5 + $0x5b8] sm:$0xff]   ;;  %v3427_v6 = vmax.f32 %v3212_v51, 0.0  ;;  %v3429_v49 = vmax.f32 %v3253_v52, 0.0  ;;  %v12753_v16 = vld [vmem:[%s16157_s5 + $0x680] sm:$0xff]  }
 0x995   :  { %v3428_v22 = vmax.f32 %v3214_v13, 0.0  ;;  %v3430_v23 = vmax.f32 %v3255_v14, 0.0  ;;  %v12752_v13 = vld [vmem:[%s16157_s5 + $0x600] sm:$0xff]   ;;  %v12755_v59 = vld [vmem:[%s16157_s5 + $0x6c8] sm:$0xff]  }
 0x996   :  { %v3443_v14 = vpack.c.bf16 %v3427_v6, %v3427_v6  ;;  %v3445_v15 = vpack.c.bf16 %v3429_v49, %v3429_v49  ;;  %v12766_v51 = vld [vmem:[%s16157_s5 + $0x660] sm:$0xff]   ;;  %v2747_v6 = vrot.slane %v14516_v41, %v13778_v2  ;;  %v2755_v49 = vrot.slane %v14516_v41, %v13781_v3 }
 0x997   :  { %v3444_v24 = vpack.c.bf16 %v3428_v22, %v3428_v22  ;;  %v3446_v27 = vpack.c.bf16 %v3430_v23, %v3430_v23  ;;  %11836 = vmatpush3.bf16.msra.mxu1 %v12732_v17  ;;  %11858 = vmatpush3.bf16.msra.mxu0 %v12733_v18  ;;  %v12754_v18 = vld [vmem:[%s16157_s5 + $0x648] sm:$0xff]   ;;  %v12758_v22 = vld [vmem:[%s16157_s5 + $0x650] sm:$0xff]   ;;  %v12767_v52 = vld [vmem:[%s16157_s5 + $0x6e0] sm:$0xff]  }
 0x998   :  { %11837 = vmatprep.subr.bf16.mxu1 %v12734_v29  ;;  %11859 = vmatprep.subr.bf16.mxu0 %v12735_v60  ;;  %v12756_v29 = vld [vmem:[%s16157_s5 + $0x608] sm:$0xff]   ;;  %v12759_v23 = vld [vmem:[%s16157_s5 + $0x6d0] sm:$0xff]  }
 0x999   :  { %4597 = vmatprep.mubr.bf16.mxu1 %v3444_v24  ;;  %4637 = vmatprep.mubr.bf16.mxu0 %v3446_v27  ;;  %v12757_v60 = vld [vmem:[%s16157_s5 + $0x688] sm:$0xff]   ;;  %v2751_v24 = vrot.slane %v14516_v41, %v13827_v43  ;;  %v12760_v27 = vld [vmem:[%s16157_s5 + $0x610] sm:$0xff]  }
 0x99b   :  { %11838 = vmatpush3.bf16.msra.mxu1 %v12736_v25  ;;  %11860 = vmatpush3.bf16.msra.mxu0 %v12737_v28  ;;  %v12761_v25 = vld [vmem:[%s16157_s5 + $0x690] sm:$0xff]   ;;  %v12762_v28 = vld [vmem:[%s16157_s5 + $0x658] sm:$0xff]  }
 0x99c   :  { %11839 = vmatprep.subr.bf16.mxu1 %v12738_v35  ;;  %11861 = vmatprep.subr.bf16.mxu0 %v12739_v36 }
 0x99f   :  { %11840 = vmatpush3.bf16.msra.mxu1 %v12740_v37  ;;  %11862 = vmatpush3.bf16.msra.mxu0 %v12741_v38  ;;  %v12763_v37 = vld [vmem:[%s16157_s5 + $0x6d8] sm:$0xff]  }
 0x9a0   :  { %11841 = vmatprep.subr.bf16.mxu1 %v12742_v45  ;;  %11863 = vmatprep.subr.bf16.mxu0 %v12743_v46 }
 0x9a1   :  { %v14540_v54 = vpop.f32.mrb[44].mxu1  ;;  %v14542_v61 = vpop.f32.mrb[44].mxu0 }
 0x9a2   :  { %v3295_v55 = vpop.f32.mrb[45].mxu1  ;;  %v3336_v56 = vpop.f32.mrb[45].mxu0 }
 0x9a3   :  { %v3296_v57 = vadd.f32 %v3295_v55, %v2731_v47  ;;  %v3337_v58 = vadd.f32 %v3336_v56, %v2739_v21  ;;  %v3297_v26 = vpop.f32.mrb[46].mxu1  ;;  %v3338_v62 = vpop.f32.mrb[46].mxu0  ;;  %11842 = vmatpush3.bf16.msra.mxu1 %v12744_v48  ;;  %11864 = vmatpush3.bf16.msra.mxu0 %v12745_v50  ;;  %v12764_v47 = vld [vmem:[%s16157_s5 + $0x618] sm:$0xff]   ;;  %v12770_v55 = vld [vmem:[%s16157_s5 + $0x668] sm:$0xff]  }
 0x9a4   :  { %v3298_v7 = vpop.f32.mrb[47].mxu1  ;;  %v3339_v8 = vpop.f32.mrb[47].mxu0  ;;  %11843 = vmatprep.subr.bf16.mxu1 %v12746_v32  ;;  %11865 = vmatprep.subr.bf16.mxu0 %v12747_v53  ;;  %v12765_v50 = vld [vmem:[%s16157_s5 + $0x698] sm:$0xff]   ;;  %v12768_v32 = vld [vmem:[%s16157_s5 + $0x620] sm:$0xff]   ;;  %v12771_v56 = vld [vmem:[%s16157_s5 + $0x6e8] sm:$0xff]  }
 0x9a5   :  { %v3432_v44 = vmax.f32 %v3296_v57, 0.0  ;;  %v3434_v12 = vmax.f32 %v3337_v58, 0.0  ;;  %v12769_v53 = vld [vmem:[%s16157_s5 + $0x6a0] sm:$0xff]   ;;  %v12772_v57 = vld [vmem:[%s16157_s5 + $0x628] sm:$0xff]   ;;  %v2727_v58 = vrot.slane %v14516_v41, %v13738_v30  ;;  %v12774_v62 = vld [vmem:[%s16157_s5 + $0x670] sm:$0xff]  }
 0x9a6   :  { %v12773_v26 = vld [vmem:[%s16157_s5 + $0x6a8] sm:$0xff]   ;;  %v12776_v7 = vld [vmem:[%s16157_s5 + $0x630] sm:$0xff]  }
 0x9a7   :  { %11844 = vmatpush3.bf16.msra.mxu1 %v12748_v63  ;;  %11866 = vmatpush3.bf16.msra.mxu0 %v12749_v5  ;;  %v3448_v17 = vpack.c.bf16 %v3432_v44, %v3432_v44  ;;  %v3450_v19 = vpack.c.bf16 %v3434_v12, %v3434_v12  ;;  %v2735_v63 = vrot.slane %v14516_v41, %v13741_v31  ;;  %v12775_v5 = vld [vmem:[%s16157_s5 + $0x6f0] sm:$0xff]   ;;  %v12779_v12 = vld [vmem:[%s16157_s5 + $0x6f8] sm:$0xff]  }
 0x9a8   :  { %11873 = vmatprep.subr.bf16.mxu1 %v12750_v9  ;;  %11895 = vmatprep.subr.bf16.mxu0 %v12751_v10  ;;  %v3294_v8 = vadd.f32 %v14540_v54, %v2727_v58  ;;  %v12777_v9 = vld [vmem:[%s16157_s5 + $0x6b0] sm:$0xff]   ;;  %v12778_v10 = vld [vmem:[%s16157_s5 + $0x678] sm:$0xff]   ;;  %v2743_v58 = vrot.slane %v14516_v41, %v13824_v42 }
 0x9a9   :  { %v3335_v44 = vadd.f32 %v14542_v61, %v2735_v63  ;;  %v12780_v54 = vld [vmem:[%s16157_s5 + $0x638] sm:$0xff]   ;;  %v12782_v61 = vld [vmem:[%s16157_s5 + $0x740] sm:$0xff]   ;;  %v12807_v63 = vld [vmem:[%s16157_s5 + $0x7f0] sm:$0xff]  }
 0x9aa   :  { %4598 = vmatmul.mubr.bf16.vlgmr.msra.gmra.mrb[56].mxu1 %v3443_v14  ;;  %4638 = vmatmul.mubr.bf16.vlgmr.msra.gmra.mrb[56].mxu0 %v3445_v15  ;;  %v3431_v15 = vmax.f32 %v3294_v8, 0.0  ;;  %v12808_v41 = vld [vmem:[%s16157_s5 + $0x730] sm:$0xff]  }
 0x9ab   :  { %11874 = vmatpush3.bf16.msra.mxu1 %v12752_v13  ;;  %4677 = vmatprep.mubr.bf16.mxu1 %v3448_v17  ;;  %v3433_v17 = vmax.f32 %v3335_v44, 0.0  ;;  %v4954_v44 = vld [vmem:[#allocation2 + $0x80] sm:$0xff] }
 0x9ac   :  { %11896 = vmatpush3.bf16.msra.mxu0 %v12753_v16  ;;  %4717 = vmatprep.mubr.bf16.mxu0 %v3450_v19  ;;  %v12781_v16 = vld [vmem:[%s16157_s5 + $0x6b8] sm:$0xff]  }
 0x9ad   :  { %11875 = vmatprep.subr.bf16.mxu1 %v12754_v18  ;;  %11897 = vmatprep.subr.bf16.mxu0 %v12755_v59  ;;  %v12783_v18 = vld [vmem:[%s16157_s5 + $0x7c0] sm:$0xff]  }
 0x9af   :  { %11876 = vmatpush3.bf16.msra.mxu1 %v12756_v29  ;;  %v12784_v29 = vld [vmem:[%s16157_s5 + $0x700] sm:$0xff]  }
 0x9b0   :  { %11898 = vmatpush3.bf16.msra.mxu0 %v12757_v60  ;;  %11877 = vmatprep.subr.bf16.mxu1 %v12758_v22  ;;  %v3447_v60 = vpack.c.bf16 %v3431_v15, %v3431_v15  ;;  %v12785_v22 = vld [vmem:[%s16157_s5 + $0x780] sm:$0xff]   ;;  %v4956_v15 = vld [vmem:[#allocation2 + $0x90] sm:$0xff] }
 0x9b1   :  { %v14591_v35 = vpop.f32.mrb[48].mxu1  ;;  %v3416_v36 = vpop.f32.mrb[48].mxu0  ;;  %11899 = vmatprep.subr.bf16.mxu0 %v12759_v23  ;;  %v3449_v23 = vpack.c.bf16 %v3433_v17, %v3433_v17  ;;  %v4959_v17 = vld [vmem:[#allocation2 + $0xa8] sm:$0xff] }
 0x9b2   :  { %v14596_v38 = vadd.f32 %v3416_v36, %v2751_v24  ;;  %v3377_v39 = vpop.f32.mrb[49].mxu1  ;;  %v3418_v40 = vpop.f32.mrb[49].mxu0  ;;  %v12786_v24 = vld [vmem:[%s16157_s5 + $0x748] sm:$0xff]  }
 0x9b3   :  { %v3379_v45 = vpop.f32.mrb[50].mxu1  ;;  %v3420_v46 = vpop.f32.mrb[50].mxu0  ;;  %11878 = vmatpush3.bf16.msra.mxu1 %v12760_v27  ;;  %v3378_v13 = vadd.f32 %v3377_v39, %v2747_v6  ;;  %v3419_v14 = vadd.f32 %v3418_v40, %v2755_v49  ;;  %v12788_v36 = vld [vmem:[%s16157_s5 + $0x708] sm:$0xff]   ;;  %v12790_v39 = vld [vmem:[%s16157_s5 + $0x750] sm:$0xff]   ;;  %v12810_v49 = vld [vmem:[%s16157_s5 + $0x778] sm:$0xff]  }
 0x9b4   :  { %11900 = vmatpush3.bf16.msra.mxu0 %v12761_v25  ;;  %v3380_v21 = vpop.f32.mrb[51].mxu1  ;;  %v3421_v48 = vpop.f32.mrb[51].mxu0  ;;  %11879 = vmatprep.subr.bf16.mxu1 %v12762_v28  ;;  %v12787_v25 = vld [vmem:[%s16157_s5 + $0x7c8] sm:$0xff]   ;;  %v12791_v40 = vld [vmem:[%s16157_s5 + $0x7d0] sm:$0xff]  }
 0x9b5   :  { %11901 = vmatprep.subr.bf16.mxu0 %v12763_v37  ;;  %v3436_v59 = vmax.f32 %v3378_v13, 0.0  ;;  %v3438_v19 = vmax.f32 %v3419_v14, 0.0  ;;  %v12789_v37 = vld [vmem:[%s16157_s5 + $0x788] sm:$0xff]   ;;  %v12792_v45 = vld [vmem:[%s16157_s5 + $0x710] sm:$0xff]   ;;  %v12795_v21 = vld [vmem:[%s16157_s5 + $0x7d8] sm:$0xff]  }
 0x9b6   :  { %v12793_v46 = vld [vmem:[%s16157_s5 + $0x790] sm:$0xff]   ;;  %v12796_v48 = vld [vmem:[%s16157_s5 + $0x718] sm:$0xff]  }
 0x9b7   :  { %11880 = vmatpush3.bf16.msra.mxu1 %v12764_v47  ;;  %v3452_v27 = vpack.c.bf16 %v3436_v59, %v3436_v59  ;;  %v3454_v28 = vpack.c.bf16 %v3438_v19, %v3438_v19  ;;  %v12794_v47 = vld [vmem:[%s16157_s5 + $0x758] sm:$0xff]   ;;  %v12809_v6 = vld [vmem:[%s16157_s5 + $0x7b0] sm:$0xff]  }
 0x9b8   :  { %11902 = vmatpush3.bf16.msra.mxu0 %v12765_v50  ;;  %11881 = vmatprep.subr.bf16.mxu1 %v12766_v51  ;;  %v12797_v50 = vld [vmem:[%s16157_s5 + $0x798] sm:$0xff]   ;;  %v12798_v51 = vld [vmem:[%s16157_s5 + $0x760] sm:$0xff]   ;;  %v4960_v59 = vld [vmem:[#allocation2 + $0xb0] sm:$0xff] }
 0x9b9   :  { %11903 = vmatprep.subr.bf16.mxu0 %v12767_v52  ;;  %v12799_v52 = vld [vmem:[%s16157_s5 + $0x7e0] sm:$0xff]   ;;  %v4961_v19 = vld [vmem:[#allocation2 + $0xb8] sm:$0xff] }
 0x9bb   :  { %11882 = vmatpush3.bf16.msra.mxu1 %v12768_v32  ;;  %v12800_v32 = vld [vmem:[%s16157_s5 + $0x720] sm:$0xff]  }
 0x9bc   :  { %11904 = vmatpush3.bf16.msra.mxu0 %v12769_v53  ;;  %11883 = vmatprep.subr.bf16.mxu1 %v12770_v55  ;;  %v12801_v53 = vld [vmem:[%s16157_s5 + $0x7a0] sm:$0xff]   ;;  %v12802_v55 = vld [vmem:[%s16157_s5 + $0x768] sm:$0xff]  }
 0x9bd   :  { %11905 = vmatprep.subr.bf16.mxu0 %v12771_v56  ;;  %v12803_v56 = vld [vmem:[%s16157_s5 + $0x7e8] sm:$0xff]  }
 0x9bf   :  { %11884 = vmatpush3.bf16.msra.mxu1 %v12772_v57  ;;  %v12804_v57 = vld [vmem:[%s16157_s5 + $0x728] sm:$0xff]  }
 0x9c0   :  { %11906 = vmatpush3.bf16.msra.mxu0 %v12773_v26  ;;  %11885 = vmatprep.subr.bf16.mxu1 %v12774_v62  ;;  %v12805_v26 = vld [vmem:[%s16157_s5 + $0x7a8] sm:$0xff]   ;;  %v12806_v62 = vld [vmem:[%s16157_s5 + $0x770] sm:$0xff]  }
 0x9c1   :  { %11907 = vmatprep.subr.bf16.mxu0 %v12775_v5  ;;  %v3376_v5 = vadd.f32 %v14591_v35, %v2743_v58  ;;  %v12812_v35 = vld [vmem:[%s16157_s5 + $0x738] sm:$0xff]  }
 0x9c3   :  { %11886 = vmatpush3.bf16.msra.mxu1 %v12776_v7  ;;  %v12811_v7 = vld [vmem:[%s16157_s5 + $0x7f8] sm:$0xff]   ;;  %v3435_v8 = vmax.f32 %v3376_v5, 0.0 }
 0x9c4   :  { %11908 = vmatpush3.bf16.msra.mxu0 %v12777_v9  ;;  %11887 = vmatprep.subr.bf16.mxu1 %v12778_v10  ;;  %v12813_v9 = vld [vmem:[%s16157_s5 + $0x7b8] sm:$0xff]   ;;  %v3437_v10 = vmax.f32 %v14596_v38, 0.0 }
 0x9c5   :  { %11909 = vmatprep.subr.bf16.mxu0 %v12779_v12  ;;  %v4955_v12 = vld [vmem:[#allocation2 + $0x88] sm:$0xff]  ;;  %v3451_v13 = vpack.c.bf16 %v3435_v8, %v3435_v8 }
 0x9c6   :  { %v12510_v14 = vpack.c.bf16 %v4955_v12, %v4954_v44 }
 0x9c7   :  { %11888 = vmatpush3.bf16.msra.mxu1 %v12780_v54  ;;  %v3453_v54 = vpack.c.bf16 %v3437_v10, %v3437_v10 }
 0x9c8   :  { %11910 = vmatpush3.bf16.msra.mxu0 %v12781_v16  ;;  %11917 = vmatprep.subr.bf16.mxu1 %v12782_v61  ;;  %v4957_v16 = vld [vmem:[#allocation2 + $0x98] sm:$0xff]  ;;  %v4958_v61 = vld [vmem:[#allocation2 + $0xa0] sm:$0xff] }
 0x9c9   :  { %11939 = vmatprep.subr.bf16.mxu0 %v12783_v18  ;;  %v12513_v38 = vpack.c.bf16 %v4957_v16, %v4956_v15  ;;  %v12516_v18 = vpack.c.bf16 %v4959_v17, %v4958_v61 }
 0x9ca   :  { %4678 = vmatmul.mubr.bf16.vlgmr.msra.gmra.mrb[60].mxu1 %v3447_v60 }
 0x9cb   :  { %4718 = vmatmul.mubr.bf16.vlgmr.msra.gmra.mrb[60].mxu0 %v3449_v23  ;;  %11918 = vmatpush3.bf16.msra.mxu1 %v12784_v29  ;;  %v12519_v29 = vpack.c.bf16 %v4961_v19, %v4960_v59  ;;  %v10390_v23 = vld [vmem:[#allocation8 + $0xa] ss:$0 sm:$0xff] }
 0x9cc   :  { %4757 = vmatprep.mubr.bf16.mxu1 %v3452_v27  ;;  %11940 = vmatpush3.bf16.msra.mxu0 %v12785_v22 }
 0x9cd   :  { %4797 = vmatprep.mubr.bf16.mxu0 %v3454_v28  ;;  %11919 = vmatprep.subr.bf16.mxu1 %v12786_v24 }
 0x9ce   :  { %11941 = vmatprep.subr.bf16.mxu0 %v12787_v25 }
 0x9cf   :  { %11920 = vmatpush3.bf16.msra.mxu1 %v12788_v36 }
 0x9d0   :  { %11942 = vmatpush3.bf16.msra.mxu0 %v12789_v37  ;;  %11921 = vmatprep.subr.bf16.mxu1 %v12790_v39 }
 0x9d1   :  { %11943 = vmatprep.subr.bf16.mxu0 %v12791_v40 }
 0x9d3   :  { %11922 = vmatpush3.bf16.msra.mxu1 %v12792_v45 }
 0x9d4   :  { %11944 = vmatpush3.bf16.msra.mxu0 %v12793_v46  ;;  %11923 = vmatprep.subr.bf16.mxu1 %v12794_v47 }
 0x9d5   :  { %11945 = vmatprep.subr.bf16.mxu0 %v12795_v21 }
 0x9d7   :  { %11924 = vmatpush3.bf16.msra.mxu1 %v12796_v48 }
 0x9d8   :  { %11946 = vmatpush3.bf16.msra.mxu0 %v12797_v50  ;;  %11925 = vmatprep.subr.bf16.mxu1 %v12798_v51 }
 0x9d9   :  { %11947 = vmatprep.subr.bf16.mxu0 %v12799_v52 }
 0x9db   :  { %11926 = vmatpush3.bf16.msra.mxu1 %v12800_v32 }
 0x9dc   :  { %11948 = vmatpush3.bf16.msra.mxu0 %v12801_v53  ;;  %11927 = vmatprep.subr.bf16.mxu1 %v12802_v55 }
 0x9dd   :  { %11949 = vmatprep.subr.bf16.mxu0 %v12803_v56 }
 0x9df   :  { %11928 = vmatpush3.bf16.msra.mxu1 %v12804_v57 }
 0x9e0   :  { %11950 = vmatpush3.bf16.msra.mxu0 %v12805_v26  ;;  %11929 = vmatprep.subr.bf16.mxu1 %v12806_v62 }
 0x9e1   :  { %11951 = vmatprep.subr.bf16.mxu0 %v12807_v63 }
 0x9e3   :  { %11930 = vmatpush3.bf16.msra.mxu1 %v12808_v41 }
 0x9e4   :  { %11952 = vmatpush3.bf16.msra.mxu0 %v12809_v6  ;;  %11931 = vmatprep.subr.bf16.mxu1 %v12810_v49 }
 0x9e5   :  { %11953 = vmatprep.subr.bf16.mxu0 %v12811_v7 }
 0x9e7   :  { %11932 = vmatpush3.bf16.msra.mxu1 %v12812_v35 }
 0x9e8   :  { %11954 = vmatpush3.bf16.msra.mxu0 %v12813_v9  ;;  %12497 = vmatprep.subr.bf16.mxu1 %v13241_v0 }
 0x9e9   :  { %12509 = vmatprep.subr.bf16.mxu0 %v13241_v0 }
 0x9ea   :  { %4758 = vmatmul.mubr.bf16.vlgmr.msra.gmra.mrb[64].mxu1 %v3451_v13 }
 0x9eb   :  { %4798 = vmatmul.mubr.bf16.vlgmr.msra.gmra.mrb[64].mxu0 %v3453_v54  ;;  %12410 = vmatprep.mubr.msk.f32.mxu1 %vm13242_vm0, %v13243_v1 }
 0x9ec   :  { %12511 = vmatpush3.bf16.msra.mxu0 %v12510_v14  ;;  %12429 = vmatprep.mubr.msk.f32.mxu0 %vm13242_vm0, %v13243_v1 }
 0x9ed   :  { %12512 = vmatprep.subr.bf16.mxu0 %v13241_v0 }
 0x9f0   :  { %12514 = vmatpush3.bf16.msra.mxu0 %v12513_v38 }
 0x9f1   :  { %12515 = vmatprep.subr.bf16.mxu0 %v13241_v0 }
 0x9f4   :  { %12517 = vmatpush3.bf16.msra.mxu0 %v12516_v18 }
 0x9f5   :  { %12518 = vmatprep.subr.bf16.mxu0 %v13241_v0 }
 0x9f8   :  { %12520 = vmatpush3.bf16.msra.mxu0 %v12519_v29 }
 0x9fb   :  { %12430 = vmatmul.mubr.msk.f32.vlgmr.msra.gmra.mrb[68].mxu0 %vm198_vm2, %v13399_v20 }
 0x9fc   :  { %5637 = vmatprep.mubr.bf16.mxu0 %v13244_v11 }
 0xa5d   :  { %v11801_v60 = vpop.f32.mrb[52].mxu1  ;;  %v11823_v22 = vpop.f32.mrb[52].mxu0 }
 0xa5e   :  { %v11802_v24 = vpop.f32.mrb[53].mxu1  ;;  %v11824_v27 = vpop.f32.mrb[53].mxu0 }
 0xa5f   :  { %v11803_v25 = vadd.f32 %v11802_v24, %v11801_v60  ;;  %v11825_v28 = vadd.f32 %v11824_v27, %v11823_v22  ;;  %v11804_v36 = vpop.f32.mrb[54].mxu1  ;;  %v11826_v37 = vpop.f32.mrb[54].mxu0 }
 0xa60   :  { %v11805_v39 = vpop.f32.mrb[55].mxu1  ;;  %v11827_v40 = vpop.f32.mrb[55].mxu0 }
 0xa61   :  { %v4520_v45 = vadd.f32 %v11803_v25, %v10390_v23 }
 0xa63   :  { %v4560_v46 = vadd.f32 %v11825_v28, %v4520_v45  ;;  %v10526_v45 = vld [vmem:[#allocation8 + $0xf] ss:$0 sm:$0xff] }
 0xa7d   :  { %v11845_v47 = vpop.f32.mrb[56].mxu1  ;;  %v11867_v21 = vpop.f32.mrb[56].mxu0 }
 0xa7e   :  { %v11846_v48 = vpop.f32.mrb[57].mxu1  ;;  %v11868_v50 = vpop.f32.mrb[57].mxu0 }
 0xa7f   :  { %v11847_v51 = vadd.f32 %v11846_v48, %v11845_v47  ;;  %v11869_v52 = vadd.f32 %v11868_v50, %v11867_v21  ;;  %v11848_v32 = vpop.f32.mrb[58].mxu1  ;;  %v11870_v53 = vpop.f32.mrb[58].mxu0  ;;  %v10520_v47 = vld [vmem:[#allocation8 + $0xc] ss:$0 sm:$0xff] }
 0xa80   :  { %v11849_v55 = vpop.f32.mrb[59].mxu1  ;;  %v11871_v56 = vpop.f32.mrb[59].mxu0 }
 0xa81   :  { %v4600_v57 = vadd.f32 %v11847_v51, %v4560_v46  ;;  %v10519_v46 = vld [vmem:[#allocation8 + $0xb] ss:$0 sm:$0xff] }
 0xa83   :  { %v4640_v58 = vadd.f32 %v11869_v52, %v4600_v57 }
 0xa9d   :  { %v11889_v26 = vpop.f32.mrb[60].mxu1 }
 0xa9e   :  { %v11911_v62 = vpop.f32.mrb[60].mxu0  ;;  %v11890_v63 = vpop.f32.mrb[61].mxu1 }
 0xa9f   :  { %v11891_v41 = vadd.f32 %v11890_v63, %v11889_v26  ;;  %v11912_v5 = vpop.f32.mrb[61].mxu0  ;;  %v11892_v6 = vpop.f32.mrb[62].mxu1 }
 0xaa0   :  { %v11913_v49 = vadd.f32 %v11912_v5, %v11911_v62  ;;  %v11914_v7 = vpop.f32.mrb[62].mxu0  ;;  %v11893_v35 = vpop.f32.mrb[63].mxu1  ;;  %v4856_v6 = vld [vmem:[#allocation5] sm:$0xff] }
 0xaa1   :  { %v4680_v8 = vadd.f32 %v11891_v41, %v4640_v58  ;;  %v11915_v9 = vpop.f32.mrb[63].mxu0  ;;  %v4858_v7 = vld [vmem:[#allocation5 + $0x10] sm:$0xff]  ;;  %v4859_v35 = vld [vmem:[#allocation5 + $0x18] sm:$0xff] }
 0xaa2   :  { %v4860_v9 = vld [vmem:[#allocation5 + $0x20] sm:$0xff] }
 0xaa3   :  { %v4720_v10 = vadd.f32 %v11913_v49, %v4680_v8  ;;  %v12501_v8 = vpack.c.bf16 %v4859_v35, %v4858_v7  ;;  %v10564_v35 = vld [vmem:[%s16156_s4 + $0x500] sm:$0xff] }
 0xabd   :  { %v11933_v44 = vpop.f32.mrb[64].mxu1 }
 0xabe   :  { %v11955_v12 = vpop.f32.mrb[64].mxu0  ;;  %v11934_v13 = vpop.f32.mrb[65].mxu1 }
 0xabf   :  { %v11935_v14 = vadd.f32 %v11934_v13, %v11933_v44  ;;  %v11956_v54 = vpop.f32.mrb[65].mxu0  ;;  %v11936_v15 = vpop.f32.mrb[66].mxu1  ;;  %v4863_v13 = vld [vmem:[#allocation5 + $0x38] sm:$0xff] }
 0xac0   :  { %v11957_v16 = vadd.f32 %v11956_v54, %v11955_v12  ;;  %v11958_v38 = vpop.f32.mrb[66].mxu0  ;;  %v11937_v61 = vpop.f32.mrb[67].mxu1  ;;  %v4862_v12 = vld [vmem:[#allocation5 + $0x30] sm:$0xff] }
 0xac1   :  { %v4760_v17 = vadd.f32 %v11935_v14, %v4720_v10  ;;  %v11959_v18 = vpop.f32.mrb[67].mxu0  ;;  %v4861_v10 = vld [vmem:[#allocation5 + $0x28] sm:$0xff]  ;;  %v12507_v14 = vpack.c.bf16 %v4863_v13, %v4862_v12 }
 0xac2   :  { %v12504_v44 = vpack.c.bf16 %v4861_v10, %v4860_v9  ;;  %v10521_v61 = vld [vmem:[#allocation8 + $0xd] ss:$0 sm:$0xff]  ;;  %v10522_v18 = vld [vmem:[#allocation8 + $0xe] ss:$0 sm:$0xff] }
 0xac3   :  { %v4800_v59 = vadd.f32 %v11957_v16, %v4760_v17  ;;  %v10565_v9 = vld [vmem:[%s16156_s4 + $0x508] sm:$0xff] }
 0xac5   :  { %v4805_v19 = vadd.f32 %v4800_v59, %v14182_v4 }
 0xac7   :  { %v4806_v29 = vsel %vm198_vm2, %v4805_v19, 0.0 }
 0xac8   :  { %4807 = vadd.xlane.f32.xlu0 %v4806_v29 }
 0xace   :  { %v5033_v60 = vpop.f32.mrb[68].mxu0 }
 0xacf   :  { %v12431_v22 = vpop.f32.mrb[69].mxu0  ;;  %v5034_v21 = vadd.f32 %v10526_v45, %v5033_v60 }
 0xad1   :  { %v5037_v52 = vadd.f32 %v5034_v21, %v13399_v20  ;;  %v4857_v20 = vld [vmem:[#allocation5 + $0x8] sm:$0xff] }
 0xad2   :  { %v12498_v49 = vpack.c.bf16 %v4857_v20, %v4856_v6  ;;  %v10557_v6 = vld [vmem:[%s16156_s4 + $0x4c8] sm:$0xff] }
 0xad3   :  { %v5038_v32 = vsel %vm198_vm2, %v5037_v52, 0.0 }
 0xad4   :  { %12499 = vmatpush3.bf16.msra.mxu1 %v12498_v49 }
 0xad5   :  { %12500 = vmatprep.subr.bf16.mxu1 %v13241_v0 }
 0xad8   :  { %12502 = vmatpush3.bf16.msra.mxu1 %v12501_v8  ;;  %v10572_v8 = vld [vmem:[%s16156_s4 + $0x540] sm:$0xff] }
 0xad9   :  { %12503 = vmatprep.subr.bf16.mxu1 %v13241_v0  ;;  %v10629_v10 = vcombine.high %v10564_v35, %v10572_v8  ;;  %v10628_v12 = vcombine.low %v10564_v35, %v10572_v8 }
 0xadc   :  { %12505 = vmatpush3.bf16.msra.mxu1 %v12504_v44  ;;  %v10573_v44 = vld [vmem:[%s16156_s4 + $0x548] sm:$0xff] }
 0xadd   :  { %12506 = vmatprep.subr.bf16.mxu1 %v13241_v0  ;;  %v10630_v13 = vcombine.low %v10565_v9, %v10573_v44 }
 0xae0   :  { %12508 = vmatpush3.bf16.msra.mxu1 %v12507_v14  ;;  %v10631_v14 = vcombine.high %v10565_v9, %v10573_v44  ;;  %v10536_v44 = vld [vmem:[%s16156_s4 + $0x420] sm:$0xff] }
 0xb55   :  { %v4808_v23 = vpop.xlane.xlu0 %4807 }
 0xb56   :  { %v4809_v24 = vmul.f32 0.015625, %v4808_v23 }
 0xb58   :  { %v4810_v27 = vsub.f32 %v4805_v19, %v4809_v24 }
 0xb5a   :  { %v4811_v25 = vmul.f32 %v4810_v27, %v4810_v27 }
 0xb5c   :  { %v4812_v28 = vsel %vm198_vm2, %v4811_v25, 0.0 }
 0xb5d   :  { %4813 = vadd.xlane.f32.xlu1 %v4812_v28  ;;  %v10524_v28 = vld [vmem:[#allocation8 + $0x12] ss:$0 sm:$0xff] }
 0xbea   :  { %v4814_v36 = vpop.xlane.xlu1 %4813 }
 0xbeb   :  { %v4815_v37 = vmul.f32 0.015625, %v4814_v36  ;;  %v10529_v36 = vld [vmem:[#allocation8 + $0x11] ss:$0 sm:$0xff] }
 0xbed   :  { %v4816_v39 = vadd.f32 1e-05, %v4815_v37 }
 0xbef   :  { %13076 = vrsqrt.f32 %v4816_v39 }
 0xbf9   :  { %v13077_v40 = vpop.eup %13076 }
 0xbfa   :  { %v4818_v4 = vmul.f32 %v13077_v40, %v4810_v27  ;;  %v10528_v27 = vld [vmem:[#allocation8 + $0x10] ss:$0 sm:$0xff] }
 0xbfc   :  { %v4824_v48 = vmul.f32 %v10519_v46, %v4818_v4 }
 0xbfe   :  { %v4830_v50 = vadd.f32 %v10520_v47, %v4824_v48 }
 0xc00   :  { %v4831_v51 = vsel %vm198_vm2, %v4830_v50, 0.0 }
 0xc01   :  { %4832 = vadd.xlane.f32.xlu0 %v4831_v51 }
 0xc05   :  { %5039 = vadd.xlane.f32.xlu0 %v5038_v32  ;;  %v10540_v32 = vld [vmem:[%s16156_s4 + $0x440] sm:$0xff] }
 0xc8e   :  { %v4833_v53 = vpop.xlane.xlu0 %4832 }
 0xc8f   :  { %v4834_v55 = vmul.f32 0.015625, %v4833_v53  ;;  %v10533_v53 = vld [vmem:[%s16156_s4 + $0x408] sm:$0xff] }
 0xc91   :  { %v4835_v56 = vsub.f32 %v4830_v50, %v4834_v55 }
 0xc92   :  { %v5040_v57 = vpop.xlane.xlu0 %5039 }
 0xc93   :  { %v5041_v58 = vmul.f32 0.015625, %v5040_v57  ;;  %v4836_v26 = vmul.f32 %v4835_v56, %v4835_v56 }
 0xc95   :  { %v5042_v62 = vsub.f32 %v5037_v52, %v5041_v58  ;;  %v4837_v63 = vsel %vm198_vm2, %v4836_v26, 0.0  ;;  %v10532_v52 = vld [vmem:[%s16156_s4 + $0x400] sm:$0xff] }
 0xc96   :  { %4838 = vadd.xlane.f32.xlu1 %v4837_v63  ;;  %v10597_v55 = vcombine.high %v10532_v52, %v10540_v32  ;;  %v10596_v57 = vcombine.low %v10532_v52, %v10540_v32  ;;  %v10556_v63 = vld [vmem:[%s16156_s4 + $0x4c0] sm:$0xff]  ;;  %v10559_v52 = vld [vmem:[%s16156_s4 + $0x4d8] sm:$0xff] }
 0xc97   :  { %v5043_v41 = vmul.f32 %v5042_v62, %v5042_v62 }
 0xc98   :  { %5564 = vmatprep.subr.bf16.mxu1 %v10597_v55 }
 0xc99   :  { %v5044_v5 = vsel %vm198_vm2, %v5043_v41, 0.0  ;;  %v10549_v41 = vld [vmem:[%s16156_s4 + $0x488] sm:$0xff] }
 0xc9a   :  { %5045 = vadd.xlane.f32.xlu1 %v5044_v5  ;;  %v10614_v49 = vcombine.low %v10549_v41, %v10557_v6  ;;  %v10615_v7 = vcombine.high %v10549_v41, %v10557_v6  ;;  %v10582_v6 = vld [vmem:[%s16156_s4 + $0x590] sm:$0xff] }
 0xd23   :  { %v4839_v54 = vpop.xlane.xlu1 %4838 }
 0xd24   :  { %v4840_v15 = vmul.f32 0.015625, %v4839_v54  ;;  %v10580_v54 = vld [vmem:[%s16156_s4 + $0x580] sm:$0xff] }
 0xd26   :  { %v4841_v16 = vadd.f32 1e-05, %v4840_v15  ;;  %v10588_v15 = vld [vmem:[%s16156_s4 + $0x5c0] sm:$0xff] }
 0xd27   :  { %v5046_v29 = vpop.xlane.xlu1 %5045 }
 0xd28   :  { %13078 = vrsqrt.f32 %v4841_v16  ;;  %v5047_v60 = vmul.f32 0.015625, %v5046_v29  ;;  %v10581_v16 = vld [vmem:[%s16156_s4 + $0x588] sm:$0xff]  ;;  %v10542_v29 = vld [vmem:[%s16156_s4 + $0x450] sm:$0xff] }
 0xd2a   :  { %v5048_v22 = vadd.f32 1e-05, %v5047_v60  ;;  %v10535_v60 = vld [vmem:[%s16156_s4 + $0x418] sm:$0xff] }
 0xd2c   :  { %13080 = vrsqrt.f32 %v5048_v22 }
 0xd32   :  { %v13079_v38 = vpop.eup %13078 }
 0xd33   :  { %v4843_v17 = vmul.f32 %v13079_v38, %v4835_v56  ;;  %v10541_v56 = vld [vmem:[%s16156_s4 + $0x448] sm:$0xff]  ;;  %v10645_v38 = vcombine.high %v10580_v54, %v10588_v15 }
 0xd34   :  { %v10598_v58 = vcombine.low %v10533_v53, %v10541_v56  ;;  %v10599_v26 = vcombine.high %v10533_v53, %v10541_v56  ;;  %v10566_v56 = vld [vmem:[%s16156_s4 + $0x510] sm:$0xff] }
 0xd35   :  { %v4849_v59 = vmul.f32 %v10521_v61, %v4843_v17  ;;  %v10589_v61 = vld [vmem:[%s16156_s4 + $0x5c8] sm:$0xff]  ;;  %v10644_v17 = vcombine.low %v10580_v54, %v10588_v15 }
 0xd36   :  { %v13081_v23 = vpop.eup %13080  ;;  %5605 = vmatprep.subr.bf16.mxu0 %v10599_v26  ;;  %v10575_v26 = vld [vmem:[%s16156_s4 + $0x558] sm:$0xff] }
 0xd37   :  { %v4855_v19 = vadd.f32 %v10522_v18, %v4849_v59  ;;  %v5050_v24 = vmul.f32 %v13081_v23, %v5042_v62  ;;  %v10548_v62 = vld [vmem:[%s16156_s4 + $0x480] sm:$0xff]  ;;  %5606 = vmatpush1.bf16.msra.mxu0 %v10598_v58  ;;  %v10646_v18 = vcombine.low %v10581_v16, %v10589_v61  ;;  %v10647_v59 = vcombine.high %v10581_v16, %v10589_v61  ;;  %v10567_v58 = vld [vmem:[%s16156_s4 + $0x518] sm:$0xff] }
 0xd38   :  { %v10613_v5 = vcombine.high %v10548_v62, %v10556_v63  ;;  %v10612_v20 = vcombine.low %v10548_v62, %v10556_v63  ;;  %5607 = vmatprep.subr.bf16.mxu0 %v10615_v7  ;;  %v10591_v7 = vld [vmem:[%s16156_s4 + $0x5d8] sm:$0xff]  ;;  %v10634_v8 = vcombine.low %v10567_v58, %v10575_v26  ;;  %v10552_v61 = vld [vmem:[%s16156_s4 + $0x4a0] sm:$0xff] }
 0xd39   :  { %12411 = vmatmul.mubr.msk.f32.vlgmr.msra.gmra.mrb[2].mxu1 %vm198_vm2, %v4855_v19  ;;  %v5056_v25 = vmul.f32 %v10528_v27, %v5050_v24  ;;  %v10534_v19 = vld [vmem:[%s16156_s4 + $0x410] sm:$0xff]  ;;  %v10543_v24 = vld [vmem:[%s16156_s4 + $0x458] sm:$0xff] }
 0xd3a   :  { %5596 = vmatprep.mubr.bf16.mxu1 %v13244_v11  ;;  %5565 = vmatpush1.bf16.msra.mxu1 %v10596_v57  ;;  %v10600_v22 = vcombine.low %v10534_v19, %v10542_v29  ;;  %v10601_v23 = vcombine.high %v10534_v19, %v10542_v29  ;;  %v10602_v27 = vcombine.low %v10535_v60, %v10543_v24  ;;  %v10574_v57 = vld [vmem:[%s16156_s4 + $0x550] sm:$0xff] }
 0xd3b   :  { %v5062_v45 = vadd.f32 %v10529_v36, %v5056_v25  ;;  %5566 = vmatprep.subr.bf16.mxu1 %v10613_v5  ;;  %5608 = vmatpush1.bf16.msra.mxu0 %v10614_v49  ;;  %v10603_v25 = vcombine.high %v10535_v60, %v10543_v24  ;;  %v10633_v41 = vcombine.high %v10566_v56, %v10574_v57  ;;  %v10583_v49 = vld [vmem:[%s16156_s4 + $0x598] sm:$0xff]  ;;  %v10576_v24 = vld [vmem:[%s16156_s4 + $0x560] sm:$0xff] }
 0xd3c   :  { %5609 = vmatprep.subr.bf16.mxu0 %v10631_v14  ;;  %v10635_v5 = vcombine.high %v10567_v58, %v10575_v26  ;;  %v10632_v35 = vcombine.low %v10566_v56, %v10574_v57  ;;  %v10545_v14 = vld [vmem:[%s16156_s4 + $0x468] sm:$0xff]  ;;  %v10650_v15 = vcombine.low %v10583_v49, %v10591_v7  ;;  %v10539_v56 = vld [vmem:[%s16156_s4 + $0x438] sm:$0xff] }
 0xd3d   :  { %v10547_v57 = vld [vmem:[%s16156_s4 + $0x478] sm:$0xff] }
 0xd3e   :  { %5567 = vmatpush1.bf16.msra.mxu1 %v10612_v20  ;;  %v10590_v20 = vld [vmem:[%s16156_s4 + $0x5d0] sm:$0xff] }
 0xd3f   :  { %5568 = vmatprep.subr.bf16.mxu1 %v10629_v10  ;;  %5610 = vmatpush1.bf16.msra.mxu0 %v10630_v13  ;;  %v10649_v9 = vcombine.high %v10582_v6, %v10590_v20  ;;  %v10651_v10 = vcombine.high %v10583_v49, %v10591_v7  ;;  %v10537_v13 = vld [vmem:[%s16156_s4 + $0x428] sm:$0xff]  ;;  %v10648_v54 = vcombine.low %v10582_v6, %v10590_v20  ;;  %v10555_v6 = vld [vmem:[%s16156_s4 + $0x4b8] sm:$0xff] }
 0xd40   :  { %5611 = vmatprep.subr.bf16.mxu0 %v10647_v59  ;;  %v10561_v59 = vld [vmem:[%s16156_s4 + $0x4e8] sm:$0xff]  ;;  %v10606_v29 = vcombine.low %v10537_v13, %v10545_v14  ;;  %v10563_v20 = vld [vmem:[%s16156_s4 + $0x4f8] sm:$0xff]  ;;  %v10610_v7 = vcombine.low %v10539_v56, %v10547_v57 }
 0xd42   :  { %5569 = vmatpush1.bf16.msra.mxu1 %v10628_v12  ;;  %v10544_v12 = vld [vmem:[%s16156_s4 + $0x460] sm:$0xff] }
 0xd43   :  { %5570 = vmatprep.subr.bf16.mxu1 %v10645_v38  ;;  %5612 = vmatpush1.bf16.msra.mxu0 %v10646_v18  ;;  %v10605_v16 = vcombine.high %v10536_v44, %v10544_v12  ;;  %v10607_v38 = vcombine.high %v10537_v13, %v10545_v14  ;;  %v10553_v18 = vld [vmem:[%s16156_s4 + $0x4a8] sm:$0xff]  ;;  %v10604_v19 = vcombine.low %v10536_v44, %v10544_v12  ;;  %v10571_v44 = vld [vmem:[%s16156_s4 + $0x538] sm:$0xff] }
 0xd44   :  { %5687 = vmatprep.subr.bf16.mxu0 %v10603_v25  ;;  %v10577_v25 = vld [vmem:[%s16156_s4 + $0x568] sm:$0xff]  ;;  %v10579_v12 = vld [vmem:[%s16156_s4 + $0x578] sm:$0xff]  ;;  %v10626_v14 = vcombine.low %v10555_v6, %v10563_v20 }
 0xd46   :  { %5571 = vmatpush1.bf16.msra.mxu1 %v10644_v17  ;;  %v10560_v17 = vld [vmem:[%s16156_s4 + $0x4e0] sm:$0xff] }
 0xd47   :  { %5646 = vmatprep.subr.bf16.mxu1 %v10601_v23  ;;  %v10621_v60 = vcombine.high %v10552_v61, %v10560_v17  ;;  %v10568_v23 = vld [vmem:[%s16156_s4 + $0x520] sm:$0xff] }
 0xe0c   :  { %v14787_v37 = vpop.f32.mrb[2].mxu1 }
 0xe0d   :  { %v4942_v39 = vadd.f32 %v10524_v28, %v14787_v37  ;;  %v12412_v40 = vpop.f32.mrb[3].mxu1 }
 0xe0f   :  { %v5063_v46 = vadd.f32 %v5062_v45, %v4942_v39  ;;  %v10530_v45 = vld [vmem:[#allocation8 + $0x13] ss:$0 sm:$0xff] }
 0xe11   :  { %v5064_v4 = vsel %vm198_vm2, %v5063_v46, 0.0 }
 0xe12   :  { %5065 = vadd.xlane.f32.xlu0 %v5064_v4  ;;  %v10531_v4 = vld [vmem:[#allocation8 + $0x14] ss:$0 sm:$0xff] }
 0xe9f   :  { %v5066_v47 = vpop.xlane.xlu0 %5065 }
 0xea0   :  { %v5067_v21 = vmul.f32 0.015625, %v5066_v47 }
 0xea2   :  { %v14791_v48 = vsub.f32 %v5063_v46, %v5067_v21  ;;  %v10550_v21 = vld [vmem:[%s16156_s4 + $0x490] sm:$0xff] }
 0xea4   :  { %v5069_v50 = vmul.f32 %v14791_v48, %v14791_v48 }
 0xea6   :  { %v5070_v51 = vsel %vm198_vm2, %v5069_v50, 0.0  ;;  %v10558_v50 = vld [vmem:[%s16156_s4 + $0x4d0] sm:$0xff] }
 0xea7   :  { %5071 = vadd.xlane.f32.xlu1 %v5070_v51  ;;  %v10551_v51 = vld [vmem:[%s16156_s4 + $0x498] sm:$0xff]  ;;  %v10617_v53 = vcombine.high %v10550_v21, %v10558_v50  ;;  %v10616_v62 = vcombine.low %v10550_v21, %v10558_v50  ;;  %v10636_v21 = vcombine.low %v10568_v23, %v10576_v24 }
 0xea8   :  { %v10619_v55 = vcombine.high %v10551_v51, %v10559_v52  ;;  %v10618_v63 = vcombine.low %v10551_v51, %v10559_v52 }
 0xf34   :  { %v5072_v28 = vpop.xlane.xlu1 %5071 }
 0xf35   :  { %v5073_v36 = vmul.f32 0.015625, %v5072_v28  ;;  %v10620_v28 = vcombine.low %v10552_v61, %v10560_v17  ;;  %v10587_v61 = vld [vmem:[%s16156_s4 + $0x5b8] sm:$0xff] }
 0xf36   :  { %v10595_v17 = vld [vmem:[%s16156_s4 + $0x5f8] sm:$0xff] }
 0xf37   :  { %v5074_v39 = vadd.f32 1e-05, %v5073_v36  ;;  %v10622_v36 = vcombine.low %v10553_v18, %v10561_v59 }
 0xf39   :  { %13082 = vrsqrt.f32 %v5074_v39  ;;  %v10637_v39 = vcombine.high %v10568_v23, %v10576_v24  ;;  %v12814_v23 = vld [vmem:[%s16157_s5 + $0x840] sm:$0xff]  }
 0xf3a   :  { %v12815_v24 = vld [vmem:[%s16157_s5 + $0x8c0] sm:$0xff]  }
 0xf43   :  { %v13083_v40 = vpop.eup %13082 }
 0xf44   :  { %v5076_v46 = vmul.f32 %v13083_v40, %v14791_v48 }
 0xf46   :  { %v5082_v47 = vmul.f32 %v10530_v45, %v5076_v46  ;;  %v10584_v45 = vld [vmem:[%s16156_s4 + $0x5a0] sm:$0xff] }
 0xf47   :  { %v10592_v46 = vld [vmem:[%s16156_s4 + $0x5e0] sm:$0xff] }
 0xf48   :  { %v14869_v32 = vadd.f32 %v10531_v4, %v5082_v47  ;;  %v10585_v4 = vld [vmem:[%s16156_s4 + $0x5a8] sm:$0xff]  ;;  %v10653_v51 = vcombine.high %v10584_v45, %v10592_v46  ;;  %v10652_v58 = vcombine.low %v10584_v45, %v10592_v46  ;;  %v12822_v45 = vld [vmem:[%s16157_s5 + $0x850] sm:$0xff]  }
 0xf49   :  { %v10593_v47 = vld [vmem:[%s16156_s4 + $0x5e8] sm:$0xff]  ;;  %v12824_v46 = vld [vmem:[%s16157_s5 + $0x810] sm:$0xff]  }
 0xf4a   :  { %v14873_v48 = vpack.c.bf16 %v14869_v32, %v14869_v32  ;;  %v10655_v52 = vcombine.high %v10585_v4, %v10593_v47  ;;  %v10654_v26 = vcombine.low %v10585_v4, %v10593_v47  ;;  %v12825_v4 = vld [vmem:[%s16157_s5 + $0x890] sm:$0xff]   ;;  %v12826_v47 = vld [vmem:[%s16157_s5 + $0x858] sm:$0xff]  }
 0xf4c   :  { %10660 = vmatmul.mubr.msk.bf16.vlgmr.msra.gmra.mrb[68].mxu1 %vm198_vm2, %v14873_v48  ;;  %10661 = vmatmul.mubr.msk.bf16.vlgmr.msra.gmra.mrb[72].mxu0 %vm198_vm2, %v14873_v48 }
 0xf4d   :  { %5647 = vmatpush1.bf16.msra.mxu1 %v10600_v22  ;;  %5688 = vmatpush1.bf16.msra.mxu0 %v10602_v27  ;;  %v10623_v22 = vcombine.high %v10553_v18, %v10561_v59  ;;  %v10569_v27 = vld [vmem:[%s16156_s4 + $0x528] sm:$0xff]  ;;  %v10642_v59 = vcombine.low %v10571_v44, %v10579_v12 }
 0xf4e   :  { %5648 = vmatprep.subr.bf16.mxu1 %v10617_v53  ;;  %5689 = vmatprep.subr.bf16.mxu0 %v10619_v55  ;;  %v10639_v40 = vcombine.high %v10569_v27, %v10577_v25  ;;  %v10638_v50 = vcombine.low %v10569_v27, %v10577_v25  ;;  %v10538_v53 = vld [vmem:[%s16156_s4 + $0x430] sm:$0xff]  ;;  %v12816_v27 = vld [vmem:[%s16157_s5 + $0x800] sm:$0xff]  }
 0xf4f   :  { %5678 = vmatprep.mubr.bf16.mxu1 %v13244_v11  ;;  %5719 = vmatprep.mubr.bf16.mxu0 %v13244_v11  ;;  %v10546_v55 = vld [vmem:[%s16156_s4 + $0x470] sm:$0xff]  ;;  %v12817_v25 = vld [vmem:[%s16157_s5 + $0x880] sm:$0xff]  }
 0xf50   :  { %v10608_v49 = vcombine.low %v10538_v53, %v10546_v55 }
 0xf51   :  { %5649 = vmatpush1.bf16.msra.mxu1 %v10616_v62  ;;  %5690 = vmatpush1.bf16.msra.mxu0 %v10618_v63  ;;  %v10609_v62 = vcombine.high %v10538_v53, %v10546_v55  ;;  %v10611_v63 = vcombine.high %v10539_v56, %v10547_v57  ;;  %v12831_v53 = vld [vmem:[%s16157_s5 + $0x8e0] sm:$0xff]   ;;  %v12834_v57 = vld [vmem:[%s16157_s5 + $0x868] sm:$0xff]  }
 0xf52   :  { %5650 = vmatprep.subr.bf16.mxu1 %v10633_v41  ;;  %5691 = vmatprep.subr.bf16.mxu0 %v10635_v5  ;;  %v10554_v41 = vld [vmem:[%s16156_s4 + $0x4b0] sm:$0xff]  ;;  %v12832_v55 = vld [vmem:[%s16157_s5 + $0x820] sm:$0xff]  }
 0xf53   :  { %v10562_v5 = vld [vmem:[%s16156_s4 + $0x4f0] sm:$0xff]  ;;  %v12833_v56 = vld [vmem:[%s16157_s5 + $0x8a0] sm:$0xff]  }
 0xf54   :  { %v10624_v13 = vcombine.low %v10554_v41, %v10562_v5 }
 0xf55   :  { %5651 = vmatpush1.bf16.msra.mxu1 %v10632_v35  ;;  %5692 = vmatpush1.bf16.msra.mxu0 %v10634_v8  ;;  %v10625_v35 = vcombine.high %v10554_v41, %v10562_v5  ;;  %v10627_v8 = vcombine.high %v10555_v6, %v10563_v20  ;;  %v12839_v41 = vld [vmem:[%s16157_s5 + $0x8f0] sm:$0xff]   ;;  %v12842_v20 = vld [vmem:[%s16157_s5 + $0x878] sm:$0xff]  }
 0xf56   :  { %5652 = vmatprep.subr.bf16.mxu1 %v10649_v9  ;;  %5693 = vmatprep.subr.bf16.mxu0 %v10651_v10  ;;  %v10570_v9 = vld [vmem:[%s16156_s4 + $0x530] sm:$0xff] }
 0xf57   :  { %v10578_v10 = vld [vmem:[%s16156_s4 + $0x570] sm:$0xff] }
 0xf58   :  { %v10640_v18 = vcombine.low %v10570_v9, %v10578_v10  ;;  %v12840_v5 = vld [vmem:[%s16157_s5 + $0x830] sm:$0xff]  }
 0xf59   :  { %5653 = vmatpush1.bf16.msra.mxu1 %v10648_v54  ;;  %5694 = vmatpush1.bf16.msra.mxu0 %v10650_v15  ;;  %v10641_v54 = vcombine.high %v10570_v9, %v10578_v10  ;;  %v10643_v15 = vcombine.high %v10571_v44, %v10579_v12  ;;  %v12841_v6 = vld [vmem:[%s16157_s5 + $0x8b0] sm:$0xff]   ;;  %v12847_v9 = vld [vmem:[%s16157_s5 + $0x9c0] sm:$0xff]  }
 0xf5a   :  { %5728 = vmatprep.subr.bf16.mxu1 %v10605_v16  ;;  %5769 = vmatprep.subr.bf16.mxu0 %v10607_v38  ;;  %v10586_v16 = vld [vmem:[%s16156_s4 + $0x5b0] sm:$0xff] }
 0xf5b   :  { %v10594_v38 = vld [vmem:[%s16156_s4 + $0x5f0] sm:$0xff] }
 0xf5c   :  { %10662 = vmatmul.mubr.msk.bf16.vlgmr.msra.gmra.mrb[72].mxu1 %vm198_vm2, %v14873_v48  ;;  %10663 = vmatmul.mubr.msk.bf16.vlgmr.msra.gmra.mrb[76].mxu0 %vm198_vm2, %v14873_v48  ;;  %v15119_v10 = vld [vmem:[#allocation7 + $0x2] ss:$4 sm:$0xff] }
 0xf5d   :  { %5729 = vmatpush1.bf16.msra.mxu1 %v10604_v19  ;;  %5770 = vmatpush1.bf16.msra.mxu0 %v10606_v29  ;;  %v10657_v19 = vcombine.high %v10586_v16, %v10594_v38  ;;  %v10659_v29 = vcombine.high %v10587_v61, %v10595_v17  ;;  %v5164_v44 = vrot.slane %v15119_v10, %v13738_v30 }
 0xf5e   :  { %5730 = vmatprep.subr.bf16.mxu1 %v10621_v60  ;;  %5771 = vmatprep.subr.bf16.mxu0 %v10623_v22  ;;  %v10656_v60 = vcombine.low %v10586_v16, %v10594_v38  ;;  %v10658_v22 = vcombine.low %v10587_v61, %v10595_v17  ;;  %v5172_v12 = vrot.slane %v15119_v10, %v13741_v31 }
 0xf5f   :  { %5760 = vmatprep.mubr.bf16.mxu1 %v13244_v11  ;;  %5801 = vmatprep.mubr.bf16.mxu0 %v13244_v11 }
 0xf61   :  { %5731 = vmatpush1.bf16.msra.mxu1 %v10620_v28  ;;  %5772 = vmatpush1.bf16.msra.mxu0 %v10622_v36  ;;  %v12818_v28 = vld [vmem:[%s16157_s5 + $0x848] sm:$0xff]  }
 0xf62   :  { %5732 = vmatprep.subr.bf16.mxu1 %v10637_v39  ;;  %5773 = vmatprep.subr.bf16.mxu0 %v10639_v40  ;;  %v12819_v36 = vld [vmem:[%s16157_s5 + $0x8c8] sm:$0xff]  }
 0xf63   :  { %v12820_v39 = vld [vmem:[%s16157_s5 + $0x808] sm:$0xff]  }
 0xf64   :  { %v12821_v40 = vld [vmem:[%s16157_s5 + $0x888] sm:$0xff]  }
 0xf65   :  { %5733 = vmatpush1.bf16.msra.mxu1 %v10636_v21  ;;  %5774 = vmatpush1.bf16.msra.mxu0 %v10638_v50  ;;  %v12827_v21 = vld [vmem:[%s16157_s5 + $0x8d8] sm:$0xff]  }
 0xf66   :  { %5734 = vmatprep.subr.bf16.mxu1 %v10653_v51  ;;  %5775 = vmatprep.subr.bf16.mxu0 %v10655_v52  ;;  %v12828_v50 = vld [vmem:[%s16157_s5 + $0x818] sm:$0xff]   ;;  %v12830_v52 = vld [vmem:[%s16157_s5 + $0x860] sm:$0xff]  }
 0xf67   :  { %v12829_v51 = vld [vmem:[%s16157_s5 + $0x898] sm:$0xff]  }
 0xf69   :  { %5735 = vmatpush1.bf16.msra.mxu1 %v10652_v58  ;;  %5776 = vmatpush1.bf16.msra.mxu0 %v10654_v26  ;;  %v12835_v58 = vld [vmem:[%s16157_s5 + $0x8e8] sm:$0xff]  }
 0xf6a   :  { %5810 = vmatprep.subr.bf16.mxu1 %v10609_v62  ;;  %5851 = vmatprep.subr.bf16.mxu0 %v10611_v63  ;;  %v12836_v26 = vld [vmem:[%s16157_s5 + $0x828] sm:$0xff]   ;;  %v12838_v63 = vld [vmem:[%s16157_s5 + $0x870] sm:$0xff]  }
 0xf6b   :  { %v12837_v62 = vld [vmem:[%s16157_s5 + $0x8a8] sm:$0xff]  }
 0xf6c   :  { %10664 = vmatmul.mubr.msk.bf16.vlgmr.msra.gmra.mrb[76].mxu1 %vm198_vm2, %v14873_v48  ;;  %10665 = vmatmul.mubr.msk.bf16.vlgmr.msra.gmra.mrb[80].mxu0 %vm198_vm2, %v14873_v48 }
 0xf6d   :  { %5811 = vmatpush1.bf16.msra.mxu1 %v10608_v49  ;;  %5852 = vmatpush1.bf16.msra.mxu0 %v10610_v7  ;;  %v12843_v49 = vld [vmem:[%s16157_s5 + $0x8f8] sm:$0xff]  }
 0xf6e   :  { %5812 = vmatprep.subr.bf16.mxu1 %v10625_v35  ;;  %5853 = vmatprep.subr.bf16.mxu0 %v10627_v8  ;;  %v12844_v7 = vld [vmem:[%s16157_s5 + $0x838] sm:$0xff]   ;;  %v12846_v8 = vld [vmem:[%s16157_s5 + $0x940] sm:$0xff]  }
 0xf6f   :  { %5842 = vmatprep.mubr.bf16.mxu1 %v13244_v11  ;;  %5883 = vmatprep.mubr.bf16.mxu0 %v13244_v11  ;;  %v12845_v35 = vld [vmem:[%s16157_s5 + $0x8b8] sm:$0xff]  }
 0xf71   :  { %5813 = vmatpush1.bf16.msra.mxu1 %v10624_v13  ;;  %5854 = vmatpush1.bf16.msra.mxu0 %v10626_v14  ;;  %v5168_v13 = vrot.slane %v15119_v10, %v13746_v33  ;;  %v5176_v14 = vrot.slane %v15119_v10, %v13749_v34 }
 0xf72   :  { %5814 = vmatprep.subr.bf16.mxu1 %v10641_v54  ;;  %5855 = vmatprep.subr.bf16.mxu0 %v10643_v15 }
 0xf75   :  { %5815 = vmatpush1.bf16.msra.mxu1 %v10640_v18  ;;  %5856 = vmatpush1.bf16.msra.mxu0 %v10642_v59 }
 0xf76   :  { %5816 = vmatprep.subr.bf16.mxu1 %v10657_v19  ;;  %5857 = vmatprep.subr.bf16.mxu0 %v10659_v29 }
 0xf79   :  { %5817 = vmatpush1.bf16.msra.mxu1 %v10656_v60  ;;  %5858 = vmatpush1.bf16.msra.mxu0 %v10658_v22 }
 0xf7a   :  { %11979 = vmatprep.subr.bf16.mxu1 %v12814_v23  ;;  %12001 = vmatprep.subr.bf16.mxu0 %v12815_v24 }
 0xf7c   :  { %10666 = vmatmul.mubr.msk.bf16.vlgmr.msra.gmra.mrb[80].mxu1 %vm198_vm2, %v14873_v48  ;;  %10667 = vmatmul.mubr.msk.bf16.vlgmr.msra.gmra.mrb[84].mxu0 %vm198_vm2, %v14873_v48  ;;  %v12823_v48 = vld [vmem:[%s16157_s5 + $0x8d0] sm:$0xff]  }
 0xf7d   :  { %11980 = vmatpush3.bf16.msra.mxu1 %v12816_v27  ;;  %12002 = vmatpush3.bf16.msra.mxu0 %v12817_v25 }
 0xf7e   :  { %11981 = vmatprep.subr.bf16.mxu1 %v12818_v28  ;;  %12003 = vmatprep.subr.bf16.mxu0 %v12819_v36 }
 0xf81   :  { %11982 = vmatpush3.bf16.msra.mxu1 %v12820_v39  ;;  %12004 = vmatpush3.bf16.msra.mxu0 %v12821_v40  ;;  %v12848_v39 = vld [vmem:[%s16157_s5 + $0x900] sm:$0xff]  }
 0xf82   :  { %11983 = vmatprep.subr.bf16.mxu1 %v12822_v45  ;;  %12005 = vmatprep.subr.bf16.mxu0 %v12823_v48  ;;  %v12849_v40 = vld [vmem:[%s16157_s5 + $0x980] sm:$0xff]  }
 0xf85   :  { %11984 = vmatpush3.bf16.msra.mxu1 %v12824_v46  ;;  %12006 = vmatpush3.bf16.msra.mxu0 %v12825_v4  ;;  %v12850_v46 = vld [vmem:[%s16157_s5 + $0x948] sm:$0xff]  }
 0xf86   :  { %11985 = vmatprep.subr.bf16.mxu1 %v12826_v47  ;;  %12007 = vmatprep.subr.bf16.mxu0 %v12827_v21  ;;  %v12851_v4 = vld [vmem:[%s16157_s5 + $0x9c8] sm:$0xff]  }
 0xf87   :  { %v12852_v47 = vld [vmem:[%s16157_s5 + $0x908] sm:$0xff]  }
 0xf88   :  { %v12853_v21 = vld [vmem:[%s16157_s5 + $0x988] sm:$0xff]  }
 0xf89   :  { %11986 = vmatpush3.bf16.msra.mxu1 %v12828_v50  ;;  %12008 = vmatpush3.bf16.msra.mxu0 %v12829_v51  ;;  %v12854_v50 = vld [vmem:[%s16157_s5 + $0x950] sm:$0xff]  }
 0xf8a   :  { %11987 = vmatprep.subr.bf16.mxu1 %v12830_v52  ;;  %12009 = vmatprep.subr.bf16.mxu0 %v12831_v53  ;;  %v12855_v51 = vld [vmem:[%s16157_s5 + $0x9d0] sm:$0xff]   ;;  %v5184_v52 = vrot.slane %v15119_v10, %v13778_v2  ;;  %v5192_v53 = vrot.slane %v15119_v10, %v13781_v3 }
 0xf8d   :  { %11988 = vmatpush3.bf16.msra.mxu1 %v12832_v55  ;;  %12010 = vmatpush3.bf16.msra.mxu0 %v12833_v56  ;;  %v12856_v55 = vld [vmem:[%s16157_s5 + $0x910] sm:$0xff]  }
 0xf8e   :  { %11989 = vmatprep.subr.bf16.mxu1 %v12834_v57  ;;  %12011 = vmatprep.subr.bf16.mxu0 %v12835_v58  ;;  %v12857_v56 = vld [vmem:[%s16157_s5 + $0x990] sm:$0xff]   ;;  %v12858_v57 = vld [vmem:[%s16157_s5 + $0x958] sm:$0xff]  }
 0xf8f   :  { %v12859_v58 = vld [vmem:[%s16157_s5 + $0x9d8] sm:$0xff]  }
 0xf91   :  { %11990 = vmatpush3.bf16.msra.mxu1 %v12836_v26  ;;  %12012 = vmatpush3.bf16.msra.mxu0 %v12837_v62 }
 0xf92   :  { %11991 = vmatprep.subr.bf16.mxu1 %v12838_v63  ;;  %12013 = vmatprep.subr.bf16.mxu0 %v12839_v41 }
 0xf95   :  { %11992 = vmatpush3.bf16.msra.mxu1 %v12840_v5  ;;  %12014 = vmatpush3.bf16.msra.mxu0 %v12841_v6 }
 0xf96   :  { %11993 = vmatprep.subr.bf16.mxu1 %v12842_v20  ;;  %12015 = vmatprep.subr.bf16.mxu0 %v12843_v49 }
 0xf99   :  { %11994 = vmatpush3.bf16.msra.mxu1 %v12844_v7  ;;  %12016 = vmatpush3.bf16.msra.mxu0 %v12845_v35  ;;  %v12860_v7 = vld [vmem:[%s16157_s5 + $0x918] sm:$0xff]  }
 0xf9a   :  { %12023 = vmatprep.subr.bf16.mxu1 %v12846_v8  ;;  %12045 = vmatprep.subr.bf16.mxu0 %v12847_v9  ;;  %v12861_v35 = vld [vmem:[%s16157_s5 + $0x998] sm:$0xff]  }
0x101f   :  { %v5598_v54 = vpop.f32.mrb[68].mxu1  ;;  %v5639_v15 = vpop.f32.mrb[72].mxu0 }
0x1020   :  { %v5599_v16 = vadd.f32 %v5598_v54, %v5164_v44  ;;  %v5640_v38 = vadd.f32 %v5639_v15, %v5172_v12  ;;  %v5600_v61 = vpop.f32.mrb[69].mxu1  ;;  %v5641_v17 = vpop.f32.mrb[73].mxu0  ;;  %v12862_v44 = vld [vmem:[%s16157_s5 + $0x960] sm:$0xff]  }
0x1021   :  { %v5601_v18 = vadd.f32 %v5600_v61, %v5168_v13  ;;  %v5642_v59 = vadd.f32 %v5641_v17, %v5176_v14  ;;  %v5602_v19 = vpop.f32.mrb[70].mxu1  ;;  %v5643_v29 = vpop.f32.mrb[74].mxu0  ;;  %v12863_v12 = vld [vmem:[%s16157_s5 + $0x9e0] sm:$0xff]   ;;  %v12866_v61 = vld [vmem:[%s16157_s5 + $0x968] sm:$0xff]  }
0x1022   :  { %v5892_v60 = vmax.f32 %v5599_v16, 0.0  ;;  %v5894_v22 = vmax.f32 %v5640_v38, 0.0  ;;  %v5603_v23 = vpop.f32.mrb[71].mxu1  ;;  %v5644_v24 = vpop.f32.mrb[75].mxu0  ;;  %v12864_v16 = vld [vmem:[%s16157_s5 + $0x920] sm:$0xff]   ;;  %v12867_v17 = vld [vmem:[%s16157_s5 + $0x9e8] sm:$0xff]   ;;  %v5180_v19 = vrot.slane %v15119_v10, %v13824_v42  ;;  %v5188_v29 = vrot.slane %v15119_v10, %v13827_v43 }
0x1023   :  { %v5893_v27 = vmax.f32 %v5601_v18, 0.0  ;;  %v5895_v25 = vmax.f32 %v5642_v59, 0.0  ;;  %v12865_v38 = vld [vmem:[%s16157_s5 + $0x9a0] sm:$0xff]   ;;  %v12868_v18 = vld [vmem:[%s16157_s5 + $0x928] sm:$0xff]   ;;  %v12871_v23 = vld [vmem:[%s16157_s5 + $0x9f0] sm:$0xff]  }
0x1024   :  { %v5908_v45 = vpack.c.bf16 %v5892_v60, %v5892_v60  ;;  %v5910_v48 = vpack.c.bf16 %v5894_v22, %v5894_v22  ;;  %v12869_v59 = vld [vmem:[%s16157_s5 + $0x9a8] sm:$0xff]   ;;  %v12870_v22 = vld [vmem:[%s16157_s5 + $0x970] sm:$0xff]  }
0x1025   :  { %v5909_v28 = vpack.c.bf16 %v5893_v27, %v5893_v27  ;;  %v5911_v36 = vpack.c.bf16 %v5895_v25, %v5895_v25  ;;  %v15203_v60 = vld [vmem:[#allocation7 + $0x22] ss:$4 sm:$0xff] }
0x1026   :  { %v5200_v24 = vrot.slane %v15203_v60, %v13746_v33  ;;  %v5208_v10 = vrot.slane %v15203_v60, %v13749_v34  ;;  %v12872_v27 = vld [vmem:[%s16157_s5 + $0x930] sm:$0xff]  }
0x1027   :  { %6986 = vmatprep.mubr.bf16.mxu1 %v5909_v28  ;;  %7026 = vmatprep.mubr.bf16.mxu0 %v5911_v36  ;;  %v12873_v25 = vld [vmem:[%s16157_s5 + $0x9b0] sm:$0xff]  }
0x1028   :  { %6987 = vmatmul.mubr.bf16.vlgmr.msra.gmra.mrb[84].mxu1 %v5908_v45  ;;  %7027 = vmatmul.mubr.bf16.vlgmr.msra.gmra.mrb[88].mxu0 %v5910_v48 }
0x1029   :  { %12024 = vmatpush3.bf16.msra.mxu1 %v12848_v39  ;;  %12046 = vmatpush3.bf16.msra.mxu0 %v12849_v40  ;;  %v12874_v39 = vld [vmem:[%s16157_s5 + $0x978] sm:$0xff]  }
0x102a   :  { %12025 = vmatprep.subr.bf16.mxu1 %v12850_v46  ;;  %12047 = vmatprep.subr.bf16.mxu0 %v12851_v4  ;;  %v12875_v40 = vld [vmem:[%s16157_s5 + $0x9f8] sm:$0xff]  }
0x102d   :  { %12026 = vmatpush3.bf16.msra.mxu1 %v12852_v47  ;;  %12048 = vmatpush3.bf16.msra.mxu0 %v12853_v21 }
0x102e   :  { %12027 = vmatprep.subr.bf16.mxu1 %v12854_v50  ;;  %12049 = vmatprep.subr.bf16.mxu0 %v12855_v51 }
0x102f   :  { %v5680_v26 = vpop.f32.mrb[72].mxu1  ;;  %v5721_v62 = vpop.f32.mrb[76].mxu0 }
0x1030   :  { %v5682_v63 = vpop.f32.mrb[73].mxu1  ;;  %v5723_v41 = vpop.f32.mrb[77].mxu0  ;;  %v5681_v28 = vadd.f32 %v5680_v26, %v5180_v19  ;;  %v5722_v36 = vadd.f32 %v5721_v62, %v5188_v29  ;;  %v12878_v26 = vld [vmem:[%s16157_s5 + $0xa40] sm:$0xff]  }
0x1031   :  { %v5683_v5 = vadd.f32 %v5682_v63, %v5184_v52  ;;  %v5724_v6 = vadd.f32 %v5723_v41, %v5192_v53  ;;  %v5684_v20 = vpop.f32.mrb[74].mxu1  ;;  %v5725_v49 = vpop.f32.mrb[78].mxu0  ;;  %12028 = vmatpush3.bf16.msra.mxu1 %v12856_v55  ;;  %12050 = vmatpush3.bf16.msra.mxu0 %v12857_v56  ;;  %v12876_v52 = vld [vmem:[%s16157_s5 + $0x938] sm:$0xff]   ;;  %v12879_v62 = vld [vmem:[%s16157_s5 + $0xac0] sm:$0xff]  }
0x1032   :  { %v5685_v8 = vpop.f32.mrb[75].mxu1  ;;  %v5726_v9 = vpop.f32.mrb[79].mxu0  ;;  %12029 = vmatprep.subr.bf16.mxu1 %v12858_v57  ;;  %12051 = vmatprep.subr.bf16.mxu0 %v12859_v58  ;;  %v12877_v53 = vld [vmem:[%s16157_s5 + $0x9b8] sm:$0xff]   ;;  %v5896_v55 = vmax.f32 %v5681_v28, 0.0  ;;  %v5898_v56 = vmax.f32 %v5722_v36, 0.0  ;;  %v12881_v49 = vld [vmem:[%s16157_s5 + $0xa80] sm:$0xff]  }
0x1033   :  { %v5897_v13 = vmax.f32 %v5683_v5, 0.0  ;;  %v5899_v14 = vmax.f32 %v5724_v6, 0.0  ;;  %v12880_v5 = vld [vmem:[%s16157_s5 + $0xa00] sm:$0xff]   ;;  %v12883_v8 = vld [vmem:[%s16157_s5 + $0xac8] sm:$0xff]  }
0x1034   :  { %v5912_v6 = vpack.c.bf16 %v5896_v55, %v5896_v55  ;;  %v5914_v20 = vpack.c.bf16 %v5898_v56, %v5898_v56  ;;  %v12894_v28 = vld [vmem:[%s16157_s5 + $0xa60] sm:$0xff]   ;;  %v5216_v55 = vrot.slane %v15203_v60, %v13778_v2  ;;  %v5224_v56 = vrot.slane %v15203_v60, %v13781_v3 }
0x1035   :  { %v5913_v54 = vpack.c.bf16 %v5897_v13, %v5897_v13  ;;  %v5915_v15 = vpack.c.bf16 %v5899_v14, %v5899_v14  ;;  %12030 = vmatpush3.bf16.msra.mxu1 %v12860_v7  ;;  %12052 = vmatpush3.bf16.msra.mxu0 %v12861_v35  ;;  %v12882_v35 = vld [vmem:[%s16157_s5 + $0xa48] sm:$0xff]   ;;  %v12886_v13 = vld [vmem:[%s16157_s5 + $0xa50] sm:$0xff]   ;;  %v12895_v36 = vld [vmem:[%s16157_s5 + $0xae0] sm:$0xff]  }
0x1036   :  { %12031 = vmatprep.subr.bf16.mxu1 %v12862_v44  ;;  %12053 = vmatprep.subr.bf16.mxu0 %v12863_v12  ;;  %v12884_v44 = vld [vmem:[%s16157_s5 + $0xa08] sm:$0xff]   ;;  %v12887_v14 = vld [vmem:[%s16157_s5 + $0xad0] sm:$0xff]  }
0x1037   :  { %7066 = vmatprep.mubr.bf16.mxu1 %v5913_v54  ;;  %7106 = vmatprep.mubr.bf16.mxu0 %v5915_v15  ;;  %v12885_v12 = vld [vmem:[%s16157_s5 + $0xa88] sm:$0xff]   ;;  %v5220_v54 = vrot.slane %v15203_v60, %v13827_v43  ;;  %v12888_v15 = vld [vmem:[%s16157_s5 + $0xa10] sm:$0xff]  }
0x1039   :  { %12032 = vmatpush3.bf16.msra.mxu1 %v12864_v16  ;;  %12054 = vmatpush3.bf16.msra.mxu0 %v12865_v38  ;;  %v12889_v16 = vld [vmem:[%s16157_s5 + $0xa90] sm:$0xff]   ;;  %v12890_v38 = vld [vmem:[%s16157_s5 + $0xa58] sm:$0xff]  }
0x103a   :  { %12033 = vmatprep.subr.bf16.mxu1 %v12866_v61  ;;  %12055 = vmatprep.subr.bf16.mxu0 %v12867_v17 }
0x103d   :  { %12034 = vmatpush3.bf16.msra.mxu1 %v12868_v18  ;;  %12056 = vmatpush3.bf16.msra.mxu0 %v12869_v59  ;;  %v12891_v18 = vld [vmem:[%s16157_s5 + $0xad8] sm:$0xff]  }
0x103e   :  { %12035 = vmatprep.subr.bf16.mxu1 %v12870_v22  ;;  %12057 = vmatprep.subr.bf16.mxu0 %v12871_v23 }
0x103f   :  { %v15227_v45 = vpop.f32.mrb[76].mxu1  ;;  %v15229_v48 = vpop.f32.mrb[80].mxu0 }
0x1040   :  { %v5764_v46 = vpop.f32.mrb[77].mxu1  ;;  %v5805_v4 = vpop.f32.mrb[81].mxu0 }
0x1041   :  { %v5765_v47 = vadd.f32 %v5764_v46, %v5200_v24  ;;  %v5806_v21 = vadd.f32 %v5805_v4, %v5208_v10  ;;  %v5766_v50 = vpop.f32.mrb[78].mxu1  ;;  %v5807_v51 = vpop.f32.mrb[82].mxu0  ;;  %12036 = vmatpush3.bf16.msra.mxu1 %v12872_v27  ;;  %12058 = vmatpush3.bf16.msra.mxu0 %v12873_v25  ;;  %v12892_v24 = vld [vmem:[%s16157_s5 + $0xa18] sm:$0xff]   ;;  %v12898_v46 = vld [vmem:[%s16157_s5 + $0xa68] sm:$0xff]  }
0x1042   :  { %v5767_v57 = vpop.f32.mrb[79].mxu1  ;;  %v5808_v58 = vpop.f32.mrb[83].mxu0  ;;  %12037 = vmatprep.subr.bf16.mxu1 %v12874_v39  ;;  %12059 = vmatprep.subr.bf16.mxu0 %v12875_v40  ;;  %v12893_v25 = vld [vmem:[%s16157_s5 + $0xa98] sm:$0xff]   ;;  %v12896_v39 = vld [vmem:[%s16157_s5 + $0xa20] sm:$0xff]   ;;  %v12899_v4 = vld [vmem:[%s16157_s5 + $0xae8] sm:$0xff]  }
0x1043   :  { %v5901_v63 = vmax.f32 %v5765_v47, 0.0  ;;  %v5903_v41 = vmax.f32 %v5806_v21, 0.0  ;;  %v12897_v40 = vld [vmem:[%s16157_s5 + $0xaa0] sm:$0xff]   ;;  %v12900_v47 = vld [vmem:[%s16157_s5 + $0xa28] sm:$0xff]   ;;  %v5196_v21 = vrot.slane %v15203_v60, %v13738_v30  ;;  %v12902_v51 = vld [vmem:[%s16157_s5 + $0xa70] sm:$0xff]  }
0x1044   :  { %v12901_v50 = vld [vmem:[%s16157_s5 + $0xaa8] sm:$0xff]   ;;  %v12904_v57 = vld [vmem:[%s16157_s5 + $0xa30] sm:$0xff]  }
0x1045   :  { %12038 = vmatpush3.bf16.msra.mxu1 %v12876_v52  ;;  %12060 = vmatpush3.bf16.msra.mxu0 %v12877_v53  ;;  %v5917_v7 = vpack.c.bf16 %v5901_v63, %v5901_v63  ;;  %v5919_v9 = vpack.c.bf16 %v5903_v41, %v5903_v41  ;;  %v5204_v52 = vrot.slane %v15203_v60, %v13741_v31  ;;  %v12903_v53 = vld [vmem:[%s16157_s5 + $0xaf0] sm:$0xff]   ;;  %v12907_v41 = vld [vmem:[%s16157_s5 + $0xaf8] sm:$0xff]  }
0x1046   :  { %12067 = vmatprep.subr.bf16.mxu1 %v12878_v26  ;;  %12089 = vmatprep.subr.bf16.mxu0 %v12879_v62  ;;  %v5763_v58 = vadd.f32 %v15227_v45, %v5196_v21  ;;  %v12905_v26 = vld [vmem:[%s16157_s5 + $0xab0] sm:$0xff]   ;;  %v12906_v62 = vld [vmem:[%s16157_s5 + $0xa78] sm:$0xff]   ;;  %v5212_v21 = vrot.slane %v15203_v60, %v13824_v42 }
0x1047   :  { %v5804_v63 = vadd.f32 %v15229_v48, %v5204_v52  ;;  %v12908_v45 = vld [vmem:[%s16157_s5 + $0xa38] sm:$0xff]   ;;  %v12910_v48 = vld [vmem:[%s16157_s5 + $0xb40] sm:$0xff]   ;;  %v12935_v52 = vld [vmem:[%s16157_s5 + $0xbf0] sm:$0xff]  }
0x1048   :  { %7067 = vmatmul.mubr.bf16.vlgmr.msra.gmra.mrb[88].mxu1 %v5912_v6  ;;  %7107 = vmatmul.mubr.bf16.vlgmr.msra.gmra.mrb[92].mxu0 %v5914_v20  ;;  %v5900_v20 = vmax.f32 %v5763_v58, 0.0  ;;  %v12936_v60 = vld [vmem:[%s16157_s5 + $0xb30] sm:$0xff]  }
0x1049   :  { %12068 = vmatpush3.bf16.msra.mxu1 %v12880_v5  ;;  %7146 = vmatprep.mubr.bf16.mxu1 %v5917_v7  ;;  %v5902_v7 = vmax.f32 %v5804_v63, 0.0 }
0x104a   :  { %12090 = vmatpush3.bf16.msra.mxu0 %v12881_v49  ;;  %7186 = vmatprep.mubr.bf16.mxu0 %v5919_v9  ;;  %v12909_v49 = vld [vmem:[%s16157_s5 + $0xab8] sm:$0xff]  }
0x104b   :  { %12069 = vmatprep.subr.bf16.mxu1 %v12882_v35  ;;  %12091 = vmatprep.subr.bf16.mxu0 %v12883_v8  ;;  %v12911_v35 = vld [vmem:[%s16157_s5 + $0xbc0] sm:$0xff]  }
0x104d   :  { %12070 = vmatpush3.bf16.msra.mxu1 %v12884_v44  ;;  %v12912_v44 = vld [vmem:[%s16157_s5 + $0xb00] sm:$0xff]  }
0x104e   :  { %12092 = vmatpush3.bf16.msra.mxu0 %v12885_v12  ;;  %12071 = vmatprep.subr.bf16.mxu1 %v12886_v13  ;;  %v5916_v12 = vpack.c.bf16 %v5900_v20, %v5900_v20  ;;  %v12913_v13 = vld [vmem:[%s16157_s5 + $0xb80] sm:$0xff]  }
0x104f   :  { %v15278_v61 = vpop.f32.mrb[80].mxu1  ;;  %v5885_v17 = vpop.f32.mrb[84].mxu0  ;;  %12093 = vmatprep.subr.bf16.mxu0 %v12887_v14  ;;  %v5918_v14 = vpack.c.bf16 %v5902_v7, %v5902_v7 }
0x1050   :  { %v15283_v59 = vadd.f32 %v5885_v17, %v5220_v54  ;;  %v5846_v19 = vpop.f32.mrb[81].mxu1  ;;  %v5887_v29 = vpop.f32.mrb[85].mxu0  ;;  %v12914_v54 = vld [vmem:[%s16157_s5 + $0xb48] sm:$0xff]  }
0x1051   :  { %v5848_v22 = vpop.f32.mrb[82].mxu1  ;;  %v5889_v23 = vpop.f32.mrb[86].mxu0  ;;  %12072 = vmatpush3.bf16.msra.mxu1 %v12888_v15  ;;  %v5847_v5 = vadd.f32 %v5846_v19, %v5216_v55  ;;  %v5888_v6 = vadd.f32 %v5887_v29, %v5224_v56  ;;  %v12916_v17 = vld [vmem:[%s16157_s5 + $0xb08] sm:$0xff]   ;;  %v12918_v19 = vld [vmem:[%s16157_s5 + $0xb50] sm:$0xff]   ;;  %v12938_v56 = vld [vmem:[%s16157_s5 + $0xb78] sm:$0xff]  }
0x1052   :  { %12094 = vmatpush3.bf16.msra.mxu0 %v12889_v16  ;;  %v5849_v10 = vpop.f32.mrb[83].mxu1  ;;  %v5890_v27 = vpop.f32.mrb[87].mxu0  ;;  %12073 = vmatprep.subr.bf16.mxu1 %v12890_v38  ;;  %v12915_v16 = vld [vmem:[%s16157_s5 + $0xbc8] sm:$0xff]   ;;  %v12919_v29 = vld [vmem:[%s16157_s5 + $0xbd0] sm:$0xff]  }
0x1053   :  { %12095 = vmatprep.subr.bf16.mxu0 %v12891_v18  ;;  %v5905_v8 = vmax.f32 %v5847_v5, 0.0  ;;  %v5907_v9 = vmax.f32 %v5888_v6, 0.0  ;;  %v12917_v18 = vld [vmem:[%s16157_s5 + $0xb88] sm:$0xff]   ;;  %v12920_v22 = vld [vmem:[%s16157_s5 + $0xb10] sm:$0xff]   ;;  %v12923_v10 = vld [vmem:[%s16157_s5 + $0xbd8] sm:$0xff]  }
0x1054   :  { %v12921_v23 = vld [vmem:[%s16157_s5 + $0xb90] sm:$0xff]   ;;  %v12924_v27 = vld [vmem:[%s16157_s5 + $0xb18] sm:$0xff]  }
0x1055   :  { %12074 = vmatpush3.bf16.msra.mxu1 %v12892_v24  ;;  %v5921_v15 = vpack.c.bf16 %v5905_v8, %v5905_v8  ;;  %v5923_v38 = vpack.c.bf16 %v5907_v9, %v5907_v9  ;;  %v12922_v24 = vld [vmem:[%s16157_s5 + $0xb58] sm:$0xff]   ;;  %v12937_v55 = vld [vmem:[%s16157_s5 + $0xbb0] sm:$0xff]  }
0x1056   :  { %12096 = vmatpush3.bf16.msra.mxu0 %v12893_v25  ;;  %12075 = vmatprep.subr.bf16.mxu1 %v12894_v28  ;;  %v12925_v25 = vld [vmem:[%s16157_s5 + $0xb98] sm:$0xff]   ;;  %v12926_v28 = vld [vmem:[%s16157_s5 + $0xb60] sm:$0xff]  }
0x1057   :  { %12097 = vmatprep.subr.bf16.mxu0 %v12895_v36  ;;  %v12927_v36 = vld [vmem:[%s16157_s5 + $0xbe0] sm:$0xff]  }
0x1059   :  { %12076 = vmatpush3.bf16.msra.mxu1 %v12896_v39  ;;  %v12928_v39 = vld [vmem:[%s16157_s5 + $0xb20] sm:$0xff]  }
0x105a   :  { %12098 = vmatpush3.bf16.msra.mxu0 %v12897_v40  ;;  %12077 = vmatprep.subr.bf16.mxu1 %v12898_v46  ;;  %v12929_v40 = vld [vmem:[%s16157_s5 + $0xba0] sm:$0xff]   ;;  %v12930_v46 = vld [vmem:[%s16157_s5 + $0xb68] sm:$0xff]  }
0x105b   :  { %12099 = vmatprep.subr.bf16.mxu0 %v12899_v4  ;;  %v12931_v4 = vld [vmem:[%s16157_s5 + $0xbe8] sm:$0xff]  }
0x105d   :  { %12078 = vmatpush3.bf16.msra.mxu1 %v12900_v47  ;;  %v12932_v47 = vld [vmem:[%s16157_s5 + $0xb28] sm:$0xff]  }
0x105e   :  { %12100 = vmatpush3.bf16.msra.mxu0 %v12901_v50  ;;  %12079 = vmatprep.subr.bf16.mxu1 %v12902_v51  ;;  %v12933_v50 = vld [vmem:[%s16157_s5 + $0xba8] sm:$0xff]   ;;  %v12934_v51 = vld [vmem:[%s16157_s5 + $0xb70] sm:$0xff]  }
0x105f   :  { %12101 = vmatprep.subr.bf16.mxu0 %v12903_v53  ;;  %v5845_v53 = vadd.f32 %v15278_v61, %v5212_v21  ;;  %v12940_v61 = vld [vmem:[%s16157_s5 + $0xb38] sm:$0xff]  }
0x1061   :  { %12080 = vmatpush3.bf16.msra.mxu1 %v12904_v57  ;;  %v12939_v57 = vld [vmem:[%s16157_s5 + $0xbf8] sm:$0xff]   ;;  %v5904_v58 = vmax.f32 %v5845_v53, 0.0 }
0x1062   :  { %12102 = vmatpush3.bf16.msra.mxu0 %v12905_v26  ;;  %12081 = vmatprep.subr.bf16.mxu1 %v12906_v62  ;;  %v12941_v26 = vld [vmem:[%s16157_s5 + $0xbb8] sm:$0xff]   ;;  %v5906_v62 = vmax.f32 %v15283_v59, 0.0 }
0x1063   :  { %12103 = vmatprep.subr.bf16.mxu0 %v12907_v41  ;;  %v5920_v63 = vpack.c.bf16 %v5904_v58, %v5904_v58 }
0x1064   :  { %v5922_v41 = vpack.c.bf16 %v5906_v62, %v5906_v62 }
0x1065   :  { %12082 = vmatpush3.bf16.msra.mxu1 %v12908_v45  ;;  %v10924_v45 = vld [vmem:[#allocation8 + $0x15] ss:$0 sm:$0xff] }
0x1066   :  { %12104 = vmatpush3.bf16.msra.mxu0 %v12909_v49  ;;  %12111 = vmatprep.subr.bf16.mxu1 %v12910_v48 }
0x1067   :  { %12133 = vmatprep.subr.bf16.mxu0 %v12911_v35 }
0x1068   :  { %7147 = vmatmul.mubr.bf16.vlgmr.msra.gmra.mrb[92].mxu1 %v5916_v12 }
0x1069   :  { %7187 = vmatmul.mubr.bf16.vlgmr.msra.gmra.mrb[96].mxu0 %v5918_v14  ;;  %12112 = vmatpush3.bf16.msra.mxu1 %v12912_v44 }
0x106a   :  { %7226 = vmatprep.mubr.bf16.mxu1 %v5921_v15  ;;  %12134 = vmatpush3.bf16.msra.mxu0 %v12913_v13 }
0x106b   :  { %7266 = vmatprep.mubr.bf16.mxu0 %v5923_v38  ;;  %12113 = vmatprep.subr.bf16.mxu1 %v12914_v54 }
0x106c   :  { %12135 = vmatprep.subr.bf16.mxu0 %v12915_v16 }
0x106d   :  { %12114 = vmatpush3.bf16.msra.mxu1 %v12916_v17 }
0x106e   :  { %12136 = vmatpush3.bf16.msra.mxu0 %v12917_v18  ;;  %12115 = vmatprep.subr.bf16.mxu1 %v12918_v19 }
0x106f   :  { %12137 = vmatprep.subr.bf16.mxu0 %v12919_v29 }
0x1071   :  { %12116 = vmatpush3.bf16.msra.mxu1 %v12920_v22 }
0x1072   :  { %12138 = vmatpush3.bf16.msra.mxu0 %v12921_v23  ;;  %12117 = vmatprep.subr.bf16.mxu1 %v12922_v24 }
0x1073   :  { %12139 = vmatprep.subr.bf16.mxu0 %v12923_v10 }
0x1075   :  { %12118 = vmatpush3.bf16.msra.mxu1 %v12924_v27 }
0x1076   :  { %12140 = vmatpush3.bf16.msra.mxu0 %v12925_v25  ;;  %12119 = vmatprep.subr.bf16.mxu1 %v12926_v28 }
0x1077   :  { %12141 = vmatprep.subr.bf16.mxu0 %v12927_v36 }
0x1079   :  { %12120 = vmatpush3.bf16.msra.mxu1 %v12928_v39 }
0x107a   :  { %12142 = vmatpush3.bf16.msra.mxu0 %v12929_v40  ;;  %12121 = vmatprep.subr.bf16.mxu1 %v12930_v46 }
0x107b   :  { %12143 = vmatprep.subr.bf16.mxu0 %v12931_v4 }
0x107d   :  { %12122 = vmatpush3.bf16.msra.mxu1 %v12932_v47 }
0x107e   :  { %12144 = vmatpush3.bf16.msra.mxu0 %v12933_v50  ;;  %12123 = vmatprep.subr.bf16.mxu1 %v12934_v51 }
0x107f   :  { %12145 = vmatprep.subr.bf16.mxu0 %v12935_v52 }
0x1081   :  { %12124 = vmatpush3.bf16.msra.mxu1 %v12936_v60 }
0x1082   :  { %12146 = vmatpush3.bf16.msra.mxu0 %v12937_v55  ;;  %12125 = vmatprep.subr.bf16.mxu1 %v12938_v56 }
0x1083   :  { %12147 = vmatprep.subr.bf16.mxu0 %v12939_v57 }
0x1085   :  { %12126 = vmatpush3.bf16.msra.mxu1 %v12940_v61 }
0x1086   :  { %12148 = vmatpush3.bf16.msra.mxu0 %v12941_v26  ;;  %12521 = vmatprep.subr.bf16.mxu1 %v13241_v0 }
0x1088   :  { %7227 = vmatmul.mubr.bf16.vlgmr.msra.gmra.mrb[96].mxu1 %v5920_v63 }
0x1089   :  { %7267 = vmatmul.mubr.bf16.vlgmr.msra.gmra.mrb[100].mxu0 %v5922_v41  ;;  %12448 = vmatprep.mubr.msk.f32.mxu1 %vm13242_vm0, %v13243_v1 }
0x108a   :  { %7950 = vmatprep.mubr.bf16.mxu0 %v13244_v11 }
0x10fb   :  { %v11995_v5 = vpop.f32.mrb[84].mxu1  ;;  %v12017_v6 = vpop.f32.mrb[88].mxu0 }
0x10fc   :  { %v11996_v20 = vpop.f32.mrb[85].mxu1  ;;  %v12018_v49 = vpop.f32.mrb[89].mxu0 }
0x10fd   :  { %v11997_v59 = vadd.f32 %v11996_v20, %v11995_v5  ;;  %v12019_v48 = vadd.f32 %v12018_v49, %v12017_v6  ;;  %v11998_v7 = vpop.f32.mrb[86].mxu1  ;;  %v12020_v35 = vpop.f32.mrb[90].mxu0 }
0x10fe   :  { %v11999_v8 = vpop.f32.mrb[87].mxu1  ;;  %v12021_v9 = vpop.f32.mrb[91].mxu0  ;;  %v7302_v7 = vld [vmem:[#allocation2 + $0xc8] sm:$0xff] }
0x10ff   :  { %v6989_v44 = vadd.f32 %v11997_v59, %v10924_v45  ;;  %v10525_v59 = vld [vmem:[#allocation8 + $0x1b] ss:$0 sm:$0xff] }
0x1100   :  { %v7304_v8 = vld [vmem:[#allocation2 + $0xd8] sm:$0xff] }
0x1101   :  { %v7029_v12 = vadd.f32 %v12019_v48, %v6989_v44  ;;  %v7301_v48 = vld [vmem:[#allocation2 + $0xc0] sm:$0xff] }
0x1102   :  { %v12522_v35 = vpack.c.bf16 %v7302_v7, %v7301_v48  ;;  %v7305_v44 = vld [vmem:[#allocation2 + $0xe0] sm:$0xff]  ;;  %v11062_v48 = vld [vmem:[%s16156_s4 + $0x608] sm:$0xff] }
0x1104   :  { %12523 = vmatpush3.bf16.msra.mxu1 %v12522_v35  ;;  %v11070_v35 = vld [vmem:[%s16156_s4 + $0x648] sm:$0xff] }
0x1105   :  { %12524 = vmatprep.subr.bf16.mxu1 %v13241_v0 }
0x111b   :  { %v12039_v13 = vpop.f32.mrb[88].mxu1  ;;  %v12061_v14 = vpop.f32.mrb[92].mxu0 }
0x111c   :  { %v12040_v54 = vpop.f32.mrb[89].mxu1  ;;  %v12062_v15 = vpop.f32.mrb[93].mxu0 }
0x111d   :  { %v12041_v16 = vadd.f32 %v12040_v54, %v12039_v13  ;;  %v12063_v38 = vadd.f32 %v12062_v15, %v12061_v14  ;;  %v12042_v17 = vpop.f32.mrb[90].mxu1  ;;  %v12064_v18 = vpop.f32.mrb[94].mxu0  ;;  %v7307_v14 = vld [vmem:[#allocation2 + $0xf0] sm:$0xff]  ;;  %v7308_v54 = vld [vmem:[#allocation2 + $0xf8] sm:$0xff] }
0x111e   :  { %v12043_v19 = vpop.f32.mrb[91].mxu1  ;;  %v12065_v29 = vpop.f32.mrb[95].mxu0  ;;  %v12531_v15 = vpack.c.bf16 %v7308_v54, %v7307_v14  ;;  %v11086_v54 = vld [vmem:[%s16156_s4 + $0x6c8] sm:$0xff] }
0x111f   :  { %v7069_v22 = vadd.f32 %v12041_v16, %v7029_v12  ;;  %v7306_v12 = vld [vmem:[#allocation2 + $0xe8] sm:$0xff]  ;;  %v11053_v19 = vld [vmem:[#allocation8 + $0x16] ss:$0 sm:$0xff] }
0x1120   :  { %v12528_v13 = vpack.c.bf16 %v7306_v12, %v7305_v44  ;;  %v11077_v44 = vld [vmem:[%s16156_s4 + $0x680] sm:$0xff] }
0x1121   :  { %v7109_v23 = vadd.f32 %v12063_v38, %v7069_v22  ;;  %v11054_v22 = vld [vmem:[#allocation8 + $0x17] ss:$0 sm:$0xff]  ;;  %v11085_v12 = vld [vmem:[%s16156_s4 + $0x6c0] sm:$0xff] }
0x1122   :  { %v11142_v14 = vcombine.high %v11077_v44, %v11085_v12 }
0x113b   :  { %v12083_v24 = vpop.f32.mrb[92].mxu1 }
0x113c   :  { %v12105_v10 = vpop.f32.mrb[96].mxu0  ;;  %v12084_v27 = vpop.f32.mrb[93].mxu1 }
0x113d   :  { %v12085_v25 = vadd.f32 %v12084_v27, %v12083_v24  ;;  %v12106_v28 = vpop.f32.mrb[97].mxu0  ;;  %v12086_v36 = vpop.f32.mrb[94].mxu1 }
0x113e   :  { %v12107_v39 = vadd.f32 %v12106_v28, %v12105_v10  ;;  %v12108_v40 = vpop.f32.mrb[98].mxu0  ;;  %v12087_v46 = vpop.f32.mrb[95].mxu1  ;;  %v11055_v10 = vld [vmem:[#allocation8 + $0x18] ss:$0 sm:$0xff] }
0x113f   :  { %v7149_v4 = vadd.f32 %v12085_v25, %v7109_v23  ;;  %v12109_v47 = vpop.f32.mrb[99].mxu0 }
0x1141   :  { %v7189_v21 = vadd.f32 %v12107_v39, %v7149_v4 }
0x115b   :  { %v12127_v50 = vpop.f32.mrb[96].mxu1 }
0x115c   :  { %v12149_v51 = vpop.f32.mrb[100].mxu0  ;;  %v12128_v52 = vpop.f32.mrb[97].mxu1 }
0x115d   :  { %v12129_v60 = vadd.f32 %v12128_v52, %v12127_v50  ;;  %v12150_v53 = vpop.f32.mrb[101].mxu0  ;;  %v12130_v55 = vpop.f32.mrb[98].mxu1 }
0x115e   :  { %v12151_v56 = vadd.f32 %v12150_v53, %v12149_v51  ;;  %v12152_v57 = vpop.f32.mrb[102].mxu0  ;;  %v12131_v61 = vpop.f32.mrb[99].mxu1 }
0x115f   :  { %v7229_v58 = vadd.f32 %v12129_v60, %v7189_v21  ;;  %v12153_v26 = vpop.f32.mrb[103].mxu0  ;;  %v11058_v61 = vld [vmem:[#allocation8 + $0x1a] ss:$0 sm:$0xff] }
0x1161   :  { %v7269_v62 = vadd.f32 %v12151_v56, %v7229_v58  ;;  %v11057_v56 = vld [vmem:[#allocation8 + $0x19] ss:$0 sm:$0xff] }
0x1163   :  { %v7274_v63 = vadd.f32 %v7269_v62, %v14869_v32  ;;  %v7303_v32 = vld [vmem:[#allocation2 + $0xd0] sm:$0xff] }
0x1164   :  { %v12525_v9 = vpack.c.bf16 %v7304_v8, %v7303_v32  ;;  %v11127_v8 = vcombine.low %v11062_v48, %v11070_v35 }
0x1165   :  { %v7275_v41 = vsel %vm198_vm2, %v7274_v63, 0.0 }
0x1166   :  { %7276 = vadd.xlane.f32.xlu0 %v7275_v41  ;;  %12526 = vmatpush3.bf16.msra.mxu1 %v12525_v9  ;;  %v11128_v9 = vcombine.high %v11062_v48, %v11070_v35  ;;  %v11103_v35 = vld [vmem:[%s16156_s4 + $0x750] sm:$0xff] }
0x1167   :  { %12527 = vmatprep.subr.bf16.mxu1 %v13241_v0 }
0x116a   :  { %12529 = vmatpush3.bf16.msra.mxu1 %v12528_v13  ;;  %v11078_v13 = vld [vmem:[%s16156_s4 + $0x688] sm:$0xff] }
0x116b   :  { %12530 = vmatprep.subr.bf16.mxu1 %v13241_v0 }
0x116e   :  { %12532 = vmatpush3.bf16.msra.mxu1 %v12531_v15  ;;  %v11141_v15 = vcombine.low %v11077_v44, %v11085_v12 }
0x116f   :  { %7959 = vmatprep.subr.bf16.mxu1 %v11128_v9 }
0x11f3   :  { %v7277_v5 = vpop.xlane.xlu0 %7276 }
0x11f4   :  { %v7278_v6 = vmul.f32 0.015625, %v7277_v5 }
0x11f6   :  { %v7279_v45 = vsub.f32 %v7274_v63, %v7278_v6 }
0x11f8   :  { %v7280_v20 = vmul.f32 %v7279_v45, %v7279_v45 }
0x11fa   :  { %v7281_v49 = vsel %vm198_vm2, %v7280_v20, 0.0 }
0x11fb   :  { %7282 = vadd.xlane.f32.xlu1 %v7281_v49  ;;  %v11061_v49 = vld [vmem:[%s16156_s4 + $0x600] sm:$0xff] }
0x120c   :  { %4949 = vrot.lane.b32.xlu1 %v10525_v59, %s13245_s12  ;;  %v11069_v59 = vld [vmem:[%s16156_s4 + $0x640] sm:$0xff] }
0x120d   :  { %v11126_v7 = vcombine.high %v11061_v49, %v11069_v59  ;;  %v11125_v32 = vcombine.low %v11061_v49, %v11069_v59 }
0x120f   :  { %7918 = vmatprep.subr.bf16.mxu0 %v11126_v7  ;;  %v11095_v7 = vld [vmem:[%s16156_s4 + $0x710] sm:$0xff] }
0x1210   :  { %7919 = vmatpush1.bf16.msra.mxu0 %v11125_v32  ;;  %v11096_v32 = vld [vmem:[%s16156_s4 + $0x718] sm:$0xff]  ;;  %v11162_v12 = vcombine.high %v11095_v7, %v11103_v35 }
0x1211   :  { %7920 = vmatprep.subr.bf16.mxu0 %v11142_v14  ;;  %v11111_v14 = vld [vmem:[%s16156_s4 + $0x790] sm:$0xff] }
0x1214   :  { %7921 = vmatpush1.bf16.msra.mxu0 %v11141_v15  ;;  %v11112_v15 = vld [vmem:[%s16156_s4 + $0x798] sm:$0xff] }
0x1288   :  { %v7283_v16 = vpop.xlane.xlu1 %7282 }
0x1289   :  { %v7284_v38 = vmul.f32 0.015625, %v7283_v16  ;;  %v11143_v16 = vcombine.low %v11078_v13, %v11086_v54 }
0x128b   :  { %v7285_v17 = vadd.f32 1e-05, %v7284_v38  ;;  %v11144_v38 = vcombine.high %v11078_v13, %v11086_v54  ;;  %v11119_v54 = vld [vmem:[%s16156_s4 + $0x7d0] sm:$0xff] }
0x128c   :  { %v4950_v50 = vpop.permute.xlu1 %4949 }
0x128d   :  { %13084 = vrsqrt.f32 %v7285_v17  ;;  %v4952_v51 = vadd.f32 %v4950_v50, %v14787_v37  ;;  %v11093_v17 = vld [vmem:[%s16156_s4 + $0x700] sm:$0xff]  ;;  %v11064_v50 = vld [vmem:[%s16156_s4 + $0x618] sm:$0xff] }
0x1297   :  { %v13085_v18 = vpop.eup %13084 }
0x1298   :  { %v7287_v29 = vmul.f32 %v13085_v18, %v7279_v45  ;;  %v11101_v18 = vld [vmem:[%s16156_s4 + $0x740] sm:$0xff] }
0x129a   :  { %v7293_v23 = vmul.f32 %v11053_v19, %v7287_v29  ;;  %v11094_v19 = vld [vmem:[%s16156_s4 + $0x708] sm:$0xff]  ;;  %v11158_v29 = vcombine.high %v11093_v17, %v11101_v18 }
0x129c   :  { %v7299_v24 = vadd.f32 %v11054_v22, %v7293_v23  ;;  %v11102_v22 = vld [vmem:[%s16156_s4 + $0x748] sm:$0xff]  ;;  %v11157_v23 = vcombine.low %v11093_v17, %v11101_v18  ;;  %7922 = vmatprep.subr.bf16.mxu0 %v11158_v29  ;;  %v11178_v18 = vcombine.high %v11111_v14, %v11119_v54  ;;  %v11065_v29 = vld [vmem:[%s16156_s4 + $0x620] sm:$0xff] }
0x129e   :  { %12449 = vmatmul.mubr.msk.f32.vlgmr.msra.gmra.mrb[100].mxu1 %vm198_vm2, %v7299_v24  ;;  %7923 = vmatpush1.bf16.msra.mxu0 %v11157_v23  ;;  %v11066_v23 = vld [vmem:[%s16156_s4 + $0x628] sm:$0xff] }
0x129f   :  { %7991 = vmatprep.mubr.bf16.mxu1 %v13244_v11  ;;  %7960 = vmatpush1.bf16.msra.mxu1 %v11127_v8  ;;  %v11104_v8 = vld [vmem:[%s16156_s4 + $0x758] sm:$0xff] }
0x12a0   :  { %7961 = vmatprep.subr.bf16.mxu1 %v11144_v38  ;;  %v11164_v13 = vcombine.high %v11096_v32, %v11104_v8  ;;  %v11161_v38 = vcombine.low %v11095_v7, %v11103_v35  ;;  %v11163_v17 = vcombine.low %v11096_v32, %v11104_v8  ;;  %v11076_v7 = vld [vmem:[%s16156_s4 + $0x678] sm:$0xff] }
0x12a3   :  { %7962 = vmatpush1.bf16.msra.mxu1 %v11143_v16  ;;  %v11120_v16 = vld [vmem:[%s16156_s4 + $0x7d8] sm:$0xff] }
0x1371   :  { %v7383_v27 = vpop.f32.mrb[100].mxu1 }
0x1372   :  { %v7384_v25 = vadd.f32 %v11055_v10, %v7383_v27  ;;  %v12450_v28 = vpop.f32.mrb[101].mxu1  ;;  %v11160_v10 = vcombine.high %v11094_v19, %v11102_v22  ;;  %v11109_v27 = vld [vmem:[%s16156_s4 + $0x780] sm:$0xff] }
0x1373   :  { %v11110_v28 = vld [vmem:[%s16156_s4 + $0x788] sm:$0xff] }
0x1374   :  { %v7387_v36 = vadd.f32 %v7384_v25, %v7299_v24  ;;  %v11159_v24 = vcombine.low %v11094_v19, %v11102_v22  ;;  %7963 = vmatprep.subr.bf16.mxu1 %v11160_v10  ;;  %v11117_v25 = vld [vmem:[%s16156_s4 + $0x7c0] sm:$0xff]  ;;  %v11180_v19 = vcombine.high %v11112_v15, %v11120_v16  ;;  %v11177_v10 = vcombine.low %v11111_v14, %v11119_v54  ;;  %v11092_v14 = vld [vmem:[%s16156_s4 + $0x6f8] sm:$0xff] }
0x1375   :  { %v11073_v22 = vld [vmem:[%s16156_s4 + $0x660] sm:$0xff] }
0x1376   :  { %v7388_v39 = vsel %vm198_vm2, %v7387_v36, 0.0  ;;  %7964 = vmatpush1.bf16.msra.mxu1 %v11159_v24  ;;  %v11074_v24 = vld [vmem:[%s16156_s4 + $0x668] sm:$0xff] }
0x1377   :  { %7389 = vadd.xlane.f32.xlu0 %v7388_v39  ;;  %v11118_v39 = vld [vmem:[%s16156_s4 + $0x7c8] sm:$0xff] }
0x1404   :  { %v7390_v40 = vpop.xlane.xlu0 %7389 }
0x1405   :  { %v7391_v46 = vmul.f32 0.015625, %v7390_v40  ;;  %v11173_v40 = vcombine.low %v11109_v27, %v11117_v25 }
0x1407   :  { %v7392_v4 = vsub.f32 %v7387_v36, %v7391_v46  ;;  %v11174_v36 = vcombine.high %v11109_v27, %v11117_v25  ;;  %v11175_v46 = vcombine.low %v11110_v28, %v11118_v39  ;;  %v11179_v27 = vcombine.low %v11112_v15, %v11120_v16 }
0x1408   :  { %v11134_v25 = vcombine.high %v11065_v29, %v11073_v22 }
0x1409   :  { %v7393_v47 = vmul.f32 %v7392_v4, %v7392_v4  ;;  %7924 = vmatprep.subr.bf16.mxu0 %v11174_v36  ;;  %v11081_v36 = vld [vmem:[%s16156_s4 + $0x6a0] sm:$0xff] }
0x140a   :  { %7925 = vmatpush1.bf16.msra.mxu0 %v11173_v40  ;;  %v11082_v40 = vld [vmem:[%s16156_s4 + $0x6a8] sm:$0xff] }
0x140b   :  { %v7394_v21 = vsel %vm198_vm2, %v7393_v47, 0.0  ;;  %v11063_v47 = vld [vmem:[%s16156_s4 + $0x610] sm:$0xff] }
0x140c   :  { %7395 = vadd.xlane.f32.xlu0 %v7394_v21  ;;  %v11071_v21 = vld [vmem:[%s16156_s4 + $0x650] sm:$0xff] }
0x1422   :  { %7414 = vrot.lane.b32.xlu0 %v4952_v51, %s13245_s12  ;;  %v11129_v51 = vcombine.low %v11063_v47, %v11071_v21  ;;  %s13204_s12 = scalar_lea.vmem %s9775_s16, 128 }
0x1423   :  { %p13205_p12 = scmp.ne.s32.totalorder %s9775_s16, %s13204_s12  ;;  %p13210_p0 = scmp.lt.s32.totalorder %s13204_s12, %s13204_s12 }
0x1425   :  { %p13211_p1 = por %p13210_p0, %p13209_p13 }
0x1427   :  { %p13212_p2 = pnand %p13211_p1, %p13205_p12 }
0x1499   :  { %v7396_v52 = vpop.xlane.xlu0 %7395 }
0x149a   :  { %v7397_v60 = vmul.f32 0.015625, %v7396_v52  ;;  %v11130_v52 = vcombine.high %v11063_v47, %v11071_v21  ;;  %v11135_v47 = vcombine.low %v11066_v23, %v11074_v24 }
0x149c   :  { %v7398_v53 = vadd.f32 1e-05, %v7397_v60  ;;  %v11072_v60 = vld [vmem:[%s16156_s4 + $0x658] sm:$0xff]  ;;  %8000 = vmatprep.subr.bf16.mxu0 %v11130_v52  ;;  %v11105_v52 = vld [vmem:[%s16156_s4 + $0x760] sm:$0xff] }
0x149d   :  { %v7415_v62 = vpop.permute.xlu0 %7414 }
0x149e   :  { %13086 = vrsqrt.f32 %v7398_v53  ;;  %v11131_v53 = vcombine.low %v11064_v50, %v11072_v60 }
0x14a8   :  { %v13087_v55 = vpop.eup %13086 }
0x14a9   :  { %v7400_v57 = vmul.f32 %v13087_v55, %v7392_v4  ;;  %v11176_v4 = vcombine.high %v11110_v28, %v11118_v39  ;;  %v11132_v55 = vcombine.high %v11064_v50, %v11072_v60  ;;  %v11136_v28 = vcombine.high %v11066_v23, %v11074_v24  ;;  %v11089_v39 = vld [vmem:[%s16156_s4 + $0x6e0] sm:$0xff]  ;;  %v11098_v60 = vld [vmem:[%s16156_s4 + $0x728] sm:$0xff] }
0x14aa   :  { %v11150_v21 = vcombine.high %v11081_v36, %v11089_v39 }
0x14ab   :  { %v7406_v58 = vmul.f32 %v11057_v56, %v7400_v57  ;;  %7965 = vmatprep.subr.bf16.mxu1 %v11176_v4  ;;  %v11133_v4 = vcombine.low %v11065_v29, %v11073_v22  ;;  %v11108_v29 = vld [vmem:[%s16156_s4 + $0x778] sm:$0xff] }
0x14ac   :  { %7966 = vmatpush1.bf16.msra.mxu1 %v11175_v46  ;;  %v11090_v46 = vld [vmem:[%s16156_s4 + $0x6e8] sm:$0xff] }
0x14ad   :  { %v7412_v26 = vadd.f32 %v11058_v61, %v7406_v58  ;;  %8041 = vmatprep.subr.bf16.mxu1 %v11132_v55  ;;  %v11152_v50 = vcombine.high %v11082_v40, %v11090_v46  ;;  %v11149_v55 = vcombine.low %v11081_v36, %v11089_v39  ;;  %v11124_v36 = vld [vmem:[%s16156_s4 + $0x7f8] sm:$0xff] }
0x14af   :  { %v7417_v63 = vadd.f32 %v7415_v62, %v7412_v26  ;;  %v11059_v26 = vld [vmem:[#allocation8 + $0x1c] ss:$0 sm:$0xff] }
0x14b1   :  { %v7418_v41 = vsel %vm198_vm2, %v7417_v63, 0.0 }
0x14b2   :  { %7419 = vadd.xlane.f32.xlu1 %v7418_v41 }
0x153f   :  { %v7420_v5 = vpop.xlane.xlu1 %7419 }
0x1540   :  { %v7421_v6 = vmul.f32 0.015625, %v7420_v5  ;;  %v11079_v5 = vld [vmem:[%s16156_s4 + $0x690] sm:$0xff] }
0x1542   :  { %v15467_v37 = vsub.f32 %v7417_v63, %v7421_v6  ;;  %v11060_v63 = vld [vmem:[#allocation8 + $0x1d] ss:$0 sm:$0xff]  ;;  %v11087_v6 = vld [vmem:[%s16156_s4 + $0x6d0] sm:$0xff] }
0x1543   :  { %v11146_v59 = vcombine.high %v11079_v5, %v11087_v6  ;;  %v11145_v9 = vcombine.low %v11079_v5, %v11087_v6 }
0x1544   :  { %v7423_v45 = vmul.f32 %v15467_v37, %v15467_v37 }
0x1546   :  { %v7424_v20 = vsel %vm198_vm2, %v7423_v45, 0.0  ;;  %v11080_v45 = vld [vmem:[%s16156_s4 + $0x698] sm:$0xff] }
0x1547   :  { %7425 = vadd.xlane.f32.xlu0 %v7424_v20  ;;  %v11088_v20 = vld [vmem:[%s16156_s4 + $0x6d8] sm:$0xff] }
0x1548   :  { %v11148_v48 = vcombine.high %v11080_v45, %v11088_v20  ;;  %v11147_v44 = vcombine.low %v11080_v45, %v11088_v20  ;;  %v11067_v20 = vld [vmem:[%s16156_s4 + $0x630] sm:$0xff] }
0x15d4   :  { %v7426_v56 = vpop.xlane.xlu0 %7425 }
0x15d5   :  { %v7427_v57 = vmul.f32 0.015625, %v7426_v56  ;;  %v11151_v56 = vcombine.low %v11082_v40, %v11090_v46 }
0x15d7   :  { %v7428_v61 = vadd.f32 1e-05, %v7427_v57 }
0x15d9   :  { %13088 = vrsqrt.f32 %v7428_v61 }
0x15e3   :  { %v13089_v58 = vpop.eup %13088 }
0x15e4   :  { %v7430_v62 = vmul.f32 %v13089_v58, %v15467_v37  ;;  %v11113_v58 = vld [vmem:[%s16156_s4 + $0x7a0] sm:$0xff] }
0x15e6   :  { %v7436_v41 = vmul.f32 %v11059_v26, %v7430_v62  ;;  %v11121_v26 = vld [vmem:[%s16156_s4 + $0x7e0] sm:$0xff]  ;;  %v11114_v62 = vld [vmem:[%s16156_s4 + $0x7a8] sm:$0xff] }
0x15e7   :  { %v11182_v6 = vcombine.high %v11113_v58, %v11121_v26  ;;  %v11181_v35 = vcombine.low %v11113_v58, %v11121_v26  ;;  %v12953_v58 = vld [vmem:[%s16157_s5 + $0xc90] sm:$0xff]   ;;  %v12954_v26 = vld [vmem:[%s16157_s5 + $0xc58] sm:$0xff]  }
0x15e8   :  { %v15545_v49 = vadd.f32 %v11060_v63, %v7436_v41  ;;  %v11122_v63 = vld [vmem:[%s16156_s4 + $0x7e8] sm:$0xff] }
0x15e9   :  { %v11184_v45 = vcombine.high %v11114_v62, %v11122_v63  ;;  %v11183_v32 = vcombine.low %v11114_v62, %v11122_v63  ;;  %v12955_v62 = vld [vmem:[%s16157_s5 + $0xcd8] sm:$0xff]  }
0x15ea   :  { %v15549_v37 = vpack.c.bf16 %v15545_v49, %v15545_v49  ;;  %v12956_v63 = vld [vmem:[%s16157_s5 + $0xc18] sm:$0xff]  }
0x15ec   :  { %11189 = vmatmul.mubr.msk.bf16.vlgmr.msra.gmra.mrb[104].mxu0 %vm198_vm2, %v15549_v37  ;;  %11190 = vmatmul.mubr.msk.bf16.vlgmr.msra.gmra.mrb[104].mxu1 %vm198_vm2, %v15549_v37 }
0x15ed   :  { %8001 = vmatpush1.bf16.msra.mxu0 %v11129_v51  ;;  %8042 = vmatpush1.bf16.msra.mxu1 %v11131_v53  ;;  %v11097_v51 = vld [vmem:[%s16156_s4 + $0x720] sm:$0xff]  ;;  %v11106_v53 = vld [vmem:[%s16156_s4 + $0x768] sm:$0xff] }
0x15ee   :  { %8002 = vmatprep.subr.bf16.mxu0 %v11146_v59  ;;  %8043 = vmatprep.subr.bf16.mxu1 %v11148_v48  ;;  %v11166_v57 = vcombine.high %v11097_v51, %v11105_v52  ;;  %v11168_v61 = vcombine.high %v11098_v60, %v11106_v53  ;;  %v11165_v41 = vcombine.low %v11097_v51, %v11105_v52  ;;  %v11075_v59 = vld [vmem:[%s16156_s4 + $0x670] sm:$0xff]  ;;  %v11068_v48 = vld [vmem:[%s16156_s4 + $0x638] sm:$0xff]  ;;  %v12944_v51 = vld [vmem:[%s16157_s5 + $0xc00] sm:$0xff]  }
0x15ef   :  { %8032 = vmatprep.mubr.bf16.mxu0 %v13244_v11  ;;  %8073 = vmatprep.mubr.bf16.mxu1 %v13244_v11  ;;  %v11167_v5 = vcombine.low %v11098_v60, %v11106_v53  ;;  %v11138_v8 = vcombine.high %v11067_v20, %v11075_v59  ;;  %v11137_v54 = vcombine.low %v11067_v20, %v11075_v59  ;;  %v12945_v52 = vld [vmem:[%s16157_s5 + $0xc80] sm:$0xff]   ;;  %v12946_v60 = vld [vmem:[%s16157_s5 + $0xc48] sm:$0xff]  }
0x15f0   :  { %v11139_v15 = vcombine.low %v11068_v48, %v11076_v7  ;;  %v12947_v53 = vld [vmem:[%s16157_s5 + $0xcc8] sm:$0xff]   ;;  %v12961_v20 = vld [vmem:[%s16157_s5 + $0xca0] sm:$0xff]  }
0x15f1   :  { %8003 = vmatpush1.bf16.msra.mxu0 %v11145_v9  ;;  %8044 = vmatpush1.bf16.msra.mxu1 %v11147_v44  ;;  %v11140_v9 = vcombine.high %v11068_v48, %v11076_v7  ;;  %v11083_v44 = vld [vmem:[%s16156_s4 + $0x6b0] sm:$0xff]  ;;  %v12962_v59 = vld [vmem:[%s16157_s5 + $0xc68] sm:$0xff]  }
0x15f2   :  { %8004 = vmatprep.subr.bf16.mxu0 %v11162_v12  ;;  %8045 = vmatprep.subr.bf16.mxu1 %v11164_v13  ;;  %v11091_v12 = vld [vmem:[%s16156_s4 + $0x6f0] sm:$0xff]  ;;  %v11084_v13 = vld [vmem:[%s16156_s4 + $0x6b8] sm:$0xff]  ;;  %v12963_v48 = vld [vmem:[%s16157_s5 + $0xce8] sm:$0xff]  }
0x15f3   :  { %v11154_v16 = vcombine.high %v11083_v44, %v11091_v12  ;;  %v11153_v22 = vcombine.low %v11083_v44, %v11091_v12  ;;  %v11155_v23 = vcombine.low %v11084_v13, %v11092_v14  ;;  %v12964_v7 = vld [vmem:[%s16157_s5 + $0xc28] sm:$0xff]   ;;  %v12969_v44 = vld [vmem:[%s16157_s5 + $0xcb0] sm:$0xff]   ;;  %v12970_v12 = vld [vmem:[%s16157_s5 + $0xc78] sm:$0xff]  }
0x15f5   :  { %8005 = vmatpush1.bf16.msra.mxu0 %v11161_v38  ;;  %8046 = vmatpush1.bf16.msra.mxu1 %v11163_v17  ;;  %v11156_v38 = vcombine.high %v11084_v13, %v11092_v14  ;;  %v11099_v17 = vld [vmem:[%s16156_s4 + $0x730] sm:$0xff]  ;;  %v12971_v13 = vld [vmem:[%s16157_s5 + $0xcf8] sm:$0xff]  }
0x15f6   :  { %8006 = vmatprep.subr.bf16.mxu0 %v11178_v18  ;;  %8047 = vmatprep.subr.bf16.mxu1 %v11180_v19  ;;  %v11107_v18 = vld [vmem:[%s16156_s4 + $0x770] sm:$0xff]  ;;  %v11100_v19 = vld [vmem:[%s16156_s4 + $0x738] sm:$0xff] }
0x15f7   :  { %v11170_v24 = vcombine.high %v11099_v17, %v11107_v18  ;;  %v11169_v39 = vcombine.low %v11099_v17, %v11107_v18  ;;  %v11171_v40 = vcombine.low %v11100_v19, %v11108_v29  ;;  %v12972_v14 = vld [vmem:[%s16157_s5 + $0xc38] sm:$0xff]  }
0x15f9   :  { %8007 = vmatpush1.bf16.msra.mxu0 %v11177_v10  ;;  %8048 = vmatpush1.bf16.msra.mxu1 %v11179_v27  ;;  %v11172_v10 = vcombine.high %v11100_v19, %v11108_v29  ;;  %v11115_v27 = vld [vmem:[%s16156_s4 + $0x7b0] sm:$0xff] }
0x15fa   :  { %8082 = vmatprep.subr.bf16.mxu0 %v11134_v25  ;;  %8123 = vmatprep.subr.bf16.mxu1 %v11136_v28  ;;  %v11123_v25 = vld [vmem:[%s16156_s4 + $0x7f0] sm:$0xff]  ;;  %v11116_v28 = vld [vmem:[%s16156_s4 + $0x7b8] sm:$0xff] }
0x15fb   :  { %v11186_v46 = vcombine.high %v11115_v27, %v11123_v25 }
0x15fc   :  { %11191 = vmatmul.mubr.msk.bf16.vlgmr.msra.gmra.mrb[108].mxu0 %vm198_vm2, %v15549_v37  ;;  %11192 = vmatmul.mubr.msk.bf16.vlgmr.msra.gmra.mrb[108].mxu1 %vm198_vm2, %v15549_v37 }
0x15fd   :  { %8083 = vmatpush1.bf16.msra.mxu0 %v11133_v4  ;;  %8124 = vmatpush1.bf16.msra.mxu1 %v11135_v47  ;;  %v11188_v4 = vcombine.high %v11116_v28, %v11124_v36  ;;  %v11185_v47 = vcombine.low %v11115_v27, %v11123_v25 }
0x15fe   :  { %8084 = vmatprep.subr.bf16.mxu0 %v11150_v21  ;;  %8125 = vmatprep.subr.bf16.mxu1 %v11152_v50  ;;  %v11187_v21 = vcombine.low %v11116_v28, %v11124_v36  ;;  %v12942_v50 = vld [vmem:[%s16157_s5 + $0xc40] sm:$0xff]  }
0x15ff   :  { %8114 = vmatprep.mubr.bf16.mxu0 %v13244_v11  ;;  %8155 = vmatprep.mubr.bf16.mxu1 %v13244_v11 }
0x1601   :  { %8085 = vmatpush1.bf16.msra.mxu0 %v11149_v55  ;;  %8126 = vmatpush1.bf16.msra.mxu1 %v11151_v56  ;;  %v12948_v55 = vld [vmem:[%s16157_s5 + $0xc08] sm:$0xff]  }
0x1602   :  { %8086 = vmatprep.subr.bf16.mxu0 %v11166_v57  ;;  %8127 = vmatprep.subr.bf16.mxu1 %v11168_v61  ;;  %v12949_v56 = vld [vmem:[%s16157_s5 + $0xc88] sm:$0xff]   ;;  %v12950_v57 = vld [vmem:[%s16157_s5 + $0xc50] sm:$0xff]  }
0x1603   :  { %v12952_v61 = vld [vmem:[%s16157_s5 + $0xc10] sm:$0xff]  }
0x1605   :  { %8087 = vmatpush1.bf16.msra.mxu0 %v11165_v41  ;;  %8128 = vmatpush1.bf16.msra.mxu1 %v11167_v5  ;;  %v12957_v41 = vld [vmem:[%s16157_s5 + $0xc98] sm:$0xff]   ;;  %v12958_v5 = vld [vmem:[%s16157_s5 + $0xc60] sm:$0xff]  }
0x1606   :  { %8088 = vmatprep.subr.bf16.mxu0 %v11182_v6  ;;  %8129 = vmatprep.subr.bf16.mxu1 %v11184_v45  ;;  %v12959_v6 = vld [vmem:[%s16157_s5 + $0xce0] sm:$0xff]  }
0x1607   :  { %v12960_v45 = vld [vmem:[%s16157_s5 + $0xc20] sm:$0xff]  }
0x1609   :  { %8089 = vmatpush1.bf16.msra.mxu0 %v11181_v35  ;;  %8130 = vmatpush1.bf16.msra.mxu1 %v11183_v32  ;;  %v12965_v35 = vld [vmem:[%s16157_s5 + $0xca8] sm:$0xff]   ;;  %v12966_v32 = vld [vmem:[%s16157_s5 + $0xc70] sm:$0xff]  }
0x160a   :  { %8164 = vmatprep.subr.bf16.mxu0 %v11138_v8  ;;  %8205 = vmatprep.subr.bf16.mxu1 %v11140_v9  ;;  %v12967_v8 = vld [vmem:[%s16157_s5 + $0xcf0] sm:$0xff]  }
0x160b   :  { %v12968_v9 = vld [vmem:[%s16157_s5 + $0xc30] sm:$0xff]  }
0x160c   :  { %11193 = vmatmul.mubr.msk.bf16.vlgmr.msra.gmra.mrb[112].mxu0 %vm198_vm2, %v15549_v37  ;;  %11194 = vmatmul.mubr.msk.bf16.vlgmr.msra.gmra.mrb[112].mxu1 %vm198_vm2, %v15549_v37 }
0x160d   :  { %8165 = vmatpush1.bf16.msra.mxu0 %v11137_v54  ;;  %8206 = vmatpush1.bf16.msra.mxu1 %v11139_v15  ;;  %v12973_v54 = vld [vmem:[%s16157_s5 + $0xcb8] sm:$0xff]   ;;  %v12974_v15 = vld [vmem:[%s16157_s5 + $0xd40] sm:$0xff]  }
0x160e   :  { %8166 = vmatprep.subr.bf16.mxu0 %v11154_v16  ;;  %8207 = vmatprep.subr.bf16.mxu1 %v11156_v38  ;;  %v12975_v16 = vld [vmem:[%s16157_s5 + $0xdc0] sm:$0xff]  }
0x160f   :  { %8196 = vmatprep.mubr.bf16.mxu0 %v13244_v11  ;;  %8237 = vmatprep.mubr.bf16.mxu1 %v13244_v11  ;;  %v12943_v11 = vld [vmem:[%s16157_s5 + $0xcc0] sm:$0xff]  }
0x1610   :  { %v15795_v38 = vld [vmem:[#allocation7 + $0x3] ss:$4 sm:$0xff] }
0x1611   :  { %8167 = vmatpush1.bf16.msra.mxu0 %v11153_v22  ;;  %8208 = vmatpush1.bf16.msra.mxu1 %v11155_v23  ;;  %v7518_v17 = vrot.slane %v15795_v38, %v13738_v30  ;;  %v7526_v18 = vrot.slane %v15795_v38, %v13741_v31  ;;  %v7522_v19 = vrot.slane %v15795_v38, %v13746_v33 }
0x1612   :  { %8168 = vmatprep.subr.bf16.mxu0 %v11170_v24  ;;  %8209 = vmatprep.subr.bf16.mxu1 %v11172_v10  ;;  %v7530_v29 = vrot.slane %v15795_v38, %v13749_v34 }
0x1615   :  { %8169 = vmatpush1.bf16.msra.mxu0 %v11169_v39  ;;  %8210 = vmatpush1.bf16.msra.mxu1 %v11171_v40 }
0x1616   :  { %8170 = vmatprep.subr.bf16.mxu0 %v11186_v46  ;;  %8211 = vmatprep.subr.bf16.mxu1 %v11188_v4 }
0x1619   :  { %8171 = vmatpush1.bf16.msra.mxu0 %v11185_v47  ;;  %8212 = vmatpush1.bf16.msra.mxu1 %v11187_v21 }
0x161a   :  { %12164 = vmatprep.subr.bf16.mxu0 %v12942_v50  ;;  %12186 = vmatprep.subr.bf16.mxu1 %v12943_v11 }
0x161c   :  { %11195 = vmatmul.mubr.msk.bf16.vlgmr.msra.gmra.mrb[116].mxu0 %vm198_vm2, %v15549_v37  ;;  %11196 = vmatmul.mubr.msk.bf16.vlgmr.msra.gmra.mrb[116].mxu1 %vm198_vm2, %v15549_v37  ;;  %v12951_v37 = vld [vmem:[%s16157_s5 + $0xcd0] sm:$0xff]  }
0x161d   :  { %12165 = vmatpush3.bf16.msra.mxu0 %v12944_v51  ;;  %12187 = vmatpush3.bf16.msra.mxu1 %v12945_v52 }
0x161e   :  { %12166 = vmatprep.subr.bf16.mxu0 %v12946_v60  ;;  %12188 = vmatprep.subr.bf16.mxu1 %v12947_v53  ;;  %v12976_v60 = vld [vmem:[%s16157_s5 + $0xd00] sm:$0xff]  }
0x161f   :  { %v12977_v53 = vld [vmem:[%s16157_s5 + $0xd80] sm:$0xff]  }
0x1621   :  { %12167 = vmatpush3.bf16.msra.mxu0 %v12948_v55  ;;  %12189 = vmatpush3.bf16.msra.mxu1 %v12949_v56 }
0x1622   :  { %12168 = vmatprep.subr.bf16.mxu0 %v12950_v57  ;;  %12190 = vmatprep.subr.bf16.mxu1 %v12951_v37  ;;  %v12978_v57 = vld [vmem:[%s16157_s5 + $0xd48] sm:$0xff]  }
0x1623   :  { %v12979_v37 = vld [vmem:[%s16157_s5 + $0xdc8] sm:$0xff]  }
0x1625   :  { %12169 = vmatpush3.bf16.msra.mxu0 %v12952_v61  ;;  %12191 = vmatpush3.bf16.msra.mxu1 %v12953_v58  ;;  %v12980_v61 = vld [vmem:[%s16157_s5 + $0xd08] sm:$0xff]  }
0x1626   :  { %12170 = vmatprep.subr.bf16.mxu0 %v12954_v26  ;;  %12192 = vmatprep.subr.bf16.mxu1 %v12955_v62  ;;  %v12981_v58 = vld [vmem:[%s16157_s5 + $0xd88] sm:$0xff]   ;;  %v12982_v26 = vld [vmem:[%s16157_s5 + $0xd50] sm:$0xff]  }
0x1627   :  { %v12983_v62 = vld [vmem:[%s16157_s5 + $0xdd0] sm:$0xff]  }
0x1629   :  { %12171 = vmatpush3.bf16.msra.mxu0 %v12956_v63  ;;  %12193 = vmatpush3.bf16.msra.mxu1 %v12957_v41  ;;  %v7538_v63 = vrot.slane %v15795_v38, %v13778_v2  ;;  %v7546_v41 = vrot.slane %v15795_v38, %v13781_v3 }
0x162a   :  { %12172 = vmatprep.subr.bf16.mxu0 %v12958_v5  ;;  %12194 = vmatprep.subr.bf16.mxu1 %v12959_v6  ;;  %v12984_v5 = vld [vmem:[%s16157_s5 + $0xd10] sm:$0xff]  }
0x162b   :  { %v12985_v6 = vld [vmem:[%s16157_s5 + $0xd90] sm:$0xff]  }
0x162d   :  { %12173 = vmatpush3.bf16.msra.mxu0 %v12960_v45  ;;  %12195 = vmatpush3.bf16.msra.mxu1 %v12961_v20  ;;  %v12986_v45 = vld [vmem:[%s16157_s5 + $0xd58] sm:$0xff]  }
0x162e   :  { %12174 = vmatprep.subr.bf16.mxu0 %v12962_v59  ;;  %12196 = vmatprep.subr.bf16.mxu1 %v12963_v48  ;;  %v12987_v20 = vld [vmem:[%s16157_s5 + $0xdd8] sm:$0xff]  }
0x1631   :  { %12175 = vmatpush3.bf16.msra.mxu0 %v12964_v7  ;;  %12197 = vmatpush3.bf16.msra.mxu1 %v12965_v35 }
0x1632   :  { %12176 = vmatprep.subr.bf16.mxu0 %v12966_v32  ;;  %12198 = vmatprep.subr.bf16.mxu1 %v12967_v8 }
0x1635   :  { %12177 = vmatpush3.bf16.msra.mxu0 %v12968_v9  ;;  %12199 = vmatpush3.bf16.msra.mxu1 %v12969_v44 }
0x1636   :  { %12178 = vmatprep.subr.bf16.mxu0 %v12970_v12  ;;  %12200 = vmatprep.subr.bf16.mxu1 %v12971_v13  ;;  %v12988_v12 = vld [vmem:[%s16157_s5 + $0xd18] sm:$0xff]  }
0x1637   :  { %v12989_v13 = vld [vmem:[%s16157_s5 + $0xd98] sm:$0xff]  }
0x1639   :  { %12179 = vmatpush3.bf16.msra.mxu0 %v12972_v14  ;;  %12201 = vmatpush3.bf16.msra.mxu1 %v12973_v54 }
0x163a   :  { %12208 = vmatprep.subr.bf16.mxu0 %v12974_v15  ;;  %12230 = vmatprep.subr.bf16.mxu1 %v12975_v16  ;;  %v12990_v15 = vld [vmem:[%s16157_s5 + $0xd60] sm:$0xff]  }
0x163b   :  { %v12991_v16 = vld [vmem:[%s16157_s5 + $0xde0] sm:$0xff]  }
0x16bf   :  { %v7952_v22 = vpop.f32.mrb[104].mxu0  ;;  %v7993_v23 = vpop.f32.mrb[104].mxu1 }
0x16c0   :  { %v7953_v24 = vadd.f32 %v7952_v22, %v7518_v17  ;;  %v7994_v10 = vadd.f32 %v7993_v23, %v7526_v18  ;;  %v7954_v27 = vpop.f32.mrb[105].mxu0  ;;  %v7995_v25 = vpop.f32.mrb[105].mxu1  ;;  %v12992_v22 = vld [vmem:[%s16157_s5 + $0xd20] sm:$0xff]  }
0x16c1   :  { %v7955_v28 = vadd.f32 %v7954_v27, %v7522_v19  ;;  %v7996_v36 = vadd.f32 %v7995_v25, %v7530_v29  ;;  %v7956_v39 = vpop.f32.mrb[106].mxu0  ;;  %v7997_v40 = vpop.f32.mrb[106].mxu1  ;;  %v12993_v23 = vld [vmem:[%s16157_s5 + $0xda0] sm:$0xff]   ;;  %v12996_v27 = vld [vmem:[%s16157_s5 + $0xd28] sm:$0xff]  }
0x16c2   :  { %v8246_v46 = vmax.f32 %v7953_v24, 0.0  ;;  %v8248_v4 = vmax.f32 %v7994_v10, 0.0  ;;  %v7957_v47 = vpop.f32.mrb[107].mxu0  ;;  %v7998_v21 = vpop.f32.mrb[107].mxu1  ;;  %v12994_v24 = vld [vmem:[%s16157_s5 + $0xd68] sm:$0xff]   ;;  %v12998_v40 = vld [vmem:[%s16157_s5 + $0xd70] sm:$0xff]  }
0x16c3   :  { %v8247_v50 = vmax.f32 %v7955_v28, 0.0  ;;  %v8249_v11 = vmax.f32 %v7996_v36, 0.0  ;;  %v12995_v10 = vld [vmem:[%s16157_s5 + $0xde8] sm:$0xff]   ;;  %v7534_v28 = vrot.slane %v15795_v38, %v13824_v42  ;;  %v7542_v36 = vrot.slane %v15795_v38, %v13827_v43  ;;  %v13000_v47 = vld [vmem:[%s16157_s5 + $0xd30] sm:$0xff]  }
0x16c4   :  { %v8262_v55 = vpack.c.bf16 %v8246_v46, %v8246_v46  ;;  %v8264_v56 = vpack.c.bf16 %v8248_v4, %v8248_v4  ;;  %v12997_v25 = vld [vmem:[%s16157_s5 + $0xda8] sm:$0xff]   ;;  %v12999_v46 = vld [vmem:[%s16157_s5 + $0xdf0] sm:$0xff]  }
0x16c5   :  { %v8263_v51 = vpack.c.bf16 %v8247_v50, %v8247_v50  ;;  %v8265_v52 = vpack.c.bf16 %v8249_v11, %v8249_v11  ;;  %v15879_v39 = vld [vmem:[#allocation7 + $0x23] ss:$4 sm:$0xff] }
0x16c6   :  { %v7554_v4 = vrot.slane %v15879_v39, %v13746_v33  ;;  %v7562_v38 = vrot.slane %v15879_v39, %v13749_v34  ;;  %v13001_v21 = vld [vmem:[%s16157_s5 + $0xdb0] sm:$0xff]   ;;  %v13003_v33 = vld [vmem:[%s16157_s5 + $0xdf8] sm:$0xff]  }
0x16c7   :  { %9340 = vmatprep.mubr.bf16.mxu0 %v8263_v51  ;;  %9380 = vmatprep.mubr.bf16.mxu1 %v8265_v52  ;;  %v13002_v51 = vld [vmem:[%s16157_s5 + $0xd78] sm:$0xff]  }
0x16c8   :  { %9341 = vmatmul.mubr.bf16.vlgmr.msra.gmra.mrb[120].mxu0 %v8262_v55  ;;  %9381 = vmatmul.mubr.bf16.vlgmr.msra.gmra.mrb[120].mxu1 %v8264_v56 }
0x16c9   :  { %12209 = vmatpush3.bf16.msra.mxu0 %v12976_v60  ;;  %12231 = vmatpush3.bf16.msra.mxu1 %v12977_v53 }
0x16ca   :  { %12210 = vmatprep.subr.bf16.mxu0 %v12978_v57  ;;  %12232 = vmatprep.subr.bf16.mxu1 %v12979_v37 }
0x16cd   :  { %12211 = vmatpush3.bf16.msra.mxu0 %v12980_v61  ;;  %12233 = vmatpush3.bf16.msra.mxu1 %v12981_v58  ;;  %v13004_v61 = vld [vmem:[%s16157_s5 + $0xd38] sm:$0xff]  }
0x16ce   :  { %12212 = vmatprep.subr.bf16.mxu0 %v12982_v26  ;;  %12234 = vmatprep.subr.bf16.mxu1 %v12983_v62  ;;  %v13005_v58 = vld [vmem:[%s16157_s5 + $0xdb8] sm:$0xff]  }
0x16cf   :  { %v8034_v59 = vpop.f32.mrb[108].mxu0  ;;  %v8075_v48 = vpop.f32.mrb[108].mxu1 }
0x16d0   :  { %v8036_v7 = vpop.f32.mrb[109].mxu0  ;;  %v8077_v35 = vpop.f32.mrb[109].mxu1  ;;  %v8035_v50 = vadd.f32 %v8034_v59, %v7534_v28  ;;  %v8076_v11 = vadd.f32 %v8075_v48, %v7542_v36  ;;  %v13008_v59 = vld [vmem:[%s16157_s5 + $0xe00] sm:$0xff]  }
0x16d1   :  { %v8037_v32 = vadd.f32 %v8036_v7, %v7538_v63  ;;  %v8078_v8 = vadd.f32 %v8077_v35, %v7546_v41  ;;  %v8038_v9 = vpop.f32.mrb[110].mxu0  ;;  %v8079_v44 = vpop.f32.mrb[110].mxu1  ;;  %12213 = vmatpush3.bf16.msra.mxu0 %v12984_v5  ;;  %12235 = vmatpush3.bf16.msra.mxu1 %v12985_v6  ;;  %v13006_v5 = vld [vmem:[%s16157_s5 + $0xe40] sm:$0xff]  }
0x16d2   :  { %v8039_v14 = vpop.f32.mrb[111].mxu0  ;;  %v8080_v54 = vpop.f32.mrb[111].mxu1  ;;  %12214 = vmatprep.subr.bf16.mxu0 %v12986_v45  ;;  %12236 = vmatprep.subr.bf16.mxu1 %v12987_v20  ;;  %v8250_v26 = vmax.f32 %v8035_v50, 0.0  ;;  %v8252_v62 = vmax.f32 %v8076_v11, 0.0  ;;  %v13007_v6 = vld [vmem:[%s16157_s5 + $0xec0] sm:$0xff]   ;;  %v13011_v9 = vld [vmem:[%s16157_s5 + $0xec8] sm:$0xff]  }
0x16d3   :  { %v8251_v17 = vmax.f32 %v8037_v32, 0.0  ;;  %v8253_v18 = vmax.f32 %v8078_v8, 0.0  ;;  %v13009_v35 = vld [vmem:[%s16157_s5 + $0xe80] sm:$0xff]   ;;  %v13010_v8 = vld [vmem:[%s16157_s5 + $0xe48] sm:$0xff]   ;;  %v13014_v14 = vld [vmem:[%s16157_s5 + $0xe50] sm:$0xff]  }
0x16d4   :  { %v8266_v48 = vpack.c.bf16 %v8250_v26, %v8250_v26  ;;  %v8268_v7 = vpack.c.bf16 %v8252_v62, %v8252_v62  ;;  %v13015_v54 = vld [vmem:[%s16157_s5 + $0xed0] sm:$0xff]   ;;  %v13027_v50 = vld [vmem:[%s16157_s5 + $0xee8] sm:$0xff]  }
0x16d5   :  { %v8267_v19 = vpack.c.bf16 %v8251_v17, %v8251_v17  ;;  %v8269_v29 = vpack.c.bf16 %v8253_v18, %v8253_v18  ;;  %12215 = vmatpush3.bf16.msra.mxu0 %v12988_v12  ;;  %12237 = vmatpush3.bf16.msra.mxu1 %v12989_v13  ;;  %v13012_v12 = vld [vmem:[%s16157_s5 + $0xe08] sm:$0xff]   ;;  %v13017_v17 = vld [vmem:[%s16157_s5 + $0xe90] sm:$0xff]   ;;  %v13018_v18 = vld [vmem:[%s16157_s5 + $0xe58] sm:$0xff]  }
0x16d6   :  { %12216 = vmatprep.subr.bf16.mxu0 %v12990_v15  ;;  %12238 = vmatprep.subr.bf16.mxu1 %v12991_v16  ;;  %v13013_v13 = vld [vmem:[%s16157_s5 + $0xe88] sm:$0xff]   ;;  %v7574_v15 = vrot.slane %v15879_v39, %v13827_v43  ;;  %v13016_v16 = vld [vmem:[%s16157_s5 + $0xe10] sm:$0xff]   ;;  %v13019_v43 = vld [vmem:[%s16157_s5 + $0xed8] sm:$0xff]  }
0x16d7   :  { %9420 = vmatprep.mubr.bf16.mxu0 %v8267_v19  ;;  %9460 = vmatprep.mubr.bf16.mxu1 %v8269_v29  ;;  %v13028_v11 = vld [vmem:[%s16157_s5 + $0xe28] sm:$0xff]  }
0x16d9   :  { %12217 = vmatpush3.bf16.msra.mxu0 %v12992_v22  ;;  %12239 = vmatpush3.bf16.msra.mxu1 %v12993_v23 }
0x16da   :  { %12218 = vmatprep.subr.bf16.mxu0 %v12994_v24  ;;  %12240 = vmatprep.subr.bf16.mxu1 %v12995_v10 }
0x16dd   :  { %12219 = vmatpush3.bf16.msra.mxu0 %v12996_v27  ;;  %12241 = vmatpush3.bf16.msra.mxu1 %v12997_v25  ;;  %v13020_v25 = vld [vmem:[%s16157_s5 + $0xe18] sm:$0xff]  }
0x16de   :  { %12220 = vmatprep.subr.bf16.mxu0 %v12998_v40  ;;  %12242 = vmatprep.subr.bf16.mxu1 %v12999_v46  ;;  %v13021_v40 = vld [vmem:[%s16157_s5 + $0xe98] sm:$0xff]   ;;  %v13022_v46 = vld [vmem:[%s16157_s5 + $0xe60] sm:$0xff]  }
0x16df   :  { %v15903_v34 = vpop.f32.mrb[112].mxu0  ;;  %v15905_v52 = vpop.f32.mrb[112].mxu1 }
0x16e0   :  { %v8118_v60 = vpop.f32.mrb[113].mxu0  ;;  %v8159_v53 = vpop.f32.mrb[113].mxu1 }
0x16e1   :  { %v8119_v55 = vadd.f32 %v8118_v60, %v7554_v4  ;;  %v8160_v56 = vadd.f32 %v8159_v53, %v7562_v38  ;;  %v8120_v57 = vpop.f32.mrb[114].mxu0  ;;  %v8161_v37 = vpop.f32.mrb[114].mxu1  ;;  %12221 = vmatpush3.bf16.msra.mxu0 %v13000_v47  ;;  %12243 = vmatpush3.bf16.msra.mxu1 %v13001_v21  ;;  %v13023_v4 = vld [vmem:[%s16157_s5 + $0xee0] sm:$0xff]   ;;  %v13026_v21 = vld [vmem:[%s16157_s5 + $0xe68] sm:$0xff]   ;;  %v13030_v60 = vld [vmem:[%s16157_s5 + $0xe70] sm:$0xff]   ;;  %v7558_v53 = vrot.slane %v15879_v39, %v13741_v31 }
0x16e2   :  { %v8121_v63 = vpop.f32.mrb[115].mxu0  ;;  %v8162_v41 = vpop.f32.mrb[115].mxu1  ;;  %12222 = vmatprep.subr.bf16.mxu0 %v13002_v51  ;;  %12244 = vmatprep.subr.bf16.mxu1 %v13003_v33  ;;  %v13024_v38 = vld [vmem:[%s16157_s5 + $0xe20] sm:$0xff]   ;;  %v7550_v51 = vrot.slane %v15879_v39, %v13738_v30  ;;  %v13029_v33 = vld [vmem:[%s16157_s5 + $0xea8] sm:$0xff]   ;;  %v7570_v30 = vrot.slane %v15879_v39, %v13778_v2  ;;  %v13032_v57 = vld [vmem:[%s16157_s5 + $0xe30] sm:$0xff]  }
0x16e3   :  { %v8255_v45 = vmax.f32 %v8119_v55, 0.0  ;;  %v8257_v20 = vmax.f32 %v8160_v56, 0.0  ;;  %v13025_v47 = vld [vmem:[%s16157_s5 + $0xea0] sm:$0xff]   ;;  %v13031_v55 = vld [vmem:[%s16157_s5 + $0xef0] sm:$0xff]   ;;  %v7578_v56 = vrot.slane %v15879_v39, %v13781_v3  ;;  %v13034_v2 = vld [vmem:[%s16157_s5 + $0xe78] sm:$0xff]  }
0x16e4   :  { %v8117_v37 = vadd.f32 %v15903_v34, %v7550_v51  ;;  %v13033_v31 = vld [vmem:[%s16157_s5 + $0xeb0] sm:$0xff]   ;;  %v13035_v3 = vld [vmem:[%s16157_s5 + $0xef8] sm:$0xff]  }
0x16e5   :  { %12223 = vmatpush3.bf16.msra.mxu0 %v13004_v61  ;;  %12245 = vmatpush3.bf16.msra.mxu1 %v13005_v58  ;;  %v8271_v32 = vpack.c.bf16 %v8255_v45, %v8255_v45  ;;  %v8273_v44 = vpack.c.bf16 %v8257_v20, %v8257_v20  ;;  %v8158_v61 = vadd.f32 %v15905_v52, %v7558_v53  ;;  %v13036_v34 = vld [vmem:[%s16157_s5 + $0xe38] sm:$0xff]   ;;  %v13038_v52 = vld [vmem:[%s16157_s5 + $0xf40] sm:$0xff]  }
0x16e6   :  { %12252 = vmatprep.subr.bf16.mxu0 %v13006_v5  ;;  %12274 = vmatprep.subr.bf16.mxu1 %v13007_v6  ;;  %v8254_v62 = vmax.f32 %v8117_v37, 0.0  ;;  %v13037_v63 = vld [vmem:[%s16157_s5 + $0xeb8] sm:$0xff]   ;;  %v13039_v5 = vld [vmem:[%s16157_s5 + $0xfc0] sm:$0xff]  }
0x16e7   :  { %v8256_v41 = vmax.f32 %v8158_v61, 0.0  ;;  %v13040_v20 = vld [vmem:[%s16157_s5 + $0xf00] sm:$0xff]  }
0x16e8   :  { %9421 = vmatmul.mubr.bf16.vlgmr.msra.gmra.mrb[124].mxu0 %v8266_v48  ;;  %9461 = vmatmul.mubr.bf16.vlgmr.msra.gmra.mrb[124].mxu1 %v8268_v7  ;;  %v13041_v48 = vld [vmem:[%s16157_s5 + $0xf80] sm:$0xff]  }
0x16e9   :  { %12253 = vmatpush3.bf16.msra.mxu0 %v13008_v59  ;;  %9500 = vmatprep.mubr.bf16.mxu0 %v8271_v32  ;;  %v8270_v59 = vpack.c.bf16 %v8254_v62, %v8254_v62  ;;  %v8272_v7 = vpack.c.bf16 %v8256_v41, %v8256_v41 }
0x16ea   :  { %12275 = vmatpush3.bf16.msra.mxu1 %v13009_v35  ;;  %9540 = vmatprep.mubr.bf16.mxu1 %v8273_v44  ;;  %v13042_v35 = vld [vmem:[%s16157_s5 + $0xf48] sm:$0xff]  }
0x16eb   :  { %12254 = vmatprep.subr.bf16.mxu0 %v13010_v8  ;;  %12276 = vmatprep.subr.bf16.mxu1 %v13011_v9  ;;  %v13043_v8 = vld [vmem:[%s16157_s5 + $0xfc8] sm:$0xff]  }
0x16ec   :  { %v13044_v44 = vld [vmem:[%s16157_s5 + $0xf08] sm:$0xff]  }
0x16ed   :  { %12255 = vmatpush3.bf16.msra.mxu0 %v13012_v12  ;;  %v13045_v12 = vld [vmem:[%s16157_s5 + $0xf88] sm:$0xff]  }
0x16ee   :  { %12277 = vmatpush3.bf16.msra.mxu1 %v13013_v13  ;;  %12256 = vmatprep.subr.bf16.mxu0 %v13014_v14  ;;  %v13046_v13 = vld [vmem:[%s16157_s5 + $0xf50] sm:$0xff]  }
0x16ef   :  { %v15954_v19 = vpop.f32.mrb[116].mxu0  ;;  %v8239_v29 = vpop.f32.mrb[116].mxu1  ;;  %12278 = vmatprep.subr.bf16.mxu1 %v13015_v54  ;;  %v13047_v14 = vld [vmem:[%s16157_s5 + $0xfd0] sm:$0xff]  }
0x16f0   :  { %v15959_v22 = vadd.f32 %v8239_v29, %v7574_v15  ;;  %v8200_v23 = vpop.f32.mrb[117].mxu0  ;;  %v8241_v24 = vpop.f32.mrb[117].mxu1  ;;  %v13048_v54 = vld [vmem:[%s16157_s5 + $0xf10] sm:$0xff]   ;;  %v13053_v29 = vld [vmem:[%s16157_s5 + $0xf98] sm:$0xff]  }
0x16f1   :  { %v8202_v10 = vpop.f32.mrb[118].mxu0  ;;  %v8243_v27 = vpop.f32.mrb[118].mxu1  ;;  %12257 = vmatpush3.bf16.msra.mxu0 %v13016_v16  ;;  %v8201_v58 = vadd.f32 %v8200_v23, %v7570_v30  ;;  %v8242_v26 = vadd.f32 %v8241_v24, %v7578_v56  ;;  %v13049_v15 = vld [vmem:[%s16157_s5 + $0xf90] sm:$0xff]   ;;  %v13050_v16 = vld [vmem:[%s16157_s5 + $0xf58] sm:$0xff]   ;;  %v13055_v23 = vld [vmem:[%s16157_s5 + $0xfe0] sm:$0xff]  }
0x16f2   :  { %12279 = vmatpush3.bf16.msra.mxu1 %v13017_v17  ;;  %v8203_v28 = vpop.f32.mrb[119].mxu0  ;;  %v8244_v36 = vpop.f32.mrb[119].mxu1  ;;  %12258 = vmatprep.subr.bf16.mxu0 %v13018_v18  ;;  %v13051_v17 = vld [vmem:[%s16157_s5 + $0xfd8] sm:$0xff]   ;;  %v13056_v24 = vld [vmem:[%s16157_s5 + $0xf20] sm:$0xff]   ;;  %v13058_v27 = vld [vmem:[%s16157_s5 + $0xf68] sm:$0xff]   ;;  %v8260_v51 = vmax.f32 %v15959_v22, 0.0 }
0x16f3   :  { %12280 = vmatprep.subr.bf16.mxu1 %v13019_v43  ;;  %v8259_v6 = vmax.f32 %v8201_v58, 0.0  ;;  %v8261_v45 = vmax.f32 %v8242_v26, 0.0  ;;  %v13052_v18 = vld [vmem:[%s16157_s5 + $0xf18] sm:$0xff]   ;;  %v13054_v43 = vld [vmem:[%s16157_s5 + $0xf60] sm:$0xff]   ;;  %v13060_v28 = vld [vmem:[%s16157_s5 + $0xf28] sm:$0xff]   ;;  %v7566_v36 = vrot.slane %v15879_v39, %v13824_v42 }
0x16f4   :  { %v13057_v10 = vld [vmem:[%s16157_s5 + $0xfa0] sm:$0xff]   ;;  %v13064_v42 = vld [vmem:[%s16157_s5 + $0xf30] sm:$0xff]   ;;  %v11453_v30 = vld [vmem:[#allocation8 + $0x1e] ss:$0 sm:$0xff] }
0x16f5   :  { %12259 = vmatpush3.bf16.msra.mxu0 %v13020_v25  ;;  %v8275_v32 = vpack.c.bf16 %v8259_v6, %v8259_v6  ;;  %v8277_v9 = vpack.c.bf16 %v8261_v45, %v8261_v45  ;;  %v13059_v25 = vld [vmem:[%s16157_s5 + $0xfe8] sm:$0xff]   ;;  %v8199_v39 = vadd.f32 %v15954_v19, %v7566_v36  ;;  %v13068_v19 = vld [vmem:[%s16157_s5 + $0xf38] sm:$0xff]  }
0x16f6   :  { %12281 = vmatpush3.bf16.msra.mxu1 %v13021_v40  ;;  %12260 = vmatprep.subr.bf16.mxu0 %v13022_v46  ;;  %v13061_v40 = vld [vmem:[%s16157_s5 + $0xfa8] sm:$0xff]   ;;  %v13062_v46 = vld [vmem:[%s16157_s5 + $0xf70] sm:$0xff]  }
0x16f7   :  { %12282 = vmatprep.subr.bf16.mxu1 %v13023_v4  ;;  %v13063_v4 = vld [vmem:[%s16157_s5 + $0xff0] sm:$0xff]  }
0x16f9   :  { %12261 = vmatpush3.bf16.msra.mxu0 %v13024_v38  ;;  %v13065_v38 = vld [vmem:[%s16157_s5 + $0xfb0] sm:$0xff]  }
0x16fa   :  { %12283 = vmatpush3.bf16.msra.mxu1 %v13025_v47  ;;  %12262 = vmatprep.subr.bf16.mxu0 %v13026_v21  ;;  %v13066_v47 = vld [vmem:[%s16157_s5 + $0xf78] sm:$0xff]  }
0x16fb   :  { %12284 = vmatprep.subr.bf16.mxu1 %v13027_v50  ;;  %v13067_v21 = vld [vmem:[%s16157_s5 + $0xff8] sm:$0xff]   ;;  %v8258_v50 = vmax.f32 %v8199_v39, 0.0 }
0x16fd   :  { %12263 = vmatpush3.bf16.msra.mxu0 %v13028_v11  ;;  %v13069_v11 = vld [vmem:[%s16157_s5 + $0xfb8] sm:$0xff]  }
0x16fe   :  { %12285 = vmatpush3.bf16.msra.mxu1 %v13029_v33  ;;  %12264 = vmatprep.subr.bf16.mxu0 %v13030_v60  ;;  %v8274_v33 = vpack.c.bf16 %v8258_v50, %v8258_v50  ;;  %v8276_v60 = vpack.c.bf16 %v8260_v51, %v8260_v51 }
0x16ff   :  { %12286 = vmatprep.subr.bf16.mxu1 %v13031_v55 }
0x1701   :  { %12265 = vmatpush3.bf16.msra.mxu0 %v13032_v57 }
0x1702   :  { %12287 = vmatpush3.bf16.msra.mxu1 %v13033_v31  ;;  %12266 = vmatprep.subr.bf16.mxu0 %v13034_v2 }
0x1703   :  { %12288 = vmatprep.subr.bf16.mxu1 %v13035_v3 }
0x1705   :  { %12267 = vmatpush3.bf16.msra.mxu0 %v13036_v34 }
0x1706   :  { %12289 = vmatpush3.bf16.msra.mxu1 %v13037_v63  ;;  %12296 = vmatprep.subr.bf16.mxu0 %v13038_v52 }
0x1707   :  { %12318 = vmatprep.subr.bf16.mxu1 %v13039_v5 }
0x1708   :  { %9501 = vmatmul.mubr.bf16.vlgmr.msra.gmra.mrb[128].mxu0 %v8270_v59 }
0x1709   :  { %9541 = vmatmul.mubr.bf16.vlgmr.msra.gmra.mrb[128].mxu1 %v8272_v7  ;;  %12297 = vmatpush3.bf16.msra.mxu0 %v13040_v20 }
0x170a   :  { %9580 = vmatprep.mubr.bf16.mxu0 %v8275_v32  ;;  %12319 = vmatpush3.bf16.msra.mxu1 %v13041_v48 }
0x170b   :  { %9620 = vmatprep.mubr.bf16.mxu1 %v8277_v9  ;;  %12298 = vmatprep.subr.bf16.mxu0 %v13042_v35 }
0x170c   :  { %12320 = vmatprep.subr.bf16.mxu1 %v13043_v8 }
0x170d   :  { %12299 = vmatpush3.bf16.msra.mxu0 %v13044_v44 }
0x170e   :  { %12321 = vmatpush3.bf16.msra.mxu1 %v13045_v12  ;;  %12300 = vmatprep.subr.bf16.mxu0 %v13046_v13 }
0x170f   :  { %12322 = vmatprep.subr.bf16.mxu1 %v13047_v14 }
0x1711   :  { %12301 = vmatpush3.bf16.msra.mxu0 %v13048_v54 }
0x1712   :  { %12323 = vmatpush3.bf16.msra.mxu1 %v13049_v15  ;;  %12302 = vmatprep.subr.bf16.mxu0 %v13050_v16 }
0x1713   :  { %12324 = vmatprep.subr.bf16.mxu1 %v13051_v17 }
0x1715   :  { %12303 = vmatpush3.bf16.msra.mxu0 %v13052_v18 }
0x1716   :  { %12325 = vmatpush3.bf16.msra.mxu1 %v13053_v29  ;;  %12304 = vmatprep.subr.bf16.mxu0 %v13054_v43 }
0x1717   :  { %12326 = vmatprep.subr.bf16.mxu1 %v13055_v23 }
0x1719   :  { %12305 = vmatpush3.bf16.msra.mxu0 %v13056_v24 }
0x171a   :  { %12327 = vmatpush3.bf16.msra.mxu1 %v13057_v10  ;;  %12306 = vmatprep.subr.bf16.mxu0 %v13058_v27 }
0x171b   :  { %12328 = vmatprep.subr.bf16.mxu1 %v13059_v25 }
0x171d   :  { %12307 = vmatpush3.bf16.msra.mxu0 %v13060_v28 }
0x171e   :  { %12329 = vmatpush3.bf16.msra.mxu1 %v13061_v40  ;;  %12308 = vmatprep.subr.bf16.mxu0 %v13062_v46 }
0x171f   :  { %12330 = vmatprep.subr.bf16.mxu1 %v13063_v4 }
0x1721   :  { %12309 = vmatpush3.bf16.msra.mxu0 %v13064_v42 }
0x1722   :  { %12331 = vmatpush3.bf16.msra.mxu1 %v13065_v38  ;;  %12310 = vmatprep.subr.bf16.mxu0 %v13066_v47 }
0x1723   :  { %12332 = vmatprep.subr.bf16.mxu1 %v13067_v21 }
0x1725   :  { %12311 = vmatpush3.bf16.msra.mxu0 %v13068_v19 }
0x1726   :  { %12333 = vmatpush3.bf16.msra.mxu1 %v13069_v11  ;;  %12533 = vmatprep.subr.bf16.mxu0 %v13241_v0 }
0x1728   :  { %9581 = vmatmul.mubr.bf16.vlgmr.msra.gmra.mrb[132].mxu0 %v8274_v33  ;;  %v11582_v33 = vld [vmem:[#allocation8 + $0x1f] ss:$0 sm:$0xff] }
0x1729   :  { %9621 = vmatmul.mubr.bf16.vlgmr.msra.gmra.mrb[132].mxu1 %v8276_v60  ;;  %12467 = vmatprep.mubr.msk.f32.mxu0 %vm13242_vm0, %v13243_v1 }
0x179b   :  { %v12180_v53 = vpop.f32.mrb[120].mxu0  ;;  %v12202_v55 = vpop.f32.mrb[120].mxu1 }
0x179c   :  { %v12181_v56 = vpop.f32.mrb[121].mxu0  ;;  %v12203_v57 = vpop.f32.mrb[121].mxu1 }
0x179d   :  { %v12182_v37 = vadd.f32 %v12181_v56, %v12180_v53  ;;  %v12204_v31 = vadd.f32 %v12203_v57, %v12202_v55  ;;  %v12183_v22 = vpop.f32.mrb[122].mxu0  ;;  %v12205_v2 = vpop.f32.mrb[122].mxu1  ;;  %v11583_v53 = vld [vmem:[#allocation8 + $0x20] ss:$0 sm:$0xff] }
0x179e   :  { %v12184_v61 = vpop.f32.mrb[123].mxu0  ;;  %v12206_v3 = vpop.f32.mrb[123].mxu1  ;;  %v9679_v2 = vld [vmem:[#allocation10] sm:$0xff] }
0x179f   :  { %v9343_v58 = vadd.f32 %v12182_v37, %v11453_v30  ;;  %v9680_v61 = vld [vmem:[#allocation10 + $0x8] sm:$0xff] }
0x17a0   :  { %v12534_v3 = vpack.c.bf16 %v9680_v61, %v9679_v2 }
0x17a1   :  { %v9383_v26 = vadd.f32 %v12204_v31, %v9343_v58  ;;  %v9681_v58 = vld [vmem:[#allocation10 + $0x10] sm:$0xff] }
0x17a2   :  { %12535 = vmatpush3.bf16.msra.mxu0 %v12534_v3 }
0x17a3   :  { %12536 = vmatprep.subr.bf16.mxu0 %v13241_v0 }
0x17bb   :  { %v12224_v34 = vpop.f32.mrb[124].mxu0  ;;  %v12246_v62 = vpop.f32.mrb[124].mxu1 }
0x17bc   :  { %v12225_v63 = vpop.f32.mrb[125].mxu0  ;;  %v12247_v52 = vpop.f32.mrb[125].mxu1 }
0x17bd   :  { %v12226_v41 = vadd.f32 %v12225_v63, %v12224_v34  ;;  %v12248_v5 = vadd.f32 %v12247_v52, %v12246_v62  ;;  %v12227_v1 = vpop.f32.mrb[126].mxu0  ;;  %v12249_v6 = vpop.f32.mrb[126].mxu1  ;;  %v9683_v62 = vld [vmem:[#allocation10 + $0x20] sm:$0xff]  ;;  %v9684_v63 = vld [vmem:[#allocation10 + $0x28] sm:$0xff] }
0x17be   :  { %v12228_v45 = vpop.f32.mrb[127].mxu0  ;;  %v12250_v20 = vpop.f32.mrb[127].mxu1  ;;  %v12540_v52 = vpack.c.bf16 %v9684_v63, %v9683_v62 }
0x17bf   :  { %v9423_v59 = vadd.f32 %v12226_v41, %v9383_v26  ;;  %v9682_v26 = vld [vmem:[#allocation10 + $0x18] sm:$0xff]  ;;  %v9685_v41 = vld [vmem:[#allocation10 + $0x30] sm:$0xff] }
0x17c0   :  { %v12537_v34 = vpack.c.bf16 %v9682_v26, %v9681_v58 }
0x17c1   :  { %v9463_v48 = vadd.f32 %v12248_v5, %v9423_v59  ;;  %v9686_v5 = vld [vmem:[#allocation10 + $0x38] sm:$0xff] }
0x17c2   :  { %12538 = vmatpush3.bf16.msra.mxu0 %v12537_v34  ;;  %v12543_v1 = vpack.c.bf16 %v9686_v5, %v9685_v41 }
0x17c3   :  { %12539 = vmatprep.subr.bf16.mxu0 %v13241_v0 }
0x17c6   :  { %12541 = vmatpush3.bf16.msra.mxu0 %v12540_v52 }
0x17c7   :  { %12542 = vmatprep.subr.bf16.mxu0 %v13241_v0  ;;  %v11586_v0 = vld [vmem:[%s16161_s9] ss:$0 sm:$0xff] }
0x17ca   :  { %12544 = vmatpush3.bf16.msra.mxu0 %v12543_v1 }
0x17db   :  { %v12268_v7 = vpop.f32.mrb[128].mxu0 }
0x17dc   :  { %v12290_v35 = vpop.f32.mrb[128].mxu1  ;;  %v12269_v32 = vpop.f32.mrb[129].mxu0 }
0x17dd   :  { %v12270_v8 = vadd.f32 %v12269_v32, %v12268_v7  ;;  %v12291_v9 = vpop.f32.mrb[129].mxu1  ;;  %v12271_v44 = vpop.f32.mrb[130].mxu0 }
0x17de   :  { %v12292_v12 = vadd.f32 %v12291_v9, %v12290_v35  ;;  %v12293_v13 = vpop.f32.mrb[130].mxu1  ;;  %v12272_v14 = vpop.f32.mrb[131].mxu0  ;;  %v11585_v35 = vld [vmem:[#allocation8 + $0x22] ss:$0 sm:$0xff] }
0x17df   :  { %v9503_v54 = vadd.f32 %v12270_v8, %v9463_v48  ;;  %v12294_v15 = vpop.f32.mrb[131].mxu1  ;;  %v11584_v48 = vld [vmem:[#allocation8 + $0x21] ss:$0 sm:$0xff] }
0x17e1   :  { %v9543_v16 = vadd.f32 %v12292_v12, %v9503_v54 }
0x17fb   :  { %v12312_v17 = vpop.f32.mrb[132].mxu0 }
0x17fc   :  { %v12334_v18 = vpop.f32.mrb[132].mxu1  ;;  %v12313_v29 = vpop.f32.mrb[133].mxu0 }
0x17fd   :  { %v12314_v43 = vadd.f32 %v12313_v29, %v12312_v17  ;;  %v12335_v23 = vpop.f32.mrb[133].mxu1  ;;  %v12315_v24 = vpop.f32.mrb[134].mxu0 }
0x17fe   :  { %v12336_v10 = vadd.f32 %v12335_v23, %v12334_v18  ;;  %v12337_v27 = vpop.f32.mrb[134].mxu1  ;;  %v12316_v25 = vpop.f32.mrb[135].mxu0 }
0x17ff   :  { %v9583_v28 = vadd.f32 %v12314_v43, %v9543_v16  ;;  %v12338_v36 = vpop.f32.mrb[135].mxu1 }
0x1801   :  { %v9623_v40 = vadd.f32 %v12336_v10, %v9583_v28 }
0x1803   :  { %v9628_v46 = vadd.f32 %v9623_v40, %v15545_v49 }
0x1805   :  { %v9629_v4 = vsel %vm198_vm2, %v9628_v46, 0.0 }
0x1806   :  { %9630 = vadd.xlane.f32.xlu1 %v9629_v4 }
0x1893   :  { %v9631_v42 = vpop.xlane.xlu1 %9630 }
0x1894   :  { %v9632_v39 = vmul.f32 0.015625, %v9631_v42 }
0x1896   :  { %v9633_v38 = vsub.f32 %v9628_v46, %v9632_v39 }
0x1898   :  { %v9634_v47 = vmul.f32 %v9633_v38, %v9633_v38 }
0x189a   :  { %v9635_v21 = vsel %vm198_vm2, %v9634_v47, 0.0 }
0x189b   :  { %9636 = vadd.xlane.f32.xlu1 %v9635_v21 }
0x1928   :  { %v9637_v19 = vpop.xlane.xlu1 %9636 }
0x1929   :  { %v9638_v50 = vmul.f32 0.015625, %v9637_v19 }
0x192b   :  { %v9639_v11 = vadd.f32 1e-05, %v9638_v50 }
0x192d   :  { %13090 = vrsqrt.f32 %v9639_v11 }
0x1937   :  { %v13091_v51 = vpop.eup %13090 }
0x1938   :  { %v9641_v60 = vmul.f32 %v13091_v51, %v9633_v38 }
0x193a   :  { %v9647_v55 = vmul.f32 %v11582_v33, %v9641_v60 }
0x193c   :  { %v9653_v49 = vadd.f32 %v11583_v53, %v9647_v55 }
0x193e   :  { %v9654_v30 = vsel %vm198_vm2, %v9653_v49, 0.0 }
0x193f   :  { %9655 = vadd.xlane.f32.xlu0 %v9654_v30 }
0x19cc   :  { %v9656_v56 = vpop.xlane.xlu0 %9655 }
0x19cd   :  { %v9657_v57 = vmul.f32 0.015625, %v9656_v56 }
0x19cf   :  { %v9658_v37 = vsub.f32 %v9653_v49, %v9657_v57 }
0x19d1   :  { %v9659_v31 = vmul.f32 %v9658_v37, %v9658_v37 }
0x19d3   :  { %v9660_v22 = vsel %vm198_vm2, %v9659_v31, 0.0 }
0x19d4   :  { %9661 = vadd.xlane.f32.xlu1 %v9660_v22 }
0x1a61   :  { %v9662_v6 = vpop.xlane.xlu1 %9661 }
0x1a62   :  { %v9663_v45 = vmul.f32 0.015625, %v9662_v6 }
0x1a64   :  { %v9664_v20 = vadd.f32 1e-05, %v9663_v45 }
0x1a66   :  { %13092 = vrsqrt.f32 %v9664_v20 }
0x1a70   :  { %v13093_v59 = vpop.eup %13092 }
0x1a71   :  { %v9666_v7 = vmul.f32 %v13093_v59, %v9658_v37 }
0x1a73   :  { %v9672_v32 = vmul.f32 %v11584_v48, %v9666_v7 }
0x1a75   :  { %v9678_v8 = vadd.f32 %v11585_v35, %v9672_v32 }
0x1a77   :  { %12468 = vmatmul.mubr.msk.f32.vlgmr.msra.gmra.mrb[70].mxu0 %vm198_vm2, %v9678_v8 }
0x1b4a   :  { %v9763_v9 = vpop.f32.mrb[70].mxu0 }
0x1b4b   :  { %v9764_v44 = vadd.f32 %v11586_v0, %v9763_v9  ;;  %v12469_v12 = vpop.f32.mrb[71].mxu0 }
0x1b4d   :  { %9767 = vst [vmem:[#allocation11] sm:$0xff] %v9764_v44 }
0x1b4e   :  { %13215 = shalt.err (!%p13212_p2)
}
0x1b4f   :  { %s13216_s8 = scalar_lea.hbm %s16162_s10, 128 }
0x1b50   :  { %p13217_p3 = scmp.ne.s32.totalorder %s16162_s10, %s13216_s8  ;;  %p13220_p4 = scmp.lt.u32.totalorder %s13216_s8, %s16162_s10 }
0x1b52   :  { %p13222_p5 = pnand %p13220_p4, %p13217_p3 }
0x1b54   :  { %13225 = shalt.err (!%p13222_p5)
}
0x1b55   :  { %9777 = dma.vmem_to_hbm [thread:$0]  %s9775_s16, 128, %s16162_s10, [#allocation4]  }
0x1b56   :  { %13232 = dma.done.wait [#allocation4], 128  }
0x1b57   :  { %13233 = vsyncadd [#allocation4], 4294967168 }
0x1b58   :  { %9781 = vsyncpa [#allocation3], 1 }
0x1b59   :  { %9782 = vsyncpa [#allocation6], 1 }
0x1b5a   :  { %9783 = vsyncpa [#allocation9], 1 }
0x1b5b   :  { %9784 = vsyncpa [#allocation4], 1 }

</bundles_post_ra>
